<compile_context>
chip_gen: v6e
topology: v6e:2x2x1
jax: 0.10.0
libtpu: 0.0.40
codegen_flags: <defaults>
</compile_context>

<pallas_src>
import functools

import jax
import jax.numpy as jnp
from jax.experimental import pallas as pl
from jax.experimental.pallas import tpu as pltpu

NEG_SLOPE = 0.01
NUM_LAYERS = 3


# ----------------------------------------------------------------------------
# Fused Pallas kernel: whole 3-layer HeteroRGCN forward, resident in VMEM
# ----------------------------------------------------------------------------
def _rgcn_forward_kernel(x_ref, a_ref, w_ref, b_ref, o_ref, h_ref, hn_ref,
                         *, src_ids, dst_ids, out_t, num_etypes):
    """x_ref : [T,  Np, Dp] f32   padded input features per node type
       a_ref : [E,  Np, Np] bf16  row-normalized adjacency per canonical etype
       w_ref : [3E, Dp, Dp] bf16  per-(layer, etype) weight, stored [in, out]
       b_ref : [3E, 1,  Dp] f32   per-(layer, etype) bias
       o_ref : [Np, Dp]     f32   padded output features of the requested ntype
       h_ref / hn_ref : [T, Np, Dp] f32 scratch (current / next hidden state)
    """
    h_ref[...] = x_ref[...]
    for layer in range(NUM_LAYERS):
        hn_ref[...] = jnp.zeros_like(hn_ref)
        for ei in range(num_etypes):
            s = src_ids[ei]
            d = dst_ids[ei]
            idx = layer * num_etypes + ei
            # Per-etype Linear: Wh = X @ W + b   (bf16 MXU, f32 accumulate).
            wh = jnp.dot(h_ref[s].astype(jnp.bfloat16), w_ref[idx],
                         preferred_element_type=jnp.float32)
            wh = wh + b_ref[idx]                      # f32 bias broadcast
            # Mean over incoming edges (row-normalized A) + cross-etype 'sum'.
            hn_ref[d] = hn_ref[d] + jnp.dot(
                a_ref[ei], wh.astype(jnp.bfloat16),
                preferred_element_type=jnp.float32)
        if layer < NUM_LAYERS - 1:
            v = hn_ref[...]
            h_ref[...] = jnp.where(v >= 0, v, NEG_SLOPE * v)  # leaky_relu (f32)
    o_ref[...] = hn_ref[out_t]                        # layer3: no activation


def rgcn_forward_fused(x_all, a_all, w_all, b_all, *, src_ids, dst_ids, out_t):
    t, np_pad, dp_pad = x_all.shape
    e = a_all.shape[0]
    kern = functools.partial(
        _rgcn_forward_kernel,
        src_ids=tuple(src_ids), dst_ids=tuple(dst_ids),
        out_t=out_t, num_etypes=e)
    return pl.pallas_call(
        kern,
        out_shape=jax.ShapeDtypeStruct((np_pad, dp_pad), jnp.float32),
        grid=(1,),
        in_specs=[
            pl.BlockSpec((t, np_pad, dp_pad), lambda i: (0, 0, 0)),
            pl.BlockSpec((e, np_pad, np_pad), lambda i: (0, 0, 0)),
            pl.BlockSpec((NUM_LAYERS * e, dp_pad, dp_pad), lambda i: (0, 0, 0)),
            pl.BlockSpec((NUM_LAYERS * e, 1, dp_pad), lambda i: (0, 0, 0)),
        ],
        out_specs=pl.BlockSpec((np_pad, dp_pad), lambda i: (0, 0)),
        scratch_shapes=[pltpu.VMEM((t, np_pad, dp_pad), jnp.float32),
                        pltpu.VMEM((t, np_pad, dp_pad), jnp.float32)],
        compiler_params=pltpu.CompilerParams(
            dimension_semantics=("arbitrary",)),
    )(x_all, a_all, w_all, b_all)


# ----------------------------------------------------------------------------
# Packing: pad node counts / feature dims to lane-dense 128x128 tiles
# ----------------------------------------------------------------------------
def pack_model(input_dict, params, adj, ntypes, canonical_etypes,
               np_pad, dp_pad):
    t = len(ntypes)
    e = len(canonical_etypes)
    tidx = {nt: i for i, nt in enumerate(ntypes)}

    x_all = jnp.zeros((t, np_pad, dp_pad), jnp.float32)
    for nt in ntypes:
        x = input_dict[nt]
        x_all = x_all.at[tidx[nt], :x.shape[0], :x.shape[1]].set(x)

    a_all = jnp.zeros((e, np_pad, np_pad), jnp.float32)
    src_ids, dst_ids = [], []
    for ei, cet in enumerate(canonical_etypes):
        s, _et, d = cet
        a = adj[cet]
        a_all = a_all.at[ei, :a.shape[0], :a.shape[1]].set(a)
        src_ids.append(tidx[s])
        dst_ids.append(tidx[d])

    w_all = jnp.zeros((NUM_LAYERS * e, dp_pad, dp_pad), jnp.float32)
    b_all = jnp.zeros((NUM_LAYERS * e, 1, dp_pad), jnp.float32)
    for li, lname in enumerate(("layer1", "layer2", "layer3")):
        for ei, cet in enumerate(canonical_etypes):
            w, b = params[lname][cet]
            w_all = w_all.at[li * e + ei, :w.shape[0], :w.shape[1]].set(w)
            b_all = b_all.at[li * e + ei, :, :b.shape[1]].set(b)

    # bf16 for MXU operands (adjacency + weights); bias / accumulation in f32.
    return (x_all, a_all.astype(jnp.bfloat16), w_all.astype(jnp.bfloat16),
            b_all, src_ids, dst_ids, tidx)


# ----------------------------------------------------------------------------
# Pure-JAX reference (f32) for a sanity check
# ----------------------------------------------------------------------------
def reference_forward(input_dict, params, adj, canonical_etypes, out_key):
    def layer(feat, lparams, act):
        agg = {}
        for cet in canonical_etypes:
            s, _et, d = cet
            w, b = lparams[cet]
            part = adj[cet] @ (feat[s] @ w + b)
            agg[d] = agg.get(d, 0.0) + part
        if act:
            agg = {k: jnp.where(v >= 0, v, NEG_SLOPE * v) for k, v in agg.items()}
        return agg

    h = layer(input_dict, params["layer1"], True)
    h = layer(h, params["layer2"], True)
    h = layer(h, params["layer3"], False)
    return h[out_key]


# ----------------------------------------------------------------------------
# Deterministic parameter / graph construction
# ----------------------------------------------------------------------------
def make_linear_params(key, in_dim, out_dim):
    """PyTorch nn.Linear-style uniform init, W stored as [in_dim, out_dim]."""
    kw, kb = jax.random.split(key)
    bound = 1.0 / (in_dim ** 0.5)
    w = jax.random.uniform(kw, (in_dim, out_dim), jnp.float32, -bound, bound)
    b = jax.random.uniform(kb, (1, out_dim), jnp.float32, -bound, bound)
    return w, b


def make_adjacency(key, n_dst, n_src):
    """Random 0/1 adjacency, row-normalized (mean aggregation)."""
    mask = jax.random.bernoulli(key, p=0.4, shape=(n_dst, n_src)).astype(jnp.float32)
    deg = jnp.sum(mask, axis=1, keepdims=True)
    return mask / jnp.maximum(deg, 1.0)  # degree-0 rows stay all-zero (DGL default)


if __name__ == "__main__":
    key = jax.random.PRNGKey(0)

    # Small heterogeneous graph: every ntype is both a source and a destination.
    ntype_sizes = {"user": 12, "item": 10, "tag": 6}
    ntypes = list(ntype_sizes)
    canonical_etypes = [
        ("user", "follows", "user"),
        ("user", "likes", "item"),
        ("item", "liked-by", "user"),
        ("item", "tagged", "tag"),
        ("tag", "tags", "item"),
    ]
    in_size, hidden_size, out_size = 16, 32, 8
    out_key = "item"

    # Padded tile sizes: one full, lane-dense MXU tile covers every operand.
    NP = 128   # padded node count per ntype
    DP = 128   # padded feature dim (>= in/hidden/out sizes)

    # Adjacency per canonical etype.
    adj = {}
    for cet in canonical_etypes:
        key, sub = jax.random.split(key)
        src, _e, dst = cet
        adj[cet] = make_adjacency(sub, ntype_sizes[dst], ntype_sizes[src])

    # Per-layer, per-etype Linear parameters.
    layer_dims = {
        "layer1": (in_size, hidden_size),
        "layer2": (hidden_size, hidden_size),
        "layer3": (hidden_size, out_size),
    }
    params = {}
    for lname, (din, dout) in layer_dims.items():
        params[lname] = {}
        for cet in canonical_etypes:
            key, sub = jax.random.split(key)
            params[lname][cet] = make_linear_params(sub, din, dout)

    # Input node features (G.nodes[ntype].data['inp']).
    input_dict = {}
    for ntype, n in ntype_sizes.items():
        key, sub = jax.random.split(key)
        input_dict[ntype] = jax.random.normal(sub, (n, in_size), jnp.float32)

    # Pack into padded, stacked kernel operands and run the fused kernel.
    (x_all, a_all, w_all, b_all,
     src_ids, dst_ids, tidx) = pack_model(
        input_dict, params, adj, ntypes, canonical_etypes, NP, DP)

    out_padded = rgcn_forward_fused(
        x_all, a_all, w_all, b_all,
        src_ids=src_ids, dst_ids=dst_ids, out_t=tidx[out_key])
    out = out_padded[:ntype_sizes[out_key], :out_size]
    out = jax.block_until_ready(out)

    assert out.shape == (ntype_sizes[out_key], out_size)
    assert jnp.all(jnp.isfinite(out))

    # Sanity check against an f32 pure-JAX reference (bf16 MXU -> loose tol).
    ref = reference_forward(input_dict, params, adj, canonical_etypes, out_key)
    assert jnp.allclose(out, ref, rtol=5e-2, atol=5e-2)

    print("KERNEL_OK")
</pallas_src>

<mosaic_0001>
module attributes {stable_mosaic.version = 11 : i64} {
  func.func @_rgcn_forward_kernel(%arg0: i32, %arg1: memref<3x128x128xf32, #tpu.memory_space<vmem>>, %arg2: memref<5x128x128xbf16, #tpu.memory_space<vmem>>, %arg3: memref<15x128x128xbf16, #tpu.memory_space<vmem>>, %arg4: memref<15x1x128xf32, #tpu.memory_space<vmem>>, %arg5: memref<128x128xf32, #tpu.memory_space<vmem>>, %arg6: memref<3x128x128xf32, #tpu.memory_space<vmem>>, %arg7: memref<3x128x128xf32, #tpu.memory_space<vmem>>) attributes {dimension_semantics = [#tpu.dimension_semantics<arbitrary>], iteration_bounds = array<i64: 1>, scalar_prefetch = 0 : i64, scratch_operands = 2 : i64, tpu.core_type = #tpu.core_type<tc>, window_params = [{pipeline_mode = #tpu.pipeline_mode<synchronous>, transform_indices = @transform_0, window_bounds = array<i64: 3, 128, 128>}, {pipeline_mode = #tpu.pipeline_mode<synchronous>, transform_indices = @transform_1, window_bounds = array<i64: 5, 128, 128>}, {pipeline_mode = #tpu.pipeline_mode<synchronous>, transform_indices = @transform_2, window_bounds = array<i64: 15, 128, 128>}, {pipeline_mode = #tpu.pipeline_mode<synchronous>, transform_indices = @transform_3, window_bounds = array<i64: 15, 1, 128>}, {pipeline_mode = #tpu.pipeline_mode<synchronous>, transform_indices = @transform_4, window_bounds = array<i64: 128, 128>}]} {
    %c0 = arith.constant 0 : index
    %c0_0 = arith.constant 0 : index
    %c0_1 = arith.constant 0 : index
    %0 = vector.load %arg1[%c0, %c0_0, %c0_1] : memref<3x128x128xf32, #tpu.memory_space<vmem>>, vector<3x128x128xf32>
    %c0_2 = arith.constant 0 : index
    %c0_3 = arith.constant 0 : index
    %c0_4 = arith.constant 0 : index
    %1 = vector.load %arg6[%c0_2, %c0_3, %c0_4] : memref<3x128x128xf32, #tpu.memory_space<vmem>>, vector<3x128x128xf32>
    tpu.vector_store %arg6[%c0_2, %c0_3, %c0_4], %0 {strides = array<i32>} : memref<3x128x128xf32, #tpu.memory_space<vmem>>, vector<3x128x128xf32>,
    %cst = arith.constant 0.000000e+00 : f32
    %2 = vector.broadcast %cst : f32 to vector<3x128x128xf32>
    %c0_5 = arith.constant 0 : index
    %c0_6 = arith.constant 0 : index
    %c0_7 = arith.constant 0 : index
    %3 = vector.load %arg7[%c0_5, %c0_6, %c0_7] : memref<3x128x128xf32, #tpu.memory_space<vmem>>, vector<3x128x128xf32>
    tpu.vector_store %arg7[%c0_5, %c0_6, %c0_7], %2 {strides = array<i32>} : memref<3x128x128xf32, #tpu.memory_space<vmem>>, vector<3x128x128xf32>,
    %c0_8 = arith.constant 0 : index
    %c0_9 = arith.constant 0 : index
    %c0_10 = arith.constant 0 : index
    %4 = vector.load %arg6[%c0_8, %c0_9, %c0_10] : memref<3x128x128xf32, #tpu.memory_space<vmem>>, vector<1x128x128xf32>
    %5 = vector.shape_cast %4 : vector<1x128x128xf32> to vector<128x128xf32>
    %6 = arith.truncf %5 : vector<128x128xf32> to vector<128x128xbf16>
    %c0_11 = arith.constant 0 : index
    %c0_12 = arith.constant 0 : index
    %c0_13 = arith.constant 0 : index
    %7 = vector.load %arg3[%c0_11, %c0_12, %c0_13] : memref<15x128x128xbf16, #tpu.memory_space<vmem>>, vector<1x128x128xbf16>
    %8 = vector.shape_cast %7 : vector<1x128x128xbf16> to vector<128x128xbf16>
    %cst_14 = arith.constant dense<0.000000e+00> : vector<128x128xf32>
    %9 = tpu.matmul %6, %8, %cst_14 {dimension_numbers = #tpu.dot_dimension_numbers<[1], [0], [0], [1], [0, 0, 1, 1], [], []>} : vector<128x128xbf16>, vector<128x128xbf16>, vector<128x128xf32> -> vector<128x128xf32>
    %c0_15 = arith.constant 0 : index
    %c0_16 = arith.constant 0 : index
    %c0_17 = arith.constant 0 : index
    %10 = vector.load %arg4[%c0_15, %c0_16, %c0_17] : memref<15x1x128xf32, #tpu.memory_space<vmem>>, vector<1x1x128xf32>
    %11 = vector.shape_cast %10 : vector<1x1x128xf32> to vector<1x128xf32>
    %12 = vector.broadcast %11 : vector<1x128xf32> to vector<128x128xf32>
    %13 = arith.addf %9, %12 : vector<128x128xf32>
    %c0_18 = arith.constant 0 : index
    %c0_19 = arith.constant 0 : index
    %c0_20 = arith.constant 0 : index
    %14 = vector.load %arg7[%c0_18, %c0_19, %c0_20] : memref<3x128x128xf32, #tpu.memory_space<vmem>>, vector<1x128x128xf32>
    %15 = vector.shape_cast %14 : vector<1x128x128xf32> to vector<128x128xf32>
    %c0_21 = arith.constant 0 : index
    %c0_22 = arith.constant 0 : index
    %c0_23 = arith.constant 0 : index
    %16 = vector.load %arg2[%c0_21, %c0_22, %c0_23] : memref<5x128x128xbf16, #tpu.memory_space<vmem>>, vector<1x128x128xbf16>
    %17 = vector.shape_cast %16 : vector<1x128x128xbf16> to vector<128x128xbf16>
    %18 = arith.truncf %13 : vector<128x128xf32> to vector<128x128xbf16>
    %cst_24 = arith.constant dense<0.000000e+00> : vector<128x128xf32>
    %19 = tpu.matmul %17, %18, %cst_24 {dimension_numbers = #tpu.dot_dimension_numbers<[1], [0], [0], [1], [0, 0, 1, 1], [], []>} : vector<128x128xbf16>, vector<128x128xbf16>, vector<128x128xf32> -> vector<128x128xf32>
    %20 = arith.addf %15, %19 : vector<128x128xf32>
    %c0_25 = arith.constant 0 : index
    %c0_26 = arith.constant 0 : index
    %c0_27 = arith.constant 0 : index
    %21 = vector.load %arg7[%c0_25, %c0_26, %c0_27] : memref<3x128x128xf32, #tpu.memory_space<vmem>>, vector<1x128x128xf32>
    %22 = vector.shape_cast %21 : vector<1x128x128xf32> to vector<128x128xf32>
    %23 = vector.shape_cast %20 : vector<128x128xf32> to vector<1x128x128xf32>
    tpu.vector_store %arg7[%c0_25, %c0_26, %c0_27], %23 {strides = array<i32>} : memref<3x128x128xf32, #tpu.memory_space<vmem>>, vector<1x128x128xf32>,
    %c0_28 = arith.constant 0 : index
    %c0_29 = arith.constant 0 : index
    %c0_30 = arith.constant 0 : index
    %24 = vector.load %arg6[%c0_28, %c0_29, %c0_30] : memref<3x128x128xf32, #tpu.memory_space<vmem>>, vector<1x128x128xf32>
    %25 = vector.shape_cast %24 : vector<1x128x128xf32> to vector<128x128xf32>
    %26 = arith.truncf %25 : vector<128x128xf32> to vector<128x128xbf16>
    %c1 = arith.constant 1 : index
    %c0_31 = arith.constant 0 : index
    %c0_32 = arith.constant 0 : index
    %27 = vector.load %arg3[%c1, %c0_31, %c0_32] : memref<15x128x128xbf16, #tpu.memory_space<vmem>>, vector<1x128x128xbf16>
    %28 = vector.shape_cast %27 : vector<1x128x128xbf16> to vector<128x128xbf16>
    %cst_33 = arith.constant dense<0.000000e+00> : vector<128x128xf32>
    %29 = tpu.matmul %26, %28, %cst_33 {dimension_numbers = #tpu.dot_dimension_numbers<[1], [0], [0], [1], [0, 0, 1, 1], [], []>} : vector<128x128xbf16>, vector<128x128xbf16>, vector<128x128xf32> -> vector<128x128xf32>
    %c1_34 = arith.constant 1 : index
    %c0_35 = arith.constant 0 : index
    %c0_36 = arith.constant 0 : index
    %30 = vector.load %arg4[%c1_34, %c0_35, %c0_36] : memref<15x1x128xf32, #tpu.memory_space<vmem>>, vector<1x1x128xf32>
    %31 = vector.shape_cast %30 : vector<1x1x128xf32> to vector<1x128xf32>
    %32 = vector.broadcast %31 : vector<1x128xf32> to vector<128x128xf32>
    %33 = arith.addf %29, %32 : vector<128x128xf32>
    %c1_37 = arith.constant 1 : index
    %c0_38 = arith.constant 0 : index
    %c0_39 = arith.constant 0 : index
    %34 = vector.load %arg7[%c1_37, %c0_38, %c0_39] : memref<3x128x128xf32, #tpu.memory_space<vmem>>, vector<1x128x128xf32>
    %35 = vector.shape_cast %34 : vector<1x128x128xf32> to vector<128x128xf32>
    %c1_40 = arith.constant 1 : index
    %c0_41 = arith.constant 0 : index
    %c0_42 = arith.constant 0 : index
    %36 = vector.load %arg2[%c1_40, %c0_41, %c0_42] : memref<5x128x128xbf16, #tpu.memory_space<vmem>>, vector<1x128x128xbf16>
    %37 = vector.shape_cast %36 : vector<1x128x128xbf16> to vector<128x128xbf16>
    %38 = arith.truncf %33 : vector<128x128xf32> to vector<128x128xbf16>
    %cst_43 = arith.constant dense<0.000000e+00> : vector<128x128xf32>
    %39 = tpu.matmul %37, %38, %cst_43 {dimension_numbers = #tpu.dot_dimension_numbers<[1], [0], [0], [1], [0, 0, 1, 1], [], []>} : vector<128x128xbf16>, vector<128x128xbf16>, vector<128x128xf32> -> vector<128x128xf32>
    %40 = arith.addf %35, %39 : vector<128x128xf32>
    %c1_44 = arith.constant 1 : index
    %c0_45 = arith.constant 0 : index
    %c0_46 = arith.constant 0 : index
    %41 = vector.load %arg7[%c1_44, %c0_45, %c0_46] : memref<3x128x128xf32, #tpu.memory_space<vmem>>, vector<1x128x128xf32>
    %42 = vector.shape_cast %41 : vector<1x128x128xf32> to vector<128x128xf32>
    %43 = vector.shape_cast %40 : vector<128x128xf32> to vector<1x128x128xf32>
    tpu.vector_store %arg7[%c1_44, %c0_45, %c0_46], %43 {strides = array<i32>} : memref<3x128x128xf32, #tpu.memory_space<vmem>>, vector<1x128x128xf32>,
    %c1_47 = arith.constant 1 : index
    %c0_48 = arith.constant 0 : index
    %c0_49 = arith.constant 0 : index
    %44 = vector.load %arg6[%c1_47, %c0_48, %c0_49] : memref<3x128x128xf32, #tpu.memory_space<vmem>>, vector<1x128x128xf32>
    %45 = vector.shape_cast %44 : vector<1x128x128xf32> to vector<128x128xf32>
    %46 = arith.truncf %45 : vector<128x128xf32> to vector<128x128xbf16>
    %c2 = arith.constant 2 : index
    %c0_50 = arith.constant 0 : index
    %c0_51 = arith.constant 0 : index
    %47 = vector.load %arg3[%c2, %c0_50, %c0_51] : memref<15x128x128xbf16, #tpu.memory_space<vmem>>, vector<1x128x128xbf16>
    %48 = vector.shape_cast %47 : vector<1x128x128xbf16> to vector<128x128xbf16>
    %cst_52 = arith.constant dense<0.000000e+00> : vector<128x128xf32>
    %49 = tpu.matmul %46, %48, %cst_52 {dimension_numbers = #tpu.dot_dimension_numbers<[1], [0], [0], [1], [0, 0, 1, 1], [], []>} : vector<128x128xbf16>, vector<128x128xbf16>, vector<128x128xf32> -> vector<128x128xf32>
    %c2_53 = arith.constant 2 : index
    %c0_54 = arith.constant 0 : index
    %c0_55 = arith.constant 0 : index
    %50 = vector.load %arg4[%c2_53, %c0_54, %c0_55] : memref<15x1x128xf32, #tpu.memory_space<vmem>>, vector<1x1x128xf32>
    %51 = vector.shape_cast %50 : vector<1x1x128xf32> to vector<1x128xf32>
    %52 = vector.broadcast %51 : vector<1x128xf32> to vector<128x128xf32>
    %53 = arith.addf %49, %52 : vector<128x128xf32>
    %c0_56 = arith.constant 0 : index
    %c0_57 = arith.constant 0 : index
    %c0_58 = arith.constant 0 : index
    %54 = vector.load %arg7[%c0_56, %c0_57, %c0_58] : memref<3x128x128xf32, #tpu.memory_space<vmem>>, vector<1x128x128xf32>
    %55 = vector.shape_cast %54 : vector<1x128x128xf32> to vector<128x128xf32>
    %c2_59 = arith.constant 2 : index
    %c0_60 = arith.constant 0 : index
    %c0_61 = arith.constant 0 : index
    %56 = vector.load %arg2[%c2_59, %c0_60, %c0_61] : memref<5x128x128xbf16, #tpu.memory_space<vmem>>, vector<1x128x128xbf16>
    %57 = vector.shape_cast %56 : vector<1x128x128xbf16> to vector<128x128xbf16>
    %58 = arith.truncf %53 : vector<128x128xf32> to vector<128x128xbf16>
    %cst_62 = arith.constant dense<0.000000e+00> : vector<128x128xf32>
    %59 = tpu.matmul %57, %58, %cst_62 {dimension_numbers = #tpu.dot_dimension_numbers<[1], [0], [0], [1], [0, 0, 1, 1], [], []>} : vector<128x128xbf16>, vector<128x128xbf16>, vector<128x128xf32> -> vector<128x128xf32>
    %60 = arith.addf %55, %59 : vector<128x128xf32>
    %c0_63 = arith.constant 0 : index
    %c0_64 = arith.constant 0 : index
    %c0_65 = arith.constant 0 : index
    %61 = vector.load %arg7[%c0_63, %c0_64, %c0_65] : memref<3x128x128xf32, #tpu.memory_space<vmem>>, vector<1x128x128xf32>
    %62 = vector.shape_cast %61 : vector<1x128x128xf32> to vector<128x128xf32>
    %63 = vector.shape_cast %60 : vector<128x128xf32> to vector<1x128x128xf32>
    tpu.vector_store %arg7[%c0_63, %c0_64, %c0_65], %63 {strides = array<i32>} : memref<3x128x128xf32, #tpu.memory_space<vmem>>, vector<1x128x128xf32>,
    %c1_66 = arith.constant 1 : index
    %c0_67 = arith.constant 0 : index
    %c0_68 = arith.constant 0 : index
    %64 = vector.load %arg6[%c1_66, %c0_67, %c0_68] : memref<3x128x128xf32, #tpu.memory_space<vmem>>, vector<1x128x128xf32>
    %65 = vector.shape_cast %64 : vector<1x128x128xf32> to vector<128x128xf32>
    %66 = arith.truncf %65 : vector<128x128xf32> to vector<128x128xbf16>
    %c3 = arith.constant 3 : index
    %c0_69 = arith.constant 0 : index
    %c0_70 = arith.constant 0 : index
    %67 = vector.load %arg3[%c3, %c0_69, %c0_70] : memref<15x128x128xbf16, #tpu.memory_space<vmem>>, vector<1x128x128xbf16>
    %68 = vector.shape_cast %67 : vector<1x128x128xbf16> to vector<128x128xbf16>
    %cst_71 = arith.constant dense<0.000000e+00> : vector<128x128xf32>
    %69 = tpu.matmul %66, %68, %cst_71 {dimension_numbers = #tpu.dot_dimension_numbers<[1], [0], [0], [1], [0, 0, 1, 1], [], []>} : vector<128x128xbf16>, vector<128x128xbf16>, vector<128x128xf32> -> vector<128x128xf32>
    %c3_72 = arith.constant 3 : index
    %c0_73 = arith.constant 0 : index
    %c0_74 = arith.constant 0 : index
    %70 = vector.load %arg4[%c3_72, %c0_73, %c0_74] : memref<15x1x128xf32, #tpu.memory_space<vmem>>, vector<1x1x128xf32>
    %71 = vector.shape_cast %70 : vector<1x1x128xf32> to vector<1x128xf32>
    %72 = vector.broadcast %71 : vector<1x128xf32> to vector<128x128xf32>
    %73 = arith.addf %69, %72 : vector<128x128xf32>
    %c2_75 = arith.constant 2 : index
    %c0_76 = arith.constant 0 : index
    %c0_77 = arith.constant 0 : index
    %74 = vector.load %arg7[%c2_75, %c0_76, %c0_77] : memref<3x128x128xf32, #tpu.memory_space<vmem>>, vector<1x128x128xf32>
    %75 = vector.shape_cast %74 : vector<1x128x128xf32> to vector<128x128xf32>
    %c3_78 = arith.constant 3 : index
    %c0_79 = arith.constant 0 : index
    %c0_80 = arith.constant 0 : index
    %76 = vector.load %arg2[%c3_78, %c0_79, %c0_80] : memref<5x128x128xbf16, #tpu.memory_space<vmem>>, vector<1x128x128xbf16>
    %77 = vector.shape_cast %76 : vector<1x128x128xbf16> to vector<128x128xbf16>
    %78 = arith.truncf %73 : vector<128x128xf32> to vector<128x128xbf16>
    %cst_81 = arith.constant dense<0.000000e+00> : vector<128x128xf32>
    %79 = tpu.matmul %77, %78, %cst_81 {dimension_numbers = #tpu.dot_dimension_numbers<[1], [0], [0], [1], [0, 0, 1, 1], [], []>} : vector<128x128xbf16>, vector<128x128xbf16>, vector<128x128xf32> -> vector<128x128xf32>
    %80 = arith.addf %75, %79 : vector<128x128xf32>
    %c2_82 = arith.constant 2 : index
    %c0_83 = arith.constant 0 : index
    %c0_84 = arith.constant 0 : index
    %81 = vector.load %arg7[%c2_82, %c0_83, %c0_84] : memref<3x128x128xf32, #tpu.memory_space<vmem>>, vector<1x128x128xf32>
    %82 = vector.shape_cast %81 : vector<1x128x128xf32> to vector<128x128xf32>
    %83 = vector.shape_cast %80 : vector<128x128xf32> to vector<1x128x128xf32>
    tpu.vector_store %arg7[%c2_82, %c0_83, %c0_84], %83 {strides = array<i32>} : memref<3x128x128xf32, #tpu.memory_space<vmem>>, vector<1x128x128xf32>,
    %c2_85 = arith.constant 2 : index
    %c0_86 = arith.constant 0 : index
    %c0_87 = arith.constant 0 : index
    %84 = vector.load %arg6[%c2_85, %c0_86, %c0_87] : memref<3x128x128xf32, #tpu.memory_space<vmem>>, vector<1x128x128xf32>
    %85 = vector.shape_cast %84 : vector<1x128x128xf32> to vector<128x128xf32>
    %86 = arith.truncf %85 : vector<128x128xf32> to vector<128x128xbf16>
    %c4 = arith.constant 4 : index
    %c0_88 = arith.constant 0 : index
    %c0_89 = arith.constant 0 : index
    %87 = vector.load %arg3[%c4, %c0_88, %c0_89] : memref<15x128x128xbf16, #tpu.memory_space<vmem>>, vector<1x128x128xbf16>
    %88 = vector.shape_cast %87 : vector<1x128x128xbf16> to vector<128x128xbf16>
    %cst_90 = arith.constant dense<0.000000e+00> : vector<128x128xf32>
    %89 = tpu.matmul %86, %88, %cst_90 {dimension_numbers = #tpu.dot_dimension_numbers<[1], [0], [0], [1], [0, 0, 1, 1], [], []>} : vector<128x128xbf16>, vector<128x128xbf16>, vector<128x128xf32> -> vector<128x128xf32>
    %c4_91 = arith.constant 4 : index
    %c0_92 = arith.constant 0 : index
    %c0_93 = arith.constant 0 : index
    %90 = vector.load %arg4[%c4_91, %c0_92, %c0_93] : memref<15x1x128xf32, #tpu.memory_space<vmem>>, vector<1x1x128xf32>
    %91 = vector.shape_cast %90 : vector<1x1x128xf32> to vector<1x128xf32>
    %92 = vector.broadcast %91 : vector<1x128xf32> to vector<128x128xf32>
    %93 = arith.addf %89, %92 : vector<128x128xf32>
    %c1_94 = arith.constant 1 : index
    %c0_95 = arith.constant 0 : index
    %c0_96 = arith.constant 0 : index
    %94 = vector.load %arg7[%c1_94, %c0_95, %c0_96] : memref<3x128x128xf32, #tpu.memory_space<vmem>>, vector<1x128x128xf32>
    %95 = vector.shape_cast %94 : vector<1x128x128xf32> to vector<128x128xf32>
    %c4_97 = arith.constant 4 : index
    %c0_98 = arith.constant 0 : index
    %c0_99 = arith.constant 0 : index
    %96 = vector.load %arg2[%c4_97, %c0_98, %c0_99] : memref<5x128x128xbf16, #tpu.memory_space<vmem>>, vector<1x128x128xbf16>
    %97 = vector.shape_cast %96 : vector<1x128x128xbf16> to vector<128x128xbf16>
    %98 = arith.truncf %93 : vector<128x128xf32> to vector<128x128xbf16>
    %cst_100 = arith.constant dense<0.000000e+00> : vector<128x128xf32>
    %99 = tpu.matmul %97, %98, %cst_100 {dimension_numbers = #tpu.dot_dimension_numbers<[1], [0], [0], [1], [0, 0, 1, 1], [], []>} : vector<128x128xbf16>, vector<128x128xbf16>, vector<128x128xf32> -> vector<128x128xf32>
    %100 = arith.addf %95, %99 : vector<128x128xf32>
    %c1_101 = arith.constant 1 : index
    %c0_102 = arith.constant 0 : index
    %c0_103 = arith.constant 0 : index
    %101 = vector.load %arg7[%c1_101, %c0_102, %c0_103] : memref<3x128x128xf32, #tpu.memory_space<vmem>>, vector<1x128x128xf32>
    %102 = vector.shape_cast %101 : vector<1x128x128xf32> to vector<128x128xf32>
    %103 = vector.shape_cast %100 : vector<128x128xf32> to vector<1x128x128xf32>
    tpu.vector_store %arg7[%c1_101, %c0_102, %c0_103], %103 {strides = array<i32>} : memref<3x128x128xf32, #tpu.memory_space<vmem>>, vector<1x128x128xf32>,
    %c0_104 = arith.constant 0 : index
    %c0_105 = arith.constant 0 : index
    %c0_106 = arith.constant 0 : index
    %104 = vector.load %arg7[%c0_104, %c0_105, %c0_106] : memref<3x128x128xf32, #tpu.memory_space<vmem>>, vector<3x128x128xf32>
    %cst_107 = arith.constant 0.000000e+00 : f32
    %105 = vector.broadcast %cst_107 : f32 to vector<3x128x128xf32>
    %106 = arith.cmpf oge, %104, %105 : vector<3x128x128xf32>
    %cst_108 = arith.constant 0.00999999977 : f32
    %107 = vector.broadcast %cst_108 : f32 to vector<3x128x128xf32>
    %108 = arith.mulf %107, %104 : vector<3x128x128xf32>
    %109 = arith.select %106, %104, %108 : vector<3x128x128xi1>, vector<3x128x128xf32>
    %c0_109 = arith.constant 0 : index
    %c0_110 = arith.constant 0 : index
    %c0_111 = arith.constant 0 : index
    %110 = vector.load %arg6[%c0_109, %c0_110, %c0_111] : memref<3x128x128xf32, #tpu.memory_space<vmem>>, vector<3x128x128xf32>
    tpu.vector_store %arg6[%c0_109, %c0_110, %c0_111], %109 {strides = array<i32>} : memref<3x128x128xf32, #tpu.memory_space<vmem>>, vector<3x128x128xf32>,
    %cst_112 = arith.constant 0.000000e+00 : f32
    %111 = vector.broadcast %cst_112 : f32 to vector<3x128x128xf32>
    %c0_113 = arith.constant 0 : index
    %c0_114 = arith.constant 0 : index
    %c0_115 = arith.constant 0 : index
    %112 = vector.load %arg7[%c0_113, %c0_114, %c0_115] : memref<3x128x128xf32, #tpu.memory_space<vmem>>, vector<3x128x128xf32>
    tpu.vector_store %arg7[%c0_113, %c0_114, %c0_115], %111 {strides = array<i32>} : memref<3x128x128xf32, #tpu.memory_space<vmem>>, vector<3x128x128xf32>,
    %c0_116 = arith.constant 0 : index
    %c0_117 = arith.constant 0 : index
    %c0_118 = arith.constant 0 : index
    %113 = vector.load %arg6[%c0_116, %c0_117, %c0_118] : memref<3x128x128xf32, #tpu.memory_space<vmem>>, vector<1x128x128xf32>
    %114 = vector.shape_cast %113 : vector<1x128x128xf32> to vector<128x128xf32>
    %115 = arith.truncf %114 : vector<128x128xf32> to vector<128x128xbf16>
    %c5 = arith.constant 5 : index
    %c0_119 = arith.constant 0 : index
    %c0_120 = arith.constant 0 : index
    %116 = vector.load %arg3[%c5, %c0_119, %c0_120] : memref<15x128x128xbf16, #tpu.memory_space<vmem>>, vector<1x128x128xbf16>
    %117 = vector.shape_cast %116 : vector<1x128x128xbf16> to vector<128x128xbf16>
    %cst_121 = arith.constant dense<0.000000e+00> : vector<128x128xf32>
    %118 = tpu.matmul %115, %117, %cst_121 {dimension_numbers = #tpu.dot_dimension_numbers<[1], [0], [0], [1], [0, 0, 1, 1], [], []>} : vector<128x128xbf16>, vector<128x128xbf16>, vector<128x128xf32> -> vector<128x128xf32>
    %c5_122 = arith.constant 5 : index
    %c0_123 = arith.constant 0 : index
    %c0_124 = arith.constant 0 : index
    %119 = vector.load %arg4[%c5_122, %c0_123, %c0_124] : memref<15x1x128xf32, #tpu.memory_space<vmem>>, vector<1x1x128xf32>
    %120 = vector.shape_cast %119 : vector<1x1x128xf32> to vector<1x128xf32>
    %121 = vector.broadcast %120 : vector<1x128xf32> to vector<128x128xf32>
    %122 = arith.addf %118, %121 : vector<128x128xf32>
    %c0_125 = arith.constant 0 : index
    %c0_126 = arith.constant 0 : index
    %c0_127 = arith.constant 0 : index
    %123 = vector.load %arg7[%c0_125, %c0_126, %c0_127] : memref<3x128x128xf32, #tpu.memory_space<vmem>>, vector<1x128x128xf32>
    %124 = vector.shape_cast %123 : vector<1x128x128xf32> to vector<128x128xf32>
    %c0_128 = arith.constant 0 : index
    %c0_129 = arith.constant 0 : index
    %c0_130 = arith.constant 0 : index
    %125 = vector.load %arg2[%c0_128, %c0_129, %c0_130] : memref<5x128x128xbf16, #tpu.memory_space<vmem>>, vector<1x128x128xbf16>
    %126 = vector.shape_cast %125 : vector<1x128x128xbf16> to vector<128x128xbf16>
    %127 = arith.truncf %122 : vector<128x128xf32> to vector<128x128xbf16>
    %cst_131 = arith.constant dense<0.000000e+00> : vector<128x128xf32>
    %128 = tpu.matmul %126, %127, %cst_131 {dimension_numbers = #tpu.dot_dimension_numbers<[1], [0], [0], [1], [0, 0, 1, 1], [], []>} : vector<128x128xbf16>, vector<128x128xbf16>, vector<128x128xf32> -> vector<128x128xf32>
    %129 = arith.addf %124, %128 : vector<128x128xf32>
    %c0_132 = arith.constant 0 : index
    %c0_133 = arith.constant 0 : index
    %c0_134 = arith.constant 0 : index
    %130 = vector.load %arg7[%c0_132, %c0_133, %c0_134] : memref<3x128x128xf32, #tpu.memory_space<vmem>>, vector<1x128x128xf32>
    %131 = vector.shape_cast %130 : vector<1x128x128xf32> to vector<128x128xf32>
    %132 = vector.shape_cast %129 : vector<128x128xf32> to vector<1x128x128xf32>
    tpu.vector_store %arg7[%c0_132, %c0_133, %c0_134], %132 {strides = array<i32>} : memref<3x128x128xf32, #tpu.memory_space<vmem>>, vector<1x128x128xf32>,
    %c0_135 = arith.constant 0 : index
    %c0_136 = arith.constant 0 : index
    %c0_137 = arith.constant 0 : index
    %133 = vector.load %arg6[%c0_135, %c0_136, %c0_137] : memref<3x128x128xf32, #tpu.memory_space<vmem>>, vector<1x128x128xf32>
    %134 = vector.shape_cast %133 : vector<1x128x128xf32> to vector<128x128xf32>
    %135 = arith.truncf %134 : vector<128x128xf32> to vector<128x128xbf16>
    %c6 = arith.constant 6 : index
    %c0_138 = arith.constant 0 : index
    %c0_139 = arith.constant 0 : index
    %136 = vector.load %arg3[%c6, %c0_138, %c0_139] : memref<15x128x128xbf16, #tpu.memory_space<vmem>>, vector<1x128x128xbf16>
    %137 = vector.shape_cast %136 : vector<1x128x128xbf16> to vector<128x128xbf16>
    %cst_140 = arith.constant dense<0.000000e+00> : vector<128x128xf32>
    %138 = tpu.matmul %135, %137, %cst_140 {dimension_numbers = #tpu.dot_dimension_numbers<[1], [0], [0], [1], [0, 0, 1, 1], [], []>} : vector<128x128xbf16>, vector<128x128xbf16>, vector<128x128xf32> -> vector<128x128xf32>
    %c6_141 = arith.constant 6 : index
    %c0_142 = arith.constant 0 : index
    %c0_143 = arith.constant 0 : index
    %139 = vector.load %arg4[%c6_141, %c0_142, %c0_143] : memref<15x1x128xf32, #tpu.memory_space<vmem>>, vector<1x1x128xf32>
    %140 = vector.shape_cast %139 : vector<1x1x128xf32> to vector<1x128xf32>
    %141 = vector.broadcast %140 : vector<1x128xf32> to vector<128x128xf32>
    %142 = arith.addf %138, %141 : vector<128x128xf32>
    %c1_144 = arith.constant 1 : index
    %c0_145 = arith.constant 0 : index
    %c0_146 = arith.constant 0 : index
    %143 = vector.load %arg7[%c1_144, %c0_145, %c0_146] : memref<3x128x128xf32, #tpu.memory_space<vmem>>, vector<1x128x128xf32>
    %144 = vector.shape_cast %143 : vector<1x128x128xf32> to vector<128x128xf32>
    %c1_147 = arith.constant 1 : index
    %c0_148 = arith.constant 0 : index
    %c0_149 = arith.constant 0 : index
    %145 = vector.load %arg2[%c1_147, %c0_148, %c0_149] : memref<5x128x128xbf16, #tpu.memory_space<vmem>>, vector<1x128x128xbf16>
    %146 = vector.shape_cast %145 : vector<1x128x128xbf16> to vector<128x128xbf16>
    %147 = arith.truncf %142 : vector<128x128xf32> to vector<128x128xbf16>
    %cst_150 = arith.constant dense<0.000000e+00> : vector<128x128xf32>
    %148 = tpu.matmul %146, %147, %cst_150 {dimension_numbers = #tpu.dot_dimension_numbers<[1], [0], [0], [1], [0, 0, 1, 1], [], []>} : vector<128x128xbf16>, vector<128x128xbf16>, vector<128x128xf32> -> vector<128x128xf32>
    %149 = arith.addf %144, %148 : vector<128x128xf32>
    %c1_151 = arith.constant 1 : index
    %c0_152 = arith.constant 0 : index
    %c0_153 = arith.constant 0 : index
    %150 = vector.load %arg7[%c1_151, %c0_152, %c0_153] : memref<3x128x128xf32, #tpu.memory_space<vmem>>, vector<1x128x128xf32>
    %151 = vector.shape_cast %150 : vector<1x128x128xf32> to vector<128x128xf32>
    %152 = vector.shape_cast %149 : vector<128x128xf32> to vector<1x128x128xf32>
    tpu.vector_store %arg7[%c1_151, %c0_152, %c0_153], %152 {strides = array<i32>} : memref<3x128x128xf32, #tpu.memory_space<vmem>>, vector<1x128x128xf32>,
    %c1_154 = arith.constant 1 : index
    %c0_155 = arith.constant 0 : index
    %c0_156 = arith.constant 0 : index
    %153 = vector.load %arg6[%c1_154, %c0_155, %c0_156] : memref<3x128x128xf32, #tpu.memory_space<vmem>>, vector<1x128x128xf32>
    %154 = vector.shape_cast %153 : vector<1x128x128xf32> to vector<128x128xf32>
    %155 = arith.truncf %154 : vector<128x128xf32> to vector<128x128xbf16>
    %c7 = arith.constant 7 : index
    %c0_157 = arith.constant 0 : index
    %c0_158 = arith.constant 0 : index
    %156 = vector.load %arg3[%c7, %c0_157, %c0_158] : memref<15x128x128xbf16, #tpu.memory_space<vmem>>, vector<1x128x128xbf16>
    %157 = vector.shape_cast %156 : vector<1x128x128xbf16> to vector<128x128xbf16>
    %cst_159 = arith.constant dense<0.000000e+00> : vector<128x128xf32>
    %158 = tpu.matmul %155, %157, %cst_159 {dimension_numbers = #tpu.dot_dimension_numbers<[1], [0], [0], [1], [0, 0, 1, 1], [], []>} : vector<128x128xbf16>, vector<128x128xbf16>, vector<128x128xf32> -> vector<128x128xf32>
    %c7_160 = arith.constant 7 : index
    %c0_161 = arith.constant 0 : index
    %c0_162 = arith.constant 0 : index
    %159 = vector.load %arg4[%c7_160, %c0_161, %c0_162] : memref<15x1x128xf32, #tpu.memory_space<vmem>>, vector<1x1x128xf32>
    %160 = vector.shape_cast %159 : vector<1x1x128xf32> to vector<1x128xf32>
    %161 = vector.broadcast %160 : vector<1x128xf32> to vector<128x128xf32>
    %162 = arith.addf %158, %161 : vector<128x128xf32>
    %c0_163 = arith.constant 0 : index
    %c0_164 = arith.constant 0 : index
    %c0_165 = arith.constant 0 : index
    %163 = vector.load %arg7[%c0_163, %c0_164, %c0_165] : memref<3x128x128xf32, #tpu.memory_space<vmem>>, vector<1x128x128xf32>
    %164 = vector.shape_cast %163 : vector<1x128x128xf32> to vector<128x128xf32>
    %c2_166 = arith.constant 2 : index
    %c0_167 = arith.constant 0 : index
    %c0_168 = arith.constant 0 : index
    %165 = vector.load %arg2[%c2_166, %c0_167, %c0_168] : memref<5x128x128xbf16, #tpu.memory_space<vmem>>, vector<1x128x128xbf16>
    %166 = vector.shape_cast %165 : vector<1x128x128xbf16> to vector<128x128xbf16>
    %167 = arith.truncf %162 : vector<128x128xf32> to vector<128x128xbf16>
    %cst_169 = arith.constant dense<0.000000e+00> : vector<128x128xf32>
    %168 = tpu.matmul %166, %167, %cst_169 {dimension_numbers = #tpu.dot_dimension_numbers<[1], [0], [0], [1], [0, 0, 1, 1], [], []>} : vector<128x128xbf16>, vector<128x128xbf16>, vector<128x128xf32> -> vector<128x128xf32>
    %169 = arith.addf %164, %168 : vector<128x128xf32>
    %c0_170 = arith.constant 0 : index
    %c0_171 = arith.constant 0 : index
    %c0_172 = arith.constant 0 : index
    %170 = vector.load %arg7[%c0_170, %c0_171, %c0_172] : memref<3x128x128xf32, #tpu.memory_space<vmem>>, vector<1x128x128xf32>
    %171 = vector.shape_cast %170 : vector<1x128x128xf32> to vector<128x128xf32>
    %172 = vector.shape_cast %169 : vector<128x128xf32> to vector<1x128x128xf32>
    tpu.vector_store %arg7[%c0_170, %c0_171, %c0_172], %172 {strides = array<i32>} : memref<3x128x128xf32, #tpu.memory_space<vmem>>, vector<1x128x128xf32>,
    %c1_173 = arith.constant 1 : index
    %c0_174 = arith.constant 0 : index
    %c0_175 = arith.constant 0 : index
    %173 = vector.load %arg6[%c1_173, %c0_174, %c0_175] : memref<3x128x128xf32, #tpu.memory_space<vmem>>, vector<1x128x128xf32>
    %174 = vector.shape_cast %173 : vector<1x128x128xf32> to vector<128x128xf32>
    %175 = arith.truncf %174 : vector<128x128xf32> to vector<128x128xbf16>
    %c8 = arith.constant 8 : index
    %c0_176 = arith.constant 0 : index
    %c0_177 = arith.constant 0 : index
    %176 = vector.load %arg3[%c8, %c0_176, %c0_177] : memref<15x128x128xbf16, #tpu.memory_space<vmem>>, vector<1x128x128xbf16>
    %177 = vector.shape_cast %176 : vector<1x128x128xbf16> to vector<128x128xbf16>
    %cst_178 = arith.constant dense<0.000000e+00> : vector<128x128xf32>
    %178 = tpu.matmul %175, %177, %cst_178 {dimension_numbers = #tpu.dot_dimension_numbers<[1], [0], [0], [1], [0, 0, 1, 1], [], []>} : vector<128x128xbf16>, vector<128x128xbf16>, vector<128x128xf32> -> vector<128x128xf32>
    %c8_179 = arith.constant 8 : index
    %c0_180 = arith.constant 0 : index
    %c0_181 = arith.constant 0 : index
    %179 = vector.load %arg4[%c8_179, %c0_180, %c0_181] : memref<15x1x128xf32, #tpu.memory_space<vmem>>, vector<1x1x128xf32>
    %180 = vector.shape_cast %179 : vector<1x1x128xf32> to vector<1x128xf32>
    %181 = vector.broadcast %180 : vector<1x128xf32> to vector<128x128xf32>
    %182 = arith.addf %178, %181 : vector<128x128xf32>
    %c2_182 = arith.constant 2 : index
    %c0_183 = arith.constant 0 : index
    %c0_184 = arith.constant 0 : index
    %183 = vector.load %arg7[%c2_182, %c0_183, %c0_184] : memref<3x128x128xf32, #tpu.memory_space<vmem>>, vector<1x128x128xf32>
    %184 = vector.shape_cast %183 : vector<1x128x128xf32> to vector<128x128xf32>
    %c3_185 = arith.constant 3 : index
    %c0_186 = arith.constant 0 : index
    %c0_187 = arith.constant 0 : index
    %185 = vector.load %arg2[%c3_185, %c0_186, %c0_187] : memref<5x128x128xbf16, #tpu.memory_space<vmem>>, vector<1x128x128xbf16>
    %186 = vector.shape_cast %185 : vector<1x128x128xbf16> to vector<128x128xbf16>
    %187 = arith.truncf %182 : vector<128x128xf32> to vector<128x128xbf16>
    %cst_188 = arith.constant dense<0.000000e+00> : vector<128x128xf32>
    %188 = tpu.matmul %186, %187, %cst_188 {dimension_numbers = #tpu.dot_dimension_numbers<[1], [0], [0], [1], [0, 0, 1, 1], [], []>} : vector<128x128xbf16>, vector<128x128xbf16>, vector<128x128xf32> -> vector<128x128xf32>
    %189 = arith.addf %184, %188 : vector<128x128xf32>
    %c2_189 = arith.constant 2 : index
    %c0_190 = arith.constant 0 : index
    %c0_191 = arith.constant 0 : index
    %190 = vector.load %arg7[%c2_189, %c0_190, %c0_191] : memref<3x128x128xf32, #tpu.memory_space<vmem>>, vector<1x128x128xf32>
    %191 = vector.shape_cast %190 : vector<1x128x128xf32> to vector<128x128xf32>
    %192 = vector.shape_cast %189 : vector<128x128xf32> to vector<1x128x128xf32>
    tpu.vector_store %arg7[%c2_189, %c0_190, %c0_191], %192 {strides = array<i32>} : memref<3x128x128xf32, #tpu.memory_space<vmem>>, vector<1x128x128xf32>,
    %c2_192 = arith.constant 2 : index
    %c0_193 = arith.constant 0 : index
    %c0_194 = arith.constant 0 : index
    %193 = vector.load %arg6[%c2_192, %c0_193, %c0_194] : memref<3x128x128xf32, #tpu.memory_space<vmem>>, vector<1x128x128xf32>
    %194 = vector.shape_cast %193 : vector<1x128x128xf32> to vector<128x128xf32>
    %195 = arith.truncf %194 : vector<128x128xf32> to vector<128x128xbf16>
    %c9 = arith.constant 9 : index
    %c0_195 = arith.constant 0 : index
    %c0_196 = arith.constant 0 : index
    %196 = vector.load %arg3[%c9, %c0_195, %c0_196] : memref<15x128x128xbf16, #tpu.memory_space<vmem>>, vector<1x128x128xbf16>
    %197 = vector.shape_cast %196 : vector<1x128x128xbf16> to vector<128x128xbf16>
    %cst_197 = arith.constant dense<0.000000e+00> : vector<128x128xf32>
    %198 = tpu.matmul %195, %197, %cst_197 {dimension_numbers = #tpu.dot_dimension_numbers<[1], [0], [0], [1], [0, 0, 1, 1], [], []>} : vector<128x128xbf16>, vector<128x128xbf16>, vector<128x128xf32> -> vector<128x128xf32>
    %c9_198 = arith.constant 9 : index
    %c0_199 = arith.constant 0 : index
    %c0_200 = arith.constant 0 : index
    %199 = vector.load %arg4[%c9_198, %c0_199, %c0_200] : memref<15x1x128xf32, #tpu.memory_space<vmem>>, vector<1x1x128xf32>
    %200 = vector.shape_cast %199 : vector<1x1x128xf32> to vector<1x128xf32>
    %201 = vector.broadcast %200 : vector<1x128xf32> to vector<128x128xf32>
    %202 = arith.addf %198, %201 : vector<128x128xf32>
    %c1_201 = arith.constant 1 : index
    %c0_202 = arith.constant 0 : index
    %c0_203 = arith.constant 0 : index
    %203 = vector.load %arg7[%c1_201, %c0_202, %c0_203] : memref<3x128x128xf32, #tpu.memory_space<vmem>>, vector<1x128x128xf32>
    %204 = vector.shape_cast %203 : vector<1x128x128xf32> to vector<128x128xf32>
    %c4_204 = arith.constant 4 : index
    %c0_205 = arith.constant 0 : index
    %c0_206 = arith.constant 0 : index
    %205 = vector.load %arg2[%c4_204, %c0_205, %c0_206] : memref<5x128x128xbf16, #tpu.memory_space<vmem>>, vector<1x128x128xbf16>
    %206 = vector.shape_cast %205 : vector<1x128x128xbf16> to vector<128x128xbf16>
    %207 = arith.truncf %202 : vector<128x128xf32> to vector<128x128xbf16>
    %cst_207 = arith.constant dense<0.000000e+00> : vector<128x128xf32>
    %208 = tpu.matmul %206, %207, %cst_207 {dimension_numbers = #tpu.dot_dimension_numbers<[1], [0], [0], [1], [0, 0, 1, 1], [], []>} : vector<128x128xbf16>, vector<128x128xbf16>, vector<128x128xf32> -> vector<128x128xf32>
    %209 = arith.addf %204, %208 : vector<128x128xf32>
    %c1_208 = arith.constant 1 : index
    %c0_209 = arith.constant 0 : index
    %c0_210 = arith.constant 0 : index
    %210 = vector.load %arg7[%c1_208, %c0_209, %c0_210] : memref<3x128x128xf32, #tpu.memory_space<vmem>>, vector<1x128x128xf32>
    %211 = vector.shape_cast %210 : vector<1x128x128xf32> to vector<128x128xf32>
    %212 = vector.shape_cast %209 : vector<128x128xf32> to vector<1x128x128xf32>
    tpu.vector_store %arg7[%c1_208, %c0_209, %c0_210], %212 {strides = array<i32>} : memref<3x128x128xf32, #tpu.memory_space<vmem>>, vector<1x128x128xf32>,
    %c0_211 = arith.constant 0 : index
    %c0_212 = arith.constant 0 : index
    %c0_213 = arith.constant 0 : index
    %213 = vector.load %arg7[%c0_211, %c0_212, %c0_213] : memref<3x128x128xf32, #tpu.memory_space<vmem>>, vector<3x128x128xf32>
    %cst_214 = arith.constant 0.000000e+00 : f32
    %214 = vector.broadcast %cst_214 : f32 to vector<3x128x128xf32>
    %215 = arith.cmpf oge, %213, %214 : vector<3x128x128xf32>
    %cst_215 = arith.constant 0.00999999977 : f32
    %216 = vector.broadcast %cst_215 : f32 to vector<3x128x128xf32>
    %217 = arith.mulf %216, %213 : vector<3x128x128xf32>
    %218 = arith.select %215, %213, %217 : vector<3x128x128xi1>, vector<3x128x128xf32>
    %c0_216 = arith.constant 0 : index
    %c0_217 = arith.constant 0 : index
    %c0_218 = arith.constant 0 : index
    %219 = vector.load %arg6[%c0_216, %c0_217, %c0_218] : memref<3x128x128xf32, #tpu.memory_space<vmem>>, vector<3x128x128xf32>
    tpu.vector_store %arg6[%c0_216, %c0_217, %c0_218], %218 {strides = array<i32>} : memref<3x128x128xf32, #tpu.memory_space<vmem>>, vector<3x128x128xf32>,
    %cst_219 = arith.constant 0.000000e+00 : f32
    %220 = vector.broadcast %cst_219 : f32 to vector<3x128x128xf32>
    %c0_220 = arith.constant 0 : index
    %c0_221 = arith.constant 0 : index
    %c0_222 = arith.constant 0 : index
    %221 = vector.load %arg7[%c0_220, %c0_221, %c0_222] : memref<3x128x128xf32, #tpu.memory_space<vmem>>, vector<3x128x128xf32>
    tpu.vector_store %arg7[%c0_220, %c0_221, %c0_222], %220 {strides = array<i32>} : memref<3x128x128xf32, #tpu.memory_space<vmem>>, vector<3x128x128xf32>,
    %c0_223 = arith.constant 0 : index
    %c0_224 = arith.constant 0 : index
    %c0_225 = arith.constant 0 : index
    %222 = vector.load %arg6[%c0_223, %c0_224, %c0_225] : memref<3x128x128xf32, #tpu.memory_space<vmem>>, vector<1x128x128xf32>
    %223 = vector.shape_cast %222 : vector<1x128x128xf32> to vector<128x128xf32>
    %224 = arith.truncf %223 : vector<128x128xf32> to vector<128x128xbf16>
    %c10 = arith.constant 10 : index
    %c0_226 = arith.constant 0 : index
    %c0_227 = arith.constant 0 : index
    %225 = vector.load %arg3[%c10, %c0_226, %c0_227] : memref<15x128x128xbf16, #tpu.memory_space<vmem>>, vector<1x128x128xbf16>
    %226 = vector.shape_cast %225 : vector<1x128x128xbf16> to vector<128x128xbf16>
    %cst_228 = arith.constant dense<0.000000e+00> : vector<128x128xf32>
    %227 = tpu.matmul %224, %226, %cst_228 {dimension_numbers = #tpu.dot_dimension_numbers<[1], [0], [0], [1], [0, 0, 1, 1], [], []>} : vector<128x128xbf16>, vector<128x128xbf16>, vector<128x128xf32> -> vector<128x128xf32>
    %c10_229 = arith.constant 10 : index
    %c0_230 = arith.constant 0 : index
    %c0_231 = arith.constant 0 : index
    %228 = vector.load %arg4[%c10_229, %c0_230, %c0_231] : memref<15x1x128xf32, #tpu.memory_space<vmem>>, vector<1x1x128xf32>
    %229 = vector.shape_cast %228 : vector<1x1x128xf32> to vector<1x128xf32>
    %230 = vector.broadcast %229 : vector<1x128xf32> to vector<128x128xf32>
    %231 = arith.addf %227, %230 : vector<128x128xf32>
    %c0_232 = arith.constant 0 : index
    %c0_233 = arith.constant 0 : index
    %c0_234 = arith.constant 0 : index
    %232 = vector.load %arg7[%c0_232, %c0_233, %c0_234] : memref<3x128x128xf32, #tpu.memory_space<vmem>>, vector<1x128x128xf32>
    %233 = vector.shape_cast %232 : vector<1x128x128xf32> to vector<128x128xf32>
    %c0_235 = arith.constant 0 : index
    %c0_236 = arith.constant 0 : index
    %c0_237 = arith.constant 0 : index
    %234 = vector.load %arg2[%c0_235, %c0_236, %c0_237] : memref<5x128x128xbf16, #tpu.memory_space<vmem>>, vector<1x128x128xbf16>
    %235 = vector.shape_cast %234 : vector<1x128x128xbf16> to vector<128x128xbf16>
    %236 = arith.truncf %231 : vector<128x128xf32> to vector<128x128xbf16>
    %cst_238 = arith.constant dense<0.000000e+00> : vector<128x128xf32>
    %237 = tpu.matmul %235, %236, %cst_238 {dimension_numbers = #tpu.dot_dimension_numbers<[1], [0], [0], [1], [0, 0, 1, 1], [], []>} : vector<128x128xbf16>, vector<128x128xbf16>, vector<128x128xf32> -> vector<128x128xf32>
    %238 = arith.addf %233, %237 : vector<128x128xf32>
    %c0_239 = arith.constant 0 : index
    %c0_240 = arith.constant 0 : index
    %c0_241 = arith.constant 0 : index
    %239 = vector.load %arg7[%c0_239, %c0_240, %c0_241] : memref<3x128x128xf32, #tpu.memory_space<vmem>>, vector<1x128x128xf32>
    %240 = vector.shape_cast %239 : vector<1x128x128xf32> to vector<128x128xf32>
    %241 = vector.shape_cast %238 : vector<128x128xf32> to vector<1x128x128xf32>
    tpu.vector_store %arg7[%c0_239, %c0_240, %c0_241], %241 {strides = array<i32>} : memref<3x128x128xf32, #tpu.memory_space<vmem>>, vector<1x128x128xf32>,
    %c0_242 = arith.constant 0 : index
    %c0_243 = arith.constant 0 : index
    %c0_244 = arith.constant 0 : index
    %242 = vector.load %arg6[%c0_242, %c0_243, %c0_244] : memref<3x128x128xf32, #tpu.memory_space<vmem>>, vector<1x128x128xf32>
    %243 = vector.shape_cast %242 : vector<1x128x128xf32> to vector<128x128xf32>
    %244 = arith.truncf %243 : vector<128x128xf32> to vector<128x128xbf16>
    %c11 = arith.constant 11 : index
    %c0_245 = arith.constant 0 : index
    %c0_246 = arith.constant 0 : index
    %245 = vector.load %arg3[%c11, %c0_245, %c0_246] : memref<15x128x128xbf16, #tpu.memory_space<vmem>>, vector<1x128x128xbf16>
    %246 = vector.shape_cast %245 : vector<1x128x128xbf16> to vector<128x128xbf16>
    %cst_247 = arith.constant dense<0.000000e+00> : vector<128x128xf32>
    %247 = tpu.matmul %244, %246, %cst_247 {dimension_numbers = #tpu.dot_dimension_numbers<[1], [0], [0], [1], [0, 0, 1, 1], [], []>} : vector<128x128xbf16>, vector<128x128xbf16>, vector<128x128xf32> -> vector<128x128xf32>
    %c11_248 = arith.constant 11 : index
    %c0_249 = arith.constant 0 : index
    %c0_250 = arith.constant 0 : index
    %248 = vector.load %arg4[%c11_248, %c0_249, %c0_250] : memref<15x1x128xf32, #tpu.memory_space<vmem>>, vector<1x1x128xf32>
    %249 = vector.shape_cast %248 : vector<1x1x128xf32> to vector<1x128xf32>
    %250 = vector.broadcast %249 : vector<1x128xf32> to vector<128x128xf32>
    %251 = arith.addf %247, %250 : vector<128x128xf32>
    %c1_251 = arith.constant 1 : index
    %c0_252 = arith.constant 0 : index
    %c0_253 = arith.constant 0 : index
    %252 = vector.load %arg7[%c1_251, %c0_252, %c0_253] : memref<3x128x128xf32, #tpu.memory_space<vmem>>, vector<1x128x128xf32>
    %253 = vector.shape_cast %252 : vector<1x128x128xf32> to vector<128x128xf32>
    %c1_254 = arith.constant 1 : index
    %c0_255 = arith.constant 0 : index
    %c0_256 = arith.constant 0 : index
    %254 = vector.load %arg2[%c1_254, %c0_255, %c0_256] : memref<5x128x128xbf16, #tpu.memory_space<vmem>>, vector<1x128x128xbf16>
    %255 = vector.shape_cast %254 : vector<1x128x128xbf16> to vector<128x128xbf16>
    %256 = arith.truncf %251 : vector<128x128xf32> to vector<128x128xbf16>
    %cst_257 = arith.constant dense<0.000000e+00> : vector<128x128xf32>
    %257 = tpu.matmul %255, %256, %cst_257 {dimension_numbers = #tpu.dot_dimension_numbers<[1], [0], [0], [1], [0, 0, 1, 1], [], []>} : vector<128x128xbf16>, vector<128x128xbf16>, vector<128x128xf32> -> vector<128x128xf32>
    %258 = arith.addf %253, %257 : vector<128x128xf32>
    %c1_258 = arith.constant 1 : index
    %c0_259 = arith.constant 0 : index
    %c0_260 = arith.constant 0 : index
    %259 = vector.load %arg7[%c1_258, %c0_259, %c0_260] : memref<3x128x128xf32, #tpu.memory_space<vmem>>, vector<1x128x128xf32>
    %260 = vector.shape_cast %259 : vector<1x128x128xf32> to vector<128x128xf32>
    %261 = vector.shape_cast %258 : vector<128x128xf32> to vector<1x128x128xf32>
    tpu.vector_store %arg7[%c1_258, %c0_259, %c0_260], %261 {strides = array<i32>} : memref<3x128x128xf32, #tpu.memory_space<vmem>>, vector<1x128x128xf32>,
    %c1_261 = arith.constant 1 : index
    %c0_262 = arith.constant 0 : index
    %c0_263 = arith.constant 0 : index
    %262 = vector.load %arg6[%c1_261, %c0_262, %c0_263] : memref<3x128x128xf32, #tpu.memory_space<vmem>>, vector<1x128x128xf32>
    %263 = vector.shape_cast %262 : vector<1x128x128xf32> to vector<128x128xf32>
    %264 = arith.truncf %263 : vector<128x128xf32> to vector<128x128xbf16>
    %c12 = arith.constant 12 : index
    %c0_264 = arith.constant 0 : index
    %c0_265 = arith.constant 0 : index
    %265 = vector.load %arg3[%c12, %c0_264, %c0_265] : memref<15x128x128xbf16, #tpu.memory_space<vmem>>, vector<1x128x128xbf16>
    %266 = vector.shape_cast %265 : vector<1x128x128xbf16> to vector<128x128xbf16>
    %cst_266 = arith.constant dense<0.000000e+00> : vector<128x128xf32>
    %267 = tpu.matmul %264, %266, %cst_266 {dimension_numbers = #tpu.dot_dimension_numbers<[1], [0], [0], [1], [0, 0, 1, 1], [], []>} : vector<128x128xbf16>, vector<128x128xbf16>, vector<128x128xf32> -> vector<128x128xf32>
    %c12_267 = arith.constant 12 : index
    %c0_268 = arith.constant 0 : index
    %c0_269 = arith.constant 0 : index
    %268 = vector.load %arg4[%c12_267, %c0_268, %c0_269] : memref<15x1x128xf32, #tpu.memory_space<vmem>>, vector<1x1x128xf32>
    %269 = vector.shape_cast %268 : vector<1x1x128xf32> to vector<1x128xf32>
    %270 = vector.broadcast %269 : vector<1x128xf32> to vector<128x128xf32>
    %271 = arith.addf %267, %270 : vector<128x128xf32>
    %c0_270 = arith.constant 0 : index
    %c0_271 = arith.constant 0 : index
    %c0_272 = arith.constant 0 : index
    %272 = vector.load %arg7[%c0_270, %c0_271, %c0_272] : memref<3x128x128xf32, #tpu.memory_space<vmem>>, vector<1x128x128xf32>
    %273 = vector.shape_cast %272 : vector<1x128x128xf32> to vector<128x128xf32>
    %c2_273 = arith.constant 2 : index
    %c0_274 = arith.constant 0 : index
    %c0_275 = arith.constant 0 : index
    %274 = vector.load %arg2[%c2_273, %c0_274, %c0_275] : memref<5x128x128xbf16, #tpu.memory_space<vmem>>, vector<1x128x128xbf16>
    %275 = vector.shape_cast %274 : vector<1x128x128xbf16> to vector<128x128xbf16>
    %276 = arith.truncf %271 : vector<128x128xf32> to vector<128x128xbf16>
    %cst_276 = arith.constant dense<0.000000e+00> : vector<128x128xf32>
    %277 = tpu.matmul %275, %276, %cst_276 {dimension_numbers = #tpu.dot_dimension_numbers<[1], [0], [0], [1], [0, 0, 1, 1], [], []>} : vector<128x128xbf16>, vector<128x128xbf16>, vector<128x128xf32> -> vector<128x128xf32>
    %278 = arith.addf %273, %277 : vector<128x128xf32>
    %c0_277 = arith.constant 0 : index
    %c0_278 = arith.constant 0 : index
    %c0_279 = arith.constant 0 : index
    %279 = vector.load %arg7[%c0_277, %c0_278, %c0_279] : memref<3x128x128xf32, #tpu.memory_space<vmem>>, vector<1x128x128xf32>
    %280 = vector.shape_cast %279 : vector<1x128x128xf32> to vector<128x128xf32>
    %281 = vector.shape_cast %278 : vector<128x128xf32> to vector<1x128x128xf32>
    tpu.vector_store %arg7[%c0_277, %c0_278, %c0_279], %281 {strides = array<i32>} : memref<3x128x128xf32, #tpu.memory_space<vmem>>, vector<1x128x128xf32>,
    %c1_280 = arith.constant 1 : index
    %c0_281 = arith.constant 0 : index
    %c0_282 = arith.constant 0 : index
    %282 = vector.load %arg6[%c1_280, %c0_281, %c0_282] : memref<3x128x128xf32, #tpu.memory_space<vmem>>, vector<1x128x128xf32>
    %283 = vector.shape_cast %282 : vector<1x128x128xf32> to vector<128x128xf32>
    %284 = arith.truncf %283 : vector<128x128xf32> to vector<128x128xbf16>
    %c13 = arith.constant 13 : index
    %c0_283 = arith.constant 0 : index
    %c0_284 = arith.constant 0 : index
    %285 = vector.load %arg3[%c13, %c0_283, %c0_284] : memref<15x128x128xbf16, #tpu.memory_space<vmem>>, vector<1x128x128xbf16>
    %286 = vector.shape_cast %285 : vector<1x128x128xbf16> to vector<128x128xbf16>
    %cst_285 = arith.constant dense<0.000000e+00> : vector<128x128xf32>
    %287 = tpu.matmul %284, %286, %cst_285 {dimension_numbers = #tpu.dot_dimension_numbers<[1], [0], [0], [1], [0, 0, 1, 1], [], []>} : vector<128x128xbf16>, vector<128x128xbf16>, vector<128x128xf32> -> vector<128x128xf32>
    %c13_286 = arith.constant 13 : index
    %c0_287 = arith.constant 0 : index
    %c0_288 = arith.constant 0 : index
    %288 = vector.load %arg4[%c13_286, %c0_287, %c0_288] : memref<15x1x128xf32, #tpu.memory_space<vmem>>, vector<1x1x128xf32>
    %289 = vector.shape_cast %288 : vector<1x1x128xf32> to vector<1x128xf32>
    %290 = vector.broadcast %289 : vector<1x128xf32> to vector<128x128xf32>
    %291 = arith.addf %287, %290 : vector<128x128xf32>
    %c2_289 = arith.constant 2 : index
    %c0_290 = arith.constant 0 : index
    %c0_291 = arith.constant 0 : index
    %292 = vector.load %arg7[%c2_289, %c0_290, %c0_291] : memref<3x128x128xf32, #tpu.memory_space<vmem>>, vector<1x128x128xf32>
    %293 = vector.shape_cast %292 : vector<1x128x128xf32> to vector<128x128xf32>
    %c3_292 = arith.constant 3 : index
    %c0_293 = arith.constant 0 : index
    %c0_294 = arith.constant 0 : index
    %294 = vector.load %arg2[%c3_292, %c0_293, %c0_294] : memref<5x128x128xbf16, #tpu.memory_space<vmem>>, vector<1x128x128xbf16>
    %295 = vector.shape_cast %294 : vector<1x128x128xbf16> to vector<128x128xbf16>
    %296 = arith.truncf %291 : vector<128x128xf32> to vector<128x128xbf16>
    %cst_295 = arith.constant dense<0.000000e+00> : vector<128x128xf32>
    %297 = tpu.matmul %295, %296, %cst_295 {dimension_numbers = #tpu.dot_dimension_numbers<[1], [0], [0], [1], [0, 0, 1, 1], [], []>} : vector<128x128xbf16>, vector<128x128xbf16>, vector<128x128xf32> -> vector<128x128xf32>
    %298 = arith.addf %293, %297 : vector<128x128xf32>
    %c2_296 = arith.constant 2 : index
    %c0_297 = arith.constant 0 : index
    %c0_298 = arith.constant 0 : index
    %299 = vector.load %arg7[%c2_296, %c0_297, %c0_298] : memref<3x128x128xf32, #tpu.memory_space<vmem>>, vector<1x128x128xf32>
    %300 = vector.shape_cast %299 : vector<1x128x128xf32> to vector<128x128xf32>
    %301 = vector.shape_cast %298 : vector<128x128xf32> to vector<1x128x128xf32>
    tpu.vector_store %arg7[%c2_296, %c0_297, %c0_298], %301 {strides = array<i32>} : memref<3x128x128xf32, #tpu.memory_space<vmem>>, vector<1x128x128xf32>,
    %c2_299 = arith.constant 2 : index
    %c0_300 = arith.constant 0 : index
    %c0_301 = arith.constant 0 : index
    %302 = vector.load %arg6[%c2_299, %c0_300, %c0_301] : memref<3x128x128xf32, #tpu.memory_space<vmem>>, vector<1x128x128xf32>
    %303 = vector.shape_cast %302 : vector<1x128x128xf32> to vector<128x128xf32>
    %304 = arith.truncf %303 : vector<128x128xf32> to vector<128x128xbf16>
    %c14 = arith.constant 14 : index
    %c0_302 = arith.constant 0 : index
    %c0_303 = arith.constant 0 : index
    %305 = vector.load %arg3[%c14, %c0_302, %c0_303] : memref<15x128x128xbf16, #tpu.memory_space<vmem>>, vector<1x128x128xbf16>
    %306 = vector.shape_cast %305 : vector<1x128x128xbf16> to vector<128x128xbf16>
    %cst_304 = arith.constant dense<0.000000e+00> : vector<128x128xf32>
    %307 = tpu.matmul %304, %306, %cst_304 {dimension_numbers = #tpu.dot_dimension_numbers<[1], [0], [0], [1], [0, 0, 1, 1], [], []>} : vector<128x128xbf16>, vector<128x128xbf16>, vector<128x128xf32> -> vector<128x128xf32>
    %c14_305 = arith.constant 14 : index
    %c0_306 = arith.constant 0 : index
    %c0_307 = arith.constant 0 : index
    %308 = vector.load %arg4[%c14_305, %c0_306, %c0_307] : memref<15x1x128xf32, #tpu.memory_space<vmem>>, vector<1x1x128xf32>
    %309 = vector.shape_cast %308 : vector<1x1x128xf32> to vector<1x128xf32>
    %310 = vector.broadcast %309 : vector<1x128xf32> to vector<128x128xf32>
    %311 = arith.addf %307, %310 : vector<128x128xf32>
    %c1_308 = arith.constant 1 : index
    %c0_309 = arith.constant 0 : index
    %c0_310 = arith.constant 0 : index
    %312 = vector.load %arg7[%c1_308, %c0_309, %c0_310] : memref<3x128x128xf32, #tpu.memory_space<vmem>>, vector<1x128x128xf32>
    %313 = vector.shape_cast %312 : vector<1x128x128xf32> to vector<128x128xf32>
    %c4_311 = arith.constant 4 : index
    %c0_312 = arith.constant 0 : index
    %c0_313 = arith.constant 0 : index
    %314 = vector.load %arg2[%c4_311, %c0_312, %c0_313] : memref<5x128x128xbf16, #tpu.memory_space<vmem>>, vector<1x128x128xbf16>
    %315 = vector.shape_cast %314 : vector<1x128x128xbf16> to vector<128x128xbf16>
    %316 = arith.truncf %311 : vector<128x128xf32> to vector<128x128xbf16>
    %cst_314 = arith.constant dense<0.000000e+00> : vector<128x128xf32>
    %317 = tpu.matmul %315, %316, %cst_314 {dimension_numbers = #tpu.dot_dimension_numbers<[1], [0], [0], [1], [0, 0, 1, 1], [], []>} : vector<128x128xbf16>, vector<128x128xbf16>, vector<128x128xf32> -> vector<128x128xf32>
    %318 = arith.addf %313, %317 : vector<128x128xf32>
    %c1_315 = arith.constant 1 : index
    %c0_316 = arith.constant 0 : index
    %c0_317 = arith.constant 0 : index
    %319 = vector.load %arg7[%c1_315, %c0_316, %c0_317] : memref<3x128x128xf32, #tpu.memory_space<vmem>>, vector<1x128x128xf32>
    %320 = vector.shape_cast %319 : vector<1x128x128xf32> to vector<128x128xf32>
    %321 = vector.shape_cast %318 : vector<128x128xf32> to vector<1x128x128xf32>
    tpu.vector_store %arg7[%c1_315, %c0_316, %c0_317], %321 {strides = array<i32>} : memref<3x128x128xf32, #tpu.memory_space<vmem>>, vector<1x128x128xf32>,
    %c1_318 = arith.constant 1 : index
    %c0_319 = arith.constant 0 : index
    %c0_320 = arith.constant 0 : index
    %322 = vector.load %arg7[%c1_318, %c0_319, %c0_320] : memref<3x128x128xf32, #tpu.memory_space<vmem>>, vector<1x128x128xf32>
    %323 = vector.shape_cast %322 : vector<1x128x128xf32> to vector<128x128xf32>
    %c0_321 = arith.constant 0 : index
    %c0_322 = arith.constant 0 : index
    %324 = vector.load %arg5[%c0_321, %c0_322] : memref<128x128xf32, #tpu.memory_space<vmem>>, vector<128x128xf32>
    tpu.vector_store %arg5[%c0_321, %c0_322], %323 {strides = array<i32>} : memref<128x128xf32, #tpu.memory_space<vmem>>, vector<128x128xf32>,
    return
  }
  func.func @transform_0(%arg0: i32) -> (i32, i32, i32) {
    %c0_i32 = arith.constant 0 : i32
    %c0_i32_0 = arith.constant 0 : i32
    %c0_i32_1 = arith.constant 0 : i32
    %c0_i32_2 = arith.constant 0 : i32
    return %c0_i32, %c0_i32_0, %c0_i32_1 : i32, i32, i32
  }
  func.func @transform_1(%arg0: i32) -> (i32, i32, i32) {
    %c0_i32 = arith.constant 0 : i32
    %c0_i32_0 = arith.constant 0 : i32
    %c0_i32_1 = arith.constant 0 : i32
    %c0_i32_2 = arith.constant 0 : i32
    return %c0_i32, %c0_i32_0, %c0_i32_1 : i32, i32, i32
  }
  func.func @transform_2(%arg0: i32) -> (i32, i32, i32) {
    %c0_i32 = arith.constant 0 : i32
    %c0_i32_0 = arith.constant 0 : i32
    %c0_i32_1 = arith.constant 0 : i32
    %c0_i32_2 = arith.constant 0 : i32
    return %c0_i32, %c0_i32_0, %c0_i32_1 : i32, i32, i32
  }
  func.func @transform_3(%arg0: i32) -> (i32, i32, i32) {
    %c0_i32 = arith.constant 0 : i32
    %c0_i32_0 = arith.constant 0 : i32
    %c0_i32_1 = arith.constant 0 : i32
    %c0_i32_2 = arith.constant 0 : i32
    return %c0_i32, %c0_i32_0, %c0_i32_1 : i32, i32, i32
  }
  func.func @transform_4(%arg0: i32) -> (i32, i32) {
    %c0_i32 = arith.constant 0 : i32
    %c0_i32_0 = arith.constant 0 : i32
    %c0_i32_1 = arith.constant 0 : i32
    return %c0_i32, %c0_i32_0 : i32, i32
  }
}

</mosaic_0001>

<bundles_post_ra>
// kernel: tpu_custom_call.1
= control target key start
LH: loop header
LB: loop body
LE: loop exit
PB: predicated region body
PF: predicated region fallthrough
CT: control target
= control target key end

     0   :  { %9 = vsyncpa [#allocation5], 0  ;;  %s9992_s0 = inlined_call_operand.hbm [shape: f32[3,128,128], index: 0, kind: input, shape index: {}]   ;;  %s9993_s1 = inlined_call_operand.hbm [shape: bf16[5,128,128], index: 1, kind: input, shape index: {}]   ;;  %s9994_s2 = inlined_call_operand.hbm [shape: bf16[15,128,128], index: 2, kind: input, shape index: {}]   ;;  %s9995_s3 = inlined_call_operand.hbm [shape: f32[15,1,128], index: 3, kind: input, shape index: {}]   ;;  %s9996_s4 = inlined_call_operand.hbm [shape: f32[128,128], index: 4, kind: output, shape index: {}]  }
   0x1   :  { %10 = vsyncpa [#allocation8], 0 }
   0x2   :  { %11 = vsyncpa [#allocation11], 0 }
   0x3   :  { %12 = vsyncpa [#allocation6], 0  ;;  %s9070_s15 = smov [#allocation7]  }
   0x4   :  { %s30_s16 = sshll.u32 %s9070_s15, 4  ;;  %s31_s16 = int_to_ptr.vmem [resolvable:$true] %s30_s16 }
   0x5   :  { %s8970_s17 = scalar_lea.vmem %s31_s16, 5120  ;;  %p8975_p1 = scmp.lt.s32.totalorder %s31_s16, %s31_s16 }
   0x6   :  { %p8971_p0 = scmp.ne.s32.totalorder %s31_s16, %s8970_s17  ;;  %p8976_p2 = scmp.lt.s32.totalorder %s8970_s17, %s8970_s17 }
   0x8   :  { %p8977_p3 = por %p8976_p2, %p8975_p1 }
   0xa   :  { %p8978_p4 = pnand %p8977_p3, %p8971_p0 }
   0xc   :  { %8981 = shalt.err (!%p8978_p4)
}
   0xd   :  { %s9071_s18 = smov 64   ;;  %s9072_s19 = smov 4  }
   0xe   :  { %36 = dma.hbm_to_vmem [thread:$0]  %s9993_s1, 5120, %s31_s16, [#allocation8], %s9071_s18, %s9071_s18, %s9072_s19  }
   0xf   :  { %s9073_s22 = smov [#allocation4]  }
  0x10   :  { %s18_s23 = sshll.u32 %s9073_s22, 4  ;;  %s19_s23 = int_to_ptr.vmem [resolvable:$true] %s18_s23 }
  0x11   :  { %s8990_s24 = scalar_lea.vmem %s19_s23, 6144  ;;  %p8995_p6 = scmp.lt.s32.totalorder %s19_s23, %s19_s23 }
  0x12   :  { %p8991_p5 = scmp.ne.s32.totalorder %s19_s23, %s8990_s24  ;;  %p8996_p7 = scmp.lt.s32.totalorder %s8990_s24, %s8990_s24 }
  0x14   :  { %p8997_p8 = por %p8996_p7, %p8995_p6 }
  0x16   :  { %p8998_p9 = pnand %p8997_p8, %p8991_p5 }
  0x18   :  { %9001 = shalt.err (!%p8998_p9)
}
  0x19   :  { %s9074_s25 = smov 128   ;;  %s9075_s26 = smov 8  }
  0x1a   :  { %24 = dma.hbm_to_vmem [thread:$0]  %s9992_s0, 6144, %s19_s23, [#allocation5], %s9074_s25, %s9074_s25, %s9075_s26  }
  0x1b   :  { %s9076_s1 = smov [#allocation9]   ;;  %s9077_s30 = smov [#allocation10]  }
  0x1c   :  { %s42_s29 = sshll.u32 %s9076_s1, 4  ;;  %s54_s5 = sshll.u32 %s9077_s30, 4  ;;  %s43_s29 = int_to_ptr.vmem [resolvable:$true] %s42_s29  ;;  %s55_s5 = int_to_ptr.vmem [resolvable:$true] %s54_s5 }
  0x1d   :  { %s9010_s6 = scalar_lea.vmem %s43_s29, 15360  ;;  %p9015_p11 = scmp.lt.s32.totalorder %s43_s29, %s43_s29 }
  0x1e   :  { %p9011_p10 = scmp.ne.s32.totalorder %s43_s29, %s9010_s6  ;;  %p9016_p12 = scmp.lt.s32.totalorder %s9010_s6, %s9010_s6 }
  0x20   :  { %p9017_p13 = por %p9016_p12, %p9015_p11 }
  0x22   :  { %p9018_p0 = pnand %p9017_p13, %p9011_p10 }
  0x24   :  { %9021 = shalt.err (!%p9018_p0)
}
  0x25   :  { %48 = dma.hbm_to_vmem [thread:$0]  %s9994_s2, 15360, %s43_s29, [#allocation8], %s9071_s18, %s9071_s18, %s9072_s19  }
  0x26   :  { %s9030_s0 = scalar_lea.vmem %s55_s5, 240  ;;  %s9034_s9 = scalar_lea.vmem %s55_s5, 256 }
  0x27   :  { %p9031_p1 = scmp.ne.s32.totalorder %s55_s5, %s9030_s0  ;;  %p9035_p2 = scmp.lt.s32.totalorder %s55_s5, %s55_s5 }
  0x28   :  { %p9036_p3 = scmp.lt.s32.totalorder %s9034_s9, %s9030_s0 }
  0x2a   :  { %p9037_p4 = por %p9036_p3, %p9035_p2 }
  0x2c   :  { %p9038_p5 = pnand %p9037_p4, %p9031_p1 }
  0x2e   :  { %9041 = shalt.err (!%p9038_p5)
}
  0x2f   :  { %s9078_s10 = smov 16   ;;  %s9079_s11 = smov 1  }
  0x30   :  { %60 = dma.hbm_to_vmem [thread:$0]  %s9995_s3, 240, %s55_s5, [#allocation11], %s9078_s10, %s9078_s10, %s9079_s11  }
  0x31   :  { %9062 = dma.done.wait [#allocation5], 6144  }
  0x32   :  { %9063 = vsyncadd [#allocation5], 4294961152 }
  0x33   :  { %9064 = dma.done.wait [#allocation8], 20480  }
  0x34   :  { %9065 = vsyncadd [#allocation8], 4294946816 }
  0x35   :  { %9066 = dma.done.wait [#allocation11], 240  }
  0x36   :  { %9067 = vsyncadd [#allocation11], 4294967056  ;;  %v8722_v0 = vld [vmem:[#allocation9 + $0x38] sm:$0xff]   ;;  %v8723_v1 = vld [vmem:[#allocation9 + $0x30] sm:$0xff]   ;;  %s9080_s2 = smov [#allocation12]  }
  0x37   :  { %7751 = vmatprep.subr.bf16.mxu0 %v8722_v0  ;;  %v8724_v2 = vld [vmem:[#allocation9 + $0x28] sm:$0xff]   ;;  %v8725_v3 = vld [vmem:[#allocation9 + $0x20] sm:$0xff]   ;;  %v8726_v7 = vld [vmem:[#allocation9 + $0x18] sm:$0xff]   ;;  %s7002_s3 = sshll.u32 %s9080_s2, 4  ;;  %s7003_s3 = int_to_ptr.vmem [resolvable:$true] %s7002_s3 }
  0x38   :  { %7752 = vmatpush3.bf16.msra.mxu0 %v8722_v0  ;;  %v74_v4 = vld [vmem:[#allocation4] sm:$0xff]  ;;  %v75_v5 = vld [vmem:[#allocation4 + $0x8] sm:$0xff]  ;;  %v8727_v8 = vld [vmem:[#allocation9 + $0x10] sm:$0xff]   ;;  %s9042_s14 = scalar_lea.vmem %s7003_s3, 2048  ;;  %p9047_p7 = scmp.lt.s32.totalorder %s7003_s3, %s7003_s3 }
  0x39   :  { %7753 = vmatprep.subr.bf16.mxu0 %v8723_v1  ;;  %v9127_v6 = vpack.c.bf16 %v75_v5, %v74_v4  ;;  %v8728_v9 = vld [vmem:[#allocation9 + $0x8] sm:$0xff]   ;;  %v8729_v10 = vld [vmem:[#allocation9] sm:$0xff]   ;;  %v76_v11 = vld [vmem:[#allocation4 + $0x10] sm:$0xff]  ;;  %p9043_p6 = scmp.ne.s32.totalorder %s7003_s3, %s9042_s14  ;;  %p9048_p8 = scmp.lt.s32.totalorder %s9042_s14, %s9042_s14 }
  0x3a   :  { %v77_v12 = vld [vmem:[#allocation4 + $0x18] sm:$0xff]  ;;  %v78_v14 = vld [vmem:[#allocation4 + $0x20] sm:$0xff]  ;;  %v79_v15 = vld [vmem:[#allocation4 + $0x28] sm:$0xff] }
  0x3b   :  { %7767 = vmatprep.mubr.bf16.mxu0 %v9127_v6  ;;  %v8730_v13 = vld [vmem:[#allocation9 + $0x78] sm:$0xff]   ;;  %v235_v16 = vpack.c.bf16 %v77_v12, %v76_v11  ;;  %v236_v17 = vpack.c.bf16 %v79_v15, %v78_v14  ;;  %v8731_v18 = vld [vmem:[#allocation9 + $0x70] sm:$0xff]   ;;  %v8732_v21 = vld [vmem:[#allocation9 + $0x68] sm:$0xff]   ;;  %p9049_p9 = por %p9048_p8, %p9047_p7 }
  0x3c   :  { %7754 = vmatpush3.bf16.msra.mxu0 %v8723_v1  ;;  %v80_v19 = vld [vmem:[#allocation4 + $0x30] sm:$0xff]  ;;  %v81_v20 = vld [vmem:[#allocation4 + $0x38] sm:$0xff]  ;;  %v82_v22 = vld [vmem:[#allocation4 + $0x40] sm:$0xff] }
  0x3d   :  { %7755 = vmatprep.subr.bf16.mxu0 %v8724_v2  ;;  %v83_v23 = vld [vmem:[#allocation4 + $0x48] sm:$0xff]  ;;  %v237_v24 = vpack.c.bf16 %v81_v20, %v80_v19  ;;  %v8733_v26 = vld [vmem:[#allocation9 + $0x60] sm:$0xff]   ;;  %v84_v27 = vld [vmem:[#allocation4 + $0x50] sm:$0xff]  ;;  %p9050_p10 = pnand %p9049_p9, %p9043_p6 }
  0x3e   :  { %v238_v25 = vpack.c.bf16 %v83_v23, %v82_v22  ;;  %v85_v28 = vld [vmem:[#allocation4 + $0x58] sm:$0xff]  ;;  %v86_v30 = vld [vmem:[#allocation4 + $0x60] sm:$0xff]  ;;  %v87_v31 = vld [vmem:[#allocation4 + $0x68] sm:$0xff] }
  0x3f   :  { %v8734_v29 = vld [vmem:[#allocation9 + $0x58] sm:$0xff]   ;;  %v239_v32 = vpack.c.bf16 %v85_v28, %v84_v27  ;;  %v240_v33 = vpack.c.bf16 %v87_v31, %v86_v30  ;;  %v8735_v34 = vld [vmem:[#allocation9 + $0x50] sm:$0xff]   ;;  %v8736_v37 = vld [vmem:[#allocation9 + $0x48] sm:$0xff]  }
  0x40   :  { %7756 = vmatpush3.bf16.msra.mxu0 %v8724_v2  ;;  %v88_v35 = vld [vmem:[#allocation4 + $0x70] sm:$0xff]  ;;  %v89_v36 = vld [vmem:[#allocation4 + $0x78] sm:$0xff]  ;;  %v8737_v39 = vld [vmem:[#allocation9 + $0x40] sm:$0xff]  }
  0x41   :  { %7757 = vmatprep.subr.bf16.mxu0 %v8725_v3  ;;  %v241_v38 = vpack.c.bf16 %v89_v36, %v88_v35  ;;  %v8738_v40 = vld [vmem:[#allocation9 + $0xb8] sm:$0xff]   ;;  %v8739_v41 = vld [vmem:[#allocation9 + $0xb0] sm:$0xff]   ;;  %v8740_v42 = vld [vmem:[#allocation9 + $0xa8] sm:$0xff]  }
  0x42   :  { %v8741_v43 = vld [vmem:[#allocation9 + $0xa0] sm:$0xff]   ;;  %v8742_v44 = vld [vmem:[#allocation9 + $0x98] sm:$0xff]   ;;  %v8743_v45 = vld [vmem:[#allocation9 + $0x90] sm:$0xff]  }
  0x43   :  { %v8744_v46 = vld [vmem:[#allocation9 + $0x88] sm:$0xff]   ;;  %v90_v47 = vld [vmem:[#allocation4 + $0x80] sm:$0xff]  ;;  %v92_v51 = vld [vmem:[#allocation4 + $0x90] sm:$0xff] }
  0x44   :  { %7758 = vmatpush3.bf16.msra.mxu0 %v8725_v3  ;;  %v91_v48 = vld [vmem:[#allocation4 + $0x88] sm:$0xff]  ;;  %v8745_v49 = vld [vmem:[#allocation9 + $0x80] sm:$0xff]   ;;  %v93_v52 = vld [vmem:[#allocation4 + $0x98] sm:$0xff] }
  0x45   :  { %7759 = vmatprep.subr.bf16.mxu0 %v8726_v7  ;;  %v1057_v50 = vpack.c.bf16 %v91_v48, %v90_v47  ;;  %v8746_v53 = vld [vmem:[#allocation9 + $0xf8] sm:$0xff]   ;;  %v94_v54 = vld [vmem:[#allocation4 + $0xa0] sm:$0xff]  ;;  %v95_v55 = vld [vmem:[#allocation4 + $0xa8] sm:$0xff]  ;;  %v1058_v56 = vpack.c.bf16 %v93_v52, %v92_v51 }
  0x46   :  { %v8747_v57 = vld [vmem:[#allocation9 + $0xf0] sm:$0xff]   ;;  %v1059_v58 = vpack.c.bf16 %v95_v55, %v94_v54  ;;  %v97_v60 = vld [vmem:[#allocation4 + $0xb8] sm:$0xff]  ;;  %v8748_v61 = vld [vmem:[#allocation9 + $0xe8] sm:$0xff]  }
  0x47   :  { %v96_v59 = vld [vmem:[#allocation4 + $0xb0] sm:$0xff]  ;;  %v98_v62 = vld [vmem:[#allocation4 + $0xc0] sm:$0xff]  ;;  %v99_v63 = vld [vmem:[#allocation4 + $0xc8] sm:$0xff] }
  0x48   :  { %7760 = vmatpush3.bf16.msra.mxu0 %v8726_v7  ;;  %v1060_v0 = vpack.c.bf16 %v97_v60, %v96_v59  ;;  %v8749_v1 = vld [vmem:[#allocation9 + $0xe0] sm:$0xff]   ;;  %v1061_v2 = vpack.c.bf16 %v99_v63, %v98_v62  ;;  %v100_v3 = vld [vmem:[#allocation4 + $0xd0] sm:$0xff]  ;;  %v101_v4 = vld [vmem:[#allocation4 + $0xd8] sm:$0xff] }
  0x49   :  { %7761 = vmatprep.subr.bf16.mxu0 %v8727_v8  ;;  %v8750_v5 = vld [vmem:[#allocation9 + $0xd8] sm:$0xff]   ;;  %v103_v7 = vld [vmem:[#allocation4 + $0xe8] sm:$0xff]  ;;  %v104_v11 = vld [vmem:[#allocation4 + $0xf0] sm:$0xff] }
  0x4a   :  { %v105_v12 = vld [vmem:[#allocation4 + $0xf8] sm:$0xff]  ;;  %v8753_v15 = vld [vmem:[#allocation9 + $0xc0] sm:$0xff]   ;;  %v8760_v22 = vld [vmem:[#allocation9 + $0x108] sm:$0xff]  }
  0x4b   :  { %v1064_v14 = vpack.c.bf16 %v105_v12, %v104_v11  ;;  %v8757_v19 = vld [vmem:[#allocation9 + $0x120] sm:$0xff]   ;;  %v8758_v20 = vld [vmem:[#allocation9 + $0x118] sm:$0xff]   ;;  %v108_v27 = vld [vmem:[#allocation4 + $0x110] sm:$0xff] }
  0x4c   :  { %7762 = vmatpush3.bf16.msra.mxu0 %v8727_v8  ;;  %v1062_v8 = vpack.c.bf16 %v101_v4, %v100_v3  ;;  %v106_v23 = vld [vmem:[#allocation4 + $0x100] sm:$0xff]  ;;  %v109_v28 = vld [vmem:[#allocation4 + $0x118] sm:$0xff]  ;;  %v111_v30 = vld [vmem:[#allocation4 + $0x128] sm:$0xff] }
  0x4d   :  { %7763 = vmatprep.subr.bf16.mxu0 %v8728_v9  ;;  %v1884_v31 = vpack.c.bf16 %v109_v28, %v108_v27  ;;  %v113_v35 = vld [vmem:[#allocation4 + $0x138] sm:$0xff]  ;;  %v114_v36 = vld [vmem:[#allocation4 + $0x140] sm:$0xff] }
  0x4e   :  { %v121_v47 = vld [vmem:[#allocation4 + $0x178] sm:$0xff]  ;;  %v7016_v63 = vld [vmem:[#allocation10] ss:$0 sm:$0xff] }
  0x50   :  { %7764 = vmatpush3.bf16.msra.mxu0 %v8728_v9  ;;  %v8751_v9 = vld [vmem:[#allocation9 + $0xd0] sm:$0xff]  }
  0x51   :  { %7765 = vmatprep.subr.bf16.mxu0 %v8729_v10 }
  0x54   :  { %7766 = vmatpush3.bf16.msra.mxu0 %v8729_v10 }
  0x55   :  { %7815 = vmatprep.subr.bf16.mxu0 %v8730_v13 }
  0x57   :  { %7768 = vmatmul.mubr.bf16.vlgmr.msra.gmra.mxu0 %v235_v16 }
  0x58   :  { %7816 = vmatpush3.bf16.msra.mxu0 %v8730_v13  ;;  %7771 = vmatprep.mubr.bf16.mxu0 %v236_v17  ;;  %v8752_v13 = vld [vmem:[#allocation9 + $0xc8] sm:$0xff]  }
  0x59   :  { %7817 = vmatprep.subr.bf16.mxu0 %v8731_v18 }
  0x5c   :  { %7818 = vmatpush3.bf16.msra.mxu0 %v8731_v18  ;;  %v8756_v18 = vld [vmem:[#allocation9 + $0x128] sm:$0xff]  }
  0x5d   :  { %7819 = vmatprep.subr.bf16.mxu0 %v8732_v21 }
  0x5f   :  { %7772 = vmatmul.mubr.bf16.gmra.mxu0 %v237_v24 }
  0x60   :  { %7820 = vmatpush3.bf16.msra.mxu0 %v8732_v21  ;;  %7775 = vmatprep.mubr.bf16.mxu0 %v238_v25  ;;  %v8759_v21 = vld [vmem:[#allocation9 + $0x110] sm:$0xff]  }
  0x61   :  { %7821 = vmatprep.subr.bf16.mxu0 %v8733_v26 }
  0x64   :  { %7822 = vmatpush3.bf16.msra.mxu0 %v8733_v26 }
  0x65   :  { %7823 = vmatprep.subr.bf16.mxu0 %v8734_v29 }
  0x67   :  { %7776 = vmatmul.mubr.bf16.gmra.mxu0 %v239_v32 }
  0x68   :  { %7824 = vmatpush3.bf16.msra.mxu0 %v8734_v29  ;;  %7779 = vmatprep.mubr.bf16.mxu0 %v240_v33  ;;  %v110_v29 = vld [vmem:[#allocation4 + $0x120] sm:$0xff] }
  0x69   :  { %7825 = vmatprep.subr.bf16.mxu0 %v8735_v34 }
  0x6c   :  { %7826 = vmatpush3.bf16.msra.mxu0 %v8735_v34  ;;  %v112_v34 = vld [vmem:[#allocation4 + $0x130] sm:$0xff] }
  0x6d   :  { %7827 = vmatprep.subr.bf16.mxu0 %v8736_v37 }
  0x6f   :  { %7780 = vmatmul.mubr.bf16.gmra.mxu0 %v241_v38 }
  0x70   :  { %7828 = vmatpush3.bf16.msra.mxu0 %v8736_v37  ;;  %7831 = vmatprep.mubr.bf16.mxu0 %v9127_v6  ;;  %v102_v6 = vld [vmem:[#allocation4 + $0xe0] sm:$0xff]  ;;  %v115_v37 = vld [vmem:[#allocation4 + $0x148] sm:$0xff] }
  0x71   :  { %7829 = vmatprep.subr.bf16.mxu0 %v8737_v39  ;;  %v1063_v10 = vpack.c.bf16 %v103_v7, %v102_v6 }
  0x74   :  { %7830 = vmatpush3.bf16.msra.mxu0 %v8737_v39  ;;  %v1887_v39 = vpack.c.bf16 %v115_v37, %v114_v36 }
  0x75   :  { %7879 = vmatprep.subr.bf16.mxu0 %v8738_v40 }
  0x77   :  { %7832 = vmatmul.mubr.bf16.vlgmr.msra.gmra.mxu0 %v235_v16  ;;  %v8754_v16 = vld [vmem:[#allocation9 + $0x138] sm:$0xff]  }
  0x78   :  { %7880 = vmatpush3.bf16.msra.mxu0 %v8738_v40  ;;  %7835 = vmatprep.mubr.bf16.mxu0 %v236_v17  ;;  %v8755_v17 = vld [vmem:[#allocation9 + $0x130] sm:$0xff]  }
  0x79   :  { %7881 = vmatprep.subr.bf16.mxu0 %v8739_v41  ;;  %v116_v40 = vld [vmem:[#allocation4 + $0x150] sm:$0xff] }
  0x7c   :  { %7882 = vmatpush3.bf16.msra.mxu0 %v8739_v41  ;;  %v117_v41 = vld [vmem:[#allocation4 + $0x158] sm:$0xff] }
  0x7d   :  { %7883 = vmatprep.subr.bf16.mxu0 %v8740_v42 }
  0x7f   :  { %7836 = vmatmul.mubr.bf16.gmra.mxu0 %v237_v24  ;;  %v107_v24 = vld [vmem:[#allocation4 + $0x108] sm:$0xff] }
  0x80   :  { %7884 = vmatpush3.bf16.msra.mxu0 %v8740_v42  ;;  %7839 = vmatprep.mubr.bf16.mxu0 %v238_v25  ;;  %v8761_v25 = vld [vmem:[#allocation9 + $0x100] sm:$0xff]   ;;  %v1883_v26 = vpack.c.bf16 %v107_v24, %v106_v23 }
  0x81   :  { %7885 = vmatprep.subr.bf16.mxu0 %v8741_v43  ;;  %v118_v42 = vld [vmem:[#allocation4 + $0x160] sm:$0xff] }
  0x84   :  { %7886 = vmatpush3.bf16.msra.mxu0 %v8741_v43  ;;  %v119_v43 = vld [vmem:[#allocation4 + $0x168] sm:$0xff] }
  0x85   :  { %7887 = vmatprep.subr.bf16.mxu0 %v8742_v44 }
  0x87   :  { %7840 = vmatmul.mubr.bf16.gmra.mxu0 %v239_v32  ;;  %v1885_v32 = vpack.c.bf16 %v111_v30, %v110_v29 }
  0x88   :  { %7888 = vmatpush3.bf16.msra.mxu0 %v8742_v44  ;;  %7843 = vmatprep.mubr.bf16.mxu0 %v240_v33  ;;  %v8762_v33 = vld [vmem:[#allocation7] sm:$0xff]   ;;  %v1888_v44 = vpack.c.bf16 %v117_v41, %v116_v40 }
  0x89   :  { %7889 = vmatprep.subr.bf16.mxu0 %v8743_v45  ;;  %7799 = vmatprep.mubr.bf16.mxu1 %v8762_v33  ;;  %v9145_v40 = vld [vmem:[#allocation10 + $0x1] ss:$0 sm:$0xff] }
  0x8c   :  { %7890 = vmatpush3.bf16.msra.mxu0 %v8743_v45  ;;  %v1889_v45 = vpack.c.bf16 %v119_v43, %v118_v42 }
  0x8d   :  { %7891 = vmatprep.subr.bf16.mxu0 %v8744_v46 }
  0x8f   :  { %7844 = vmatmul.mubr.bf16.gmra.mxu0 %v241_v38  ;;  %v1886_v38 = vpack.c.bf16 %v113_v35, %v112_v34 }
  0x90   :  { %7892 = vmatpush3.bf16.msra.mxu0 %v8744_v46  ;;  %7895 = vmatprep.mubr.bf16.mxu0 %v1057_v50  ;;  %v120_v46 = vld [vmem:[#allocation4 + $0x170] sm:$0xff] }
  0x91   :  { %7893 = vmatprep.subr.bf16.mxu0 %v8745_v49  ;;  %v1890_v48 = vpack.c.bf16 %v121_v47, %v120_v46  ;;  %v8764_v46 = vld [vmem:[#allocation7 + $0x10] sm:$0xff]  }
  0x94   :  { %7894 = vmatpush3.bf16.msra.mxu0 %v8745_v49 }
  0x95   :  { %7943 = vmatprep.subr.bf16.mxu0 %v8746_v53 }
  0x97   :  { %7896 = vmatmul.mubr.bf16.vlgmr.msra.gmra.mxu0 %v1058_v56 }
  0x98   :  { %7944 = vmatpush3.bf16.msra.mxu0 %v8746_v53  ;;  %7899 = vmatprep.mubr.bf16.mxu0 %v1059_v58 }
  0x99   :  { %7945 = vmatprep.subr.bf16.mxu0 %v8747_v57 }
  0x9c   :  { %7946 = vmatpush3.bf16.msra.mxu0 %v8747_v57 }
  0x9d   :  { %7947 = vmatprep.subr.bf16.mxu0 %v8748_v61 }
  0x9f   :  { %7900 = vmatmul.mubr.bf16.gmra.mxu0 %v1060_v0 }
  0xa0   :  { %7948 = vmatpush3.bf16.msra.mxu0 %v8748_v61  ;;  %7903 = vmatprep.mubr.bf16.mxu0 %v1061_v2 }
  0xa1   :  { %7949 = vmatprep.subr.bf16.mxu0 %v8749_v1 }
  0xa4   :  { %7950 = vmatpush3.bf16.msra.mxu0 %v8749_v1 }
  0xa5   :  { %7951 = vmatprep.subr.bf16.mxu0 %v8750_v5 }
  0xa7   :  { %7904 = vmatmul.mubr.bf16.gmra.mxu0 %v1062_v8 }
  0xa8   :  { %7952 = vmatpush3.bf16.msra.mxu0 %v8750_v5  ;;  %7907 = vmatprep.mubr.bf16.mxu0 %v1063_v10 }
  0xa9   :  { %7953 = vmatprep.subr.bf16.mxu0 %v8751_v9 }
  0xac   :  { %7954 = vmatpush3.bf16.msra.mxu0 %v8751_v9 }
  0xad   :  { %7955 = vmatprep.subr.bf16.mxu0 %v8752_v13 }
  0xaf   :  { %7908 = vmatmul.mubr.bf16.gmra.mxu0 %v1064_v14 }
  0xb0   :  { %7956 = vmatpush3.bf16.msra.mxu0 %v8752_v13  ;;  %7959 = vmatprep.mubr.bf16.mxu0 %v1057_v50 }
  0xb1   :  { %7957 = vmatprep.subr.bf16.mxu0 %v8753_v15 }
  0xb4   :  { %7958 = vmatpush3.bf16.msra.mxu0 %v8753_v15 }
  0xb5   :  { %8007 = vmatprep.subr.bf16.mxu0 %v8754_v16 }
  0xb7   :  { %7960 = vmatmul.mubr.bf16.vlgmr.msra.gmra.mxu0 %v1058_v56 }
  0xb8   :  { %8008 = vmatpush3.bf16.msra.mxu0 %v8754_v16  ;;  %7963 = vmatprep.mubr.bf16.mxu0 %v1059_v58 }
  0xb9   :  { %8009 = vmatprep.subr.bf16.mxu0 %v8755_v17 }
  0xbc   :  { %8010 = vmatpush3.bf16.msra.mxu0 %v8755_v17 }
  0xbd   :  { %8011 = vmatprep.subr.bf16.mxu0 %v8756_v18 }
  0xbf   :  { %7964 = vmatmul.mubr.bf16.gmra.mxu0 %v1060_v0 }
  0xc0   :  { %8012 = vmatpush3.bf16.msra.mxu0 %v8756_v18  ;;  %7967 = vmatprep.mubr.bf16.mxu0 %v1061_v2 }
  0xc1   :  { %8013 = vmatprep.subr.bf16.mxu0 %v8757_v19 }
  0xc4   :  { %8014 = vmatpush3.bf16.msra.mxu0 %v8757_v19 }
  0xc5   :  { %8015 = vmatprep.subr.bf16.mxu0 %v8758_v20 }
  0xc7   :  { %7968 = vmatmul.mubr.bf16.gmra.mxu0 %v1062_v8 }
  0xc8   :  { %8016 = vmatpush3.bf16.msra.mxu0 %v8758_v20  ;;  %7971 = vmatprep.mubr.bf16.mxu0 %v1063_v10 }
  0xc9   :  { %8017 = vmatprep.subr.bf16.mxu0 %v8759_v21 }
  0xcc   :  { %8018 = vmatpush3.bf16.msra.mxu0 %v8759_v21 }
  0xcd   :  { %8019 = vmatprep.subr.bf16.mxu0 %v8760_v22 }
  0xcf   :  { %7972 = vmatmul.mubr.bf16.gmra.mxu0 %v1064_v14 }
  0xd0   :  { %8020 = vmatpush3.bf16.msra.mxu0 %v8760_v22  ;;  %8023 = vmatprep.mubr.bf16.mxu0 %v1883_v26 }
  0xd1   :  { %8021 = vmatprep.subr.bf16.mxu0 %v8761_v25 }
  0xd4   :  { %8022 = vmatpush3.bf16.msra.mxu0 %v8761_v25 }
  0xd7   :  { %8024 = vmatmul.mubr.bf16.vlgmr.msra.gmra.mxu0 %v1884_v31 }
  0xd8   :  { %8027 = vmatprep.mubr.bf16.mxu0 %v1885_v32 }
  0xdf   :  { %8028 = vmatmul.mubr.bf16.gmra.mxu0 %v1886_v38 }
  0xe0   :  { %8031 = vmatprep.mubr.bf16.mxu0 %v1887_v39 }
  0xe7   :  { %8032 = vmatmul.mubr.bf16.gmra.mxu0 %v1888_v44  ;;  %v8763_v44 = vld [vmem:[#allocation7 + $0x8] sm:$0xff]  }
  0xe8   :  { %8035 = vmatprep.mubr.bf16.mxu0 %v1889_v45 }
  0xef   :  { %8036 = vmatmul.mubr.bf16.gmra.mxu0 %v1890_v48 }
 0x117   :  { %v7769_v49 = vpop.f32.mrf.mxu0 }
 0x118   :  { %v356_v31 = vadd.f32 %v7769_v49, %v7016_v63 }
 0x119   :  { %v347_v50 = vpop.f32.mrf.mxu0 }
 0x11a   :  { %v348_v36 = vadd.f32 %v7016_v63, %v347_v50 }
 0x11b   :  { %v7770_v51 = vpop.f32.mrf.mxu0 }
 0x11c   :  { %v359_v28 = vadd.f32 %v7770_v51, %v7016_v63 }
 0x11d   :  { %v350_v52 = vpop.f32.mrf.mxu0 }
 0x11e   :  { %v443_v33 = vpack.c.bf16 %v359_v28, %v356_v31  ;;  %v351_v34 = vadd.f32 %v7016_v63, %v350_v52 }
 0x11f   :  { %v7773_v53 = vpop.f32.mrf.mxu0 }
 0x120   :  { %v372_v21 = vadd.f32 %v7773_v53, %v7016_v63  ;;  %v442_v38 = vpack.c.bf16 %v351_v34, %v348_v36 }
 0x121   :  { %v363_v54 = vpop.f32.mrf.mxu0 }
 0x122   :  { %v364_v26 = vadd.f32 %v7016_v63, %v363_v54 }
 0x123   :  { %v7774_v55 = vpop.f32.mrf.mxu0 }
 0x124   :  { %v375_v18 = vadd.f32 %v7774_v55, %v7016_v63 }
 0x125   :  { %v366_v56 = vpop.f32.mrf.mxu0 }
 0x126   :  { %v445_v23 = vpack.c.bf16 %v375_v18, %v372_v21  ;;  %v367_v24 = vadd.f32 %v7016_v63, %v366_v56 }
 0x127   :  { %v7777_v57 = vpop.f32.mrf.mxu0 }
 0x128   :  { %v388_v11 = vadd.f32 %v7777_v57, %v7016_v63  ;;  %v444_v29 = vpack.c.bf16 %v367_v24, %v364_v26  ;;  %v8770_v24 = vld [vmem:[#allocation7 + $0x40] sm:$0xff]  }
 0x129   :  { %v379_v58 = vpop.f32.mrf.mxu0 }
 0x12a   :  { %v380_v16 = vadd.f32 %v7016_v63, %v379_v58  ;;  %v8765_v58 = vld [vmem:[#allocation7 + $0x18] sm:$0xff]  }
 0x12b   :  { %v7778_v59 = vpop.f32.mrf.mxu0 }
 0x12c   :  { %v391_v8 = vadd.f32 %v7778_v59, %v7016_v63 }
 0x12d   :  { %v382_v60 = vpop.f32.mrf.mxu0 }
 0x12e   :  { %v447_v13 = vpack.c.bf16 %v391_v8, %v388_v11  ;;  %v383_v14 = vadd.f32 %v7016_v63, %v382_v60  ;;  %v8766_v60 = vld [vmem:[#allocation7 + $0x20] sm:$0xff]  }
 0x12f   :  { %v7781_v61 = vpop.f32.mrf.mxu0 }
 0x130   :  { %v404_v1 = vadd.f32 %v7781_v61, %v7016_v63  ;;  %v446_v19 = vpack.c.bf16 %v383_v14, %v380_v16 }
 0x131   :  { %v395_v62 = vpop.f32.mrf.mxu0 }
 0x132   :  { %v396_v4 = vadd.f32 %v7016_v63, %v395_v62 }
 0x133   :  { %v7782_v0 = vpop.f32.mrf.mxu0 }
 0x134   :  { %v407_v2 = vadd.f32 %v7782_v0, %v7016_v63 }
 0x135   :  { %v398_v3 = vpop.f32.mrf.mxu0 }
 0x136   :  { %v399_v5 = vadd.f32 %v7016_v63, %v398_v3  ;;  %v449_v6 = vpack.c.bf16 %v407_v2, %v404_v1 }
 0x137   :  { %v9131_v7 = vpop.f32.mrf.mxu0 }
 0x138   :  { %v448_v9 = vpack.c.bf16 %v399_v5, %v396_v4  ;;  %7783 = vmatprep.subr.bf16.mxu1 %v449_v6  ;;  %v767_v18 = vadd.f32 %v9131_v7, %v9145_v40  ;;  %v9186_v7 = vld [vmem:[#allocation10 + $0x2] ss:$0 sm:$0xff] }
 0x139   :  { %7784 = vmatpush3.bf16.msra.mxu1 %v449_v6  ;;  %v9133_v10 = vpop.f32.mrf.mxu0  ;;  %v8767_v6 = vld [vmem:[#allocation7 + $0x28] sm:$0xff]  }
 0x13a   :  { %7785 = vmatprep.subr.bf16.mxu1 %v448_v9 }
 0x13b   :  { %v9135_v12 = vpop.f32.mrf.mxu0 }
 0x13c   :  { %v770_v14 = vadd.f32 %v9135_v12, %v9145_v40  ;;  %v759_v12 = vadd.f32 %v9145_v40, %v9133_v10 }
 0x13d   :  { %7786 = vmatpush3.bf16.msra.mxu1 %v448_v9  ;;  %v9137_v15 = vpop.f32.mrf.mxu0  ;;  %v8768_v9 = vld [vmem:[#allocation7 + $0x30] sm:$0xff]  }
 0x13e   :  { %7787 = vmatprep.subr.bf16.mxu1 %v447_v13  ;;  %v856_v21 = vpack.c.bf16 %v770_v14, %v767_v18 }
 0x13f   :  { %v9139_v17 = vpop.f32.mrf.mxu0 }
 0x140   :  { %v783_v2 = vadd.f32 %v9139_v17, %v9145_v40 }
 0x141   :  { %7788 = vmatpush3.bf16.msra.mxu1 %v447_v13  ;;  %v9141_v20 = vpop.f32.mrf.mxu0 }
 0x142   :  { %7789 = vmatprep.subr.bf16.mxu1 %v446_v19  ;;  %v775_v11 = vadd.f32 %v9145_v40, %v9141_v20  ;;  %v8769_v20 = vld [vmem:[#allocation7 + $0x38] sm:$0xff]  }
 0x143   :  { %v7838_v22 = vpop.f32.mrf.mxu0 }
 0x144   :  { %v786_v63 = vadd.f32 %v7838_v22, %v9145_v40  ;;  %v762_v22 = vadd.f32 %v9145_v40, %v9137_v15 }
 0x145   :  { %7790 = vmatpush3.bf16.msra.mxu1 %v446_v19  ;;  %v9143_v25 = vpop.f32.mrf.mxu0 }
 0x146   :  { %7791 = vmatprep.subr.bf16.mxu1 %v445_v23  ;;  %v858_v4 = vpack.c.bf16 %v786_v63, %v783_v2  ;;  %v778_v5 = vadd.f32 %v9145_v40, %v9143_v25  ;;  %v855_v26 = vpack.c.bf16 %v762_v22, %v759_v12  ;;  %v8780_v22 = vld [vmem:[#allocation7 + $0x90] sm:$0xff]  }
 0x147   :  { %v7841_v27 = vpop.f32.mrf.mxu0 }
 0x148   :  { %v799_v54 = vadd.f32 %v7841_v27, %v9145_v40  ;;  %v857_v16 = vpack.c.bf16 %v778_v5, %v775_v11  ;;  %v8778_v11 = vld [vmem:[#allocation7 + $0x80] sm:$0xff]  }
 0x149   :  { %7792 = vmatpush3.bf16.msra.mxu1 %v445_v23  ;;  %v790_v30 = vpop.f32.mrf.mxu0 }
 0x14a   :  { %7793 = vmatprep.subr.bf16.mxu1 %v444_v29  ;;  %v791_v61 = vadd.f32 %v9145_v40, %v790_v30  ;;  %v8771_v30 = vld [vmem:[#allocation7 + $0x48] sm:$0xff]  }
 0x14b   :  { %v7842_v32 = vpop.f32.mrf.mxu0 }
 0x14c   :  { %v802_v51 = vadd.f32 %v7842_v32, %v9145_v40  ;;  %v8772_v32 = vld [vmem:[#allocation7 + $0x50] sm:$0xff]  }
 0x14d   :  { %7794 = vmatpush3.bf16.msra.mxu1 %v444_v29  ;;  %v793_v35 = vpop.f32.mrf.mxu0 }
 0x14e   :  { %7795 = vmatprep.subr.bf16.mxu1 %v443_v33  ;;  %v860_v56 = vpack.c.bf16 %v802_v51, %v799_v54  ;;  %v794_v57 = vadd.f32 %v9145_v40, %v793_v35 }
 0x14f   :  { %v7845_v37 = vpop.f32.mrf.mxu0 }
 0x150   :  { %v815_v42 = vadd.f32 %v7845_v37, %v9145_v40  ;;  %v859_v0 = vpack.c.bf16 %v794_v57, %v791_v61  ;;  %v8776_v61 = vld [vmem:[#allocation7 + $0x70] sm:$0xff]  }
 0x151   :  { %7796 = vmatpush3.bf16.msra.mxu1 %v443_v33  ;;  %v806_v39 = vpop.f32.mrf.mxu0 }
 0x152   :  { %7797 = vmatprep.subr.bf16.mxu1 %v442_v38  ;;  %v807_v47 = vadd.f32 %v9145_v40, %v806_v39 }
 0x153   :  { %v7846_v41 = vpop.f32.mrf.mxu0 }
 0x154   :  { %v818_v43 = vadd.f32 %v7846_v41, %v9145_v40 }
 0x155   :  { %7798 = vmatpush3.bf16.msra.mxu1 %v442_v38  ;;  %v809_v45 = vpop.f32.mrf.mxu0 }
 0x156   :  { %v862_v48 = vpack.c.bf16 %v818_v43, %v815_v42  ;;  %v810_v49 = vadd.f32 %v9145_v40, %v809_v45  ;;  %v8773_v43 = vld [vmem:[#allocation7 + $0x58] sm:$0xff]   ;;  %v8774_v45 = vld [vmem:[#allocation7 + $0x60] sm:$0xff]  }
 0x157   :  { %v9151_v50 = vpop.f32.mrf.mxu0 }
 0x158   :  { %v861_v52 = vpack.c.bf16 %v810_v49, %v807_v47  ;;  %7800 = vmatmul.mubr.bf16.vlgmr.msra.gmra.mxu1 %v8763_v44  ;;  %7847 = vmatprep.subr.bf16.mxu1 %v862_v48 }
 0x159   :  { %7848 = vmatpush3.bf16.msra.mxu1 %v862_v48  ;;  %v9154_v53 = vpop.f32.mrf.mxu0  ;;  %7803 = vmatprep.mubr.bf16.mxu1 %v8764_v46 }
 0x15a   :  { %7849 = vmatprep.subr.bf16.mxu1 %v861_v52 }
 0x15b   :  { %v9157_v55 = vpop.f32.mrf.mxu0 }
 0x15d   :  { %7850 = vmatpush3.bf16.msra.mxu1 %v861_v52  ;;  %v9160_v59 = vpop.f32.mrf.mxu0 }
 0x15e   :  { %7851 = vmatprep.subr.bf16.mxu1 %v860_v56 }
 0x15f   :  { %v9163_v62 = vpop.f32.mrf.mxu0 }
 0x160   :  { %7804 = vmatmul.mubr.bf16.gmra.mxu1 %v8765_v58  ;;  %v1197_v52 = vadd.f32 %v9163_v62, %v9186_v7  ;;  %v8775_v58 = vld [vmem:[#allocation7 + $0x68] sm:$0xff]   ;;  %v1184_v62 = vadd.f32 %v9157_v55, %v9186_v7  ;;  %v1173_v55 = vadd.f32 %v9186_v7, %v9154_v53 }
 0x161   :  { %7852 = vmatpush3.bf16.msra.mxu1 %v860_v56  ;;  %v9166_v1 = vpop.f32.mrf.mxu0  ;;  %7807 = vmatprep.mubr.bf16.mxu1 %v8766_v60 }
 0x162   :  { %7853 = vmatprep.subr.bf16.mxu1 %v859_v0  ;;  %v1189_v63 = vadd.f32 %v9186_v7, %v9166_v1  ;;  %v8777_v1 = vld [vmem:[#allocation7 + $0x78] sm:$0xff]  }
 0x163   :  { %v9170_v3 = vpop.f32.mrf.mxu0 }
 0x164   :  { %v1200_v48 = vadd.f32 %v9170_v3, %v9186_v7 }
 0x165   :  { %7854 = vmatpush3.bf16.msra.mxu1 %v859_v0  ;;  %v9174_v8 = vpop.f32.mrf.mxu0 }
 0x166   :  { %7855 = vmatprep.subr.bf16.mxu1 %v858_v4  ;;  %v1271_v56 = vpack.c.bf16 %v1200_v48, %v1197_v52  ;;  %v1192_v57 = vadd.f32 %v9186_v7, %v9174_v8  ;;  %v1176_v8 = vadd.f32 %v9186_v7, %v9160_v59 }
 0x167   :  { %v7905_v13 = vpop.f32.mrf.mxu0 }
 0x168   :  { %7808 = vmatmul.mubr.bf16.gmra.mxu1 %v8767_v6  ;;  %v1213_v39 = vadd.f32 %v7905_v13, %v9186_v7  ;;  %v1270_v2 = vpack.c.bf16 %v1192_v57, %v1189_v63  ;;  %v1268_v14 = vpack.c.bf16 %v1176_v8, %v1173_v55  ;;  %v8786_v63 = vld [vmem:[#allocation7 + $0xc0] sm:$0xff]   ;;  %v8788_v8 = vld [vmem:[#allocation7 + $0xd0] sm:$0xff]  }
 0x169   :  { %7856 = vmatpush3.bf16.msra.mxu1 %v858_v4  ;;  %v1204_v17 = vpop.f32.mrf.mxu0  ;;  %7811 = vmatprep.mubr.bf16.mxu1 %v8768_v9  ;;  %v1181_v4 = vadd.f32 %v9151_v50, %v9186_v7  ;;  %v9228_v50 = vld [vmem:[#allocation10 + $0x3] ss:$0 sm:$0xff] }
 0x16a   :  { %7857 = vmatprep.subr.bf16.mxu1 %v857_v16  ;;  %v1205_v46 = vadd.f32 %v9186_v7, %v1204_v17 }
 0x16b   :  { %v7906_v19 = vpop.f32.mrf.mxu0  ;;  %v1269_v6 = vpack.c.bf16 %v1184_v62, %v1181_v4 }
 0x16c   :  { %v1216_v36 = vadd.f32 %v7906_v19, %v9186_v7  ;;  %v8779_v19 = vld [vmem:[#allocation7 + $0x88] sm:$0xff]  }
 0x16d   :  { %7858 = vmatpush3.bf16.msra.mxu1 %v857_v16  ;;  %v1207_v23 = vpop.f32.mrf.mxu0 }
 0x16e   :  { %7859 = vmatprep.subr.bf16.mxu1 %v856_v21  ;;  %v1273_v41 = vpack.c.bf16 %v1216_v36, %v1213_v39  ;;  %v1208_v42 = vadd.f32 %v9186_v7, %v1207_v23 }
 0x16f   :  { %v7909_v25 = vpop.f32.mrf.mxu0 }
 0x170   :  { %7812 = vmatmul.mubr.bf16.gmra.mxu1 %v8769_v20  ;;  %v1229_v15 = vadd.f32 %v7909_v25, %v9186_v7  ;;  %v1272_v49 = vpack.c.bf16 %v1208_v42, %v1205_v46  ;;  %v8784_v46 = vld [vmem:[#allocation7 + $0xb0] sm:$0xff]  }
 0x171   :  { %7860 = vmatpush3.bf16.msra.mxu1 %v856_v21  ;;  %v1220_v27 = vpop.f32.mrf.mxu0  ;;  %7863 = vmatprep.mubr.bf16.mxu1 %v8770_v24 }
 0x172   :  { %7861 = vmatprep.subr.bf16.mxu1 %v855_v26  ;;  %v1221_v10 = vadd.f32 %v9186_v7, %v1220_v27 }
 0x173   :  { %v7910_v28 = vpop.f32.mrf.mxu0 }
 0x174   :  { %v1232_v29 = vadd.f32 %v7910_v28, %v9186_v7 }
 0x175   :  { %7862 = vmatpush3.bf16.msra.mxu1 %v855_v26  ;;  %v1223_v31 = vpop.f32.mrf.mxu0 }
 0x176   :  { %v1275_v33 = vpack.c.bf16 %v1232_v29, %v1229_v15  ;;  %v1224_v34 = vadd.f32 %v9186_v7, %v1223_v31  ;;  %v8781_v29 = vld [vmem:[#allocation7 + $0x98] sm:$0xff]   ;;  %v8782_v31 = vld [vmem:[#allocation7 + $0xa0] sm:$0xff]  }
 0x177   :  { %v9192_v35 = vpop.f32.mrf.mxu0 }
 0x178   :  { %v1274_v37 = vpack.c.bf16 %v1224_v34, %v1221_v10  ;;  %7864 = vmatmul.mubr.bf16.vlgmr.msra.gmra.mxu1 %v8771_v30  ;;  %7911 = vmatprep.subr.bf16.mxu1 %v1275_v33 }
 0x179   :  { %7912 = vmatpush3.bf16.msra.mxu1 %v1275_v33  ;;  %v9195_v38 = vpop.f32.mrf.mxu0  ;;  %7867 = vmatprep.mubr.bf16.mxu1 %v8772_v32 }
 0x17a   :  { %7913 = vmatprep.subr.bf16.mxu1 %v1274_v37 }
 0x17b   :  { %v9198_v40 = vpop.f32.mrf.mxu0 }
 0x17c   :  { %v1596_v52 = vadd.f32 %v9198_v40, %v9228_v50  ;;  %v1585_v40 = vadd.f32 %v9228_v50, %v9195_v38 }
 0x17d   :  { %7914 = vmatpush3.bf16.msra.mxu1 %v1274_v37  ;;  %v9201_v44 = vpop.f32.mrf.mxu0 }
 0x17e   :  { %7915 = vmatprep.subr.bf16.mxu1 %v1273_v41 }
 0x17f   :  { %v9204_v47 = vpop.f32.mrf.mxu0 }
 0x180   :  { %7868 = vmatmul.mubr.bf16.gmra.mxu1 %v8773_v43  ;;  %v1609_v37 = vadd.f32 %v9204_v47, %v9228_v50  ;;  %v8783_v43 = vld [vmem:[#allocation7 + $0xa8] sm:$0xff]  }
 0x181   :  { %7916 = vmatpush3.bf16.msra.mxu1 %v1273_v41  ;;  %v9208_v51 = vpop.f32.mrf.mxu0  ;;  %7871 = vmatprep.mubr.bf16.mxu1 %v8774_v45 }
 0x182   :  { %7917 = vmatprep.subr.bf16.mxu1 %v1272_v49  ;;  %v1601_v48 = vadd.f32 %v9228_v50, %v9208_v51  ;;  %v8785_v51 = vld [vmem:[#allocation7 + $0xb8] sm:$0xff]  }
 0x183   :  { %v9212_v54 = vpop.f32.mrf.mxu0 }
 0x184   :  { %v1612_v33 = vadd.f32 %v9212_v54, %v9228_v50 }
 0x185   :  { %7918 = vmatpush3.bf16.msra.mxu1 %v1272_v49  ;;  %v9216_v60 = vpop.f32.mrf.mxu0 }
 0x186   :  { %7919 = vmatprep.subr.bf16.mxu1 %v1271_v56  ;;  %v1684_v41 = vpack.c.bf16 %v1612_v33, %v1609_v37  ;;  %v1604_v42 = vadd.f32 %v9228_v50, %v9216_v60  ;;  %v1588_v60 = vadd.f32 %v9228_v50, %v9201_v44  ;;  %v8787_v44 = vld [vmem:[#allocation7 + $0xc8] sm:$0xff]   ;;  %v8794_v33 = vld [vmem:[#allocation7 + $0x100] sm:$0xff]  }
 0x187   :  { %v7969_v0 = vpop.f32.mrf.mxu0  ;;  %v8795_v37 = vld [vmem:[#allocation7 + $0x108] sm:$0xff]  }
 0x188   :  { %7872 = vmatmul.mubr.bf16.gmra.mxu1 %v8775_v58  ;;  %v1625_v27 = vadd.f32 %v7969_v0, %v9228_v50  ;;  %v1683_v47 = vpack.c.bf16 %v1604_v42, %v1601_v48  ;;  %v1681_v62 = vpack.c.bf16 %v1588_v60, %v1585_v40  ;;  %v8798_v42 = vld [vmem:[#allocation7 + $0x120] sm:$0xff]   ;;  %v8800_v48 = vld [vmem:[#allocation7 + $0x130] sm:$0xff]  }
 0x189   :  { %7920 = vmatpush3.bf16.msra.mxu1 %v1271_v56  ;;  %v1616_v3 = vpop.f32.mrf.mxu0  ;;  %7875 = vmatprep.mubr.bf16.mxu1 %v8776_v61  ;;  %v1593_v56 = vadd.f32 %v9192_v35, %v9228_v50  ;;  %v7084_v35 = vld [vmem:[#allocation10 + $0x4] ss:$0 sm:$0xff] }
 0x18a   :  { %7921 = vmatprep.subr.bf16.mxu1 %v1270_v2  ;;  %v1617_v32 = vadd.f32 %v9228_v50, %v1616_v3 }
 0x18b   :  { %v7970_v5 = vpop.f32.mrf.mxu0  ;;  %v1682_v58 = vpack.c.bf16 %v1596_v52, %v1593_v56  ;;  %v8801_v52 = vld [vmem:[#allocation7 + $0x138] sm:$0xff]  }
 0x18c   :  { %v1628_v12 = vadd.f32 %v7970_v5, %v9228_v50 }
 0x18d   :  { %7922 = vmatpush3.bf16.msra.mxu1 %v1270_v2  ;;  %v1619_v9 = vpop.f32.mrf.mxu0 }
 0x18e   :  { %7923 = vmatprep.subr.bf16.mxu1 %v1269_v6  ;;  %v1686_v28 = vpack.c.bf16 %v1628_v12, %v1625_v27  ;;  %v1620_v15 = vadd.f32 %v9228_v50, %v1619_v9  ;;  %v8802_v12 = vld [vmem:[#allocation9 + $0x178] sm:$0xff]  }
 0x18f   :  { %v7973_v13 = vpop.f32.mrf.mxu0  ;;  %8071 = vmatprep.subr.bf16.mxu0 %v8802_v12 }
 0x190   :  { %7876 = vmatmul.mubr.bf16.gmra.mxu1 %v8777_v1  ;;  %v1641_v59 = vadd.f32 %v7973_v13, %v9228_v50  ;;  %v1685_v34 = vpack.c.bf16 %v1620_v15, %v1617_v32  ;;  %8072 = vmatpush3.bf16.msra.mxu0 %v8802_v12  ;;  %v8803_v15 = vld [vmem:[#allocation9 + $0x170] sm:$0xff]  }
 0x191   :  { %7924 = vmatpush3.bf16.msra.mxu1 %v1269_v6  ;;  %v1632_v16 = vpop.f32.mrf.mxu0  ;;  %7927 = vmatprep.mubr.bf16.mxu1 %v8778_v11 }
 0x192   :  { %7925 = vmatprep.subr.bf16.mxu1 %v1268_v14  ;;  %v1633_v53 = vadd.f32 %v9228_v50, %v1632_v16  ;;  %8073 = vmatprep.subr.bf16.mxu0 %v8803_v15 }
 0x193   :  { %v7974_v17 = vpop.f32.mrf.mxu0 }
 0x194   :  { %v1644_v18 = vadd.f32 %v7974_v17, %v9228_v50  ;;  %v8790_v17 = vld [vmem:[#allocation7 + $0xe0] sm:$0xff]   ;;  %8074 = vmatpush3.bf16.msra.mxu0 %v8803_v15 }
 0x195   :  { %7926 = vmatpush3.bf16.msra.mxu1 %v1268_v14  ;;  %v1635_v21 = vpop.f32.mrf.mxu0 }
 0x196   :  { %v1688_v20 = vpack.c.bf16 %v1644_v18, %v1641_v59  ;;  %v1636_v23 = vadd.f32 %v9228_v50, %v1635_v21  ;;  %v8789_v50 = vld [vmem:[#allocation7 + $0xd8] sm:$0xff]  }
 0x197   :  { %v9234_v24 = vpop.f32.mrf.mxu0 }
 0x198   :  { %v1687_v25 = vpack.c.bf16 %v1636_v23, %v1633_v53  ;;  %7928 = vmatmul.mubr.bf16.vlgmr.msra.gmra.mxu1 %v8779_v19  ;;  %7975 = vmatprep.subr.bf16.mxu1 %v1688_v20  ;;  %v8792_v23 = vld [vmem:[#allocation7 + $0xf0] sm:$0xff]  }
 0x199   :  { %7976 = vmatpush3.bf16.msra.mxu1 %v1688_v20  ;;  %v9237_v26 = vpop.f32.mrf.mxu0  ;;  %7931 = vmatprep.mubr.bf16.mxu1 %v8780_v22  ;;  %v8791_v20 = vld [vmem:[#allocation7 + $0xe8] sm:$0xff]  }
 0x19a   :  { %7977 = vmatprep.subr.bf16.mxu1 %v1687_v25 }
 0x19b   :  { %v9240_v7 = vpop.f32.mrf.mxu0 }
 0x19c   :  { %v2010_v27 = vadd.f32 %v9240_v7, %v7084_v35  ;;  %v1999_v7 = vadd.f32 %v7084_v35, %v9237_v26  ;;  %v8807_v26 = vld [vmem:[#allocation9 + $0x150] sm:$0xff]  }
 0x19d   :  { %7978 = vmatpush3.bf16.msra.mxu1 %v1687_v25  ;;  %v9243_v30 = vpop.f32.mrf.mxu0 }
 0x19e   :  { %7979 = vmatprep.subr.bf16.mxu1 %v1686_v28  ;;  %v2002_v32 = vadd.f32 %v7084_v35, %v9243_v30  ;;  %v8796_v30 = vld [vmem:[#allocation7 + $0x110] sm:$0xff]  }
 0x19f   :  { %v9246_v10 = vpop.f32.mrf.mxu0 }
 0x1a0   :  { %7932 = vmatmul.mubr.bf16.gmra.mxu1 %v8781_v29  ;;  %v2023_v21 = vadd.f32 %v9246_v10, %v7084_v35  ;;  %v2007_v29 = vadd.f32 %v9234_v24, %v7084_v35  ;;  %v8793_v10 = vld [vmem:[#allocation7 + $0xf8] sm:$0xff]   ;;  %v8805_v24 = vld [vmem:[#allocation9 + $0x160] sm:$0xff]  }
 0x1a1   :  { %7980 = vmatpush3.bf16.msra.mxu1 %v1686_v28  ;;  %v9250_v36 = vpop.f32.mrf.mxu0  ;;  %7935 = vmatprep.mubr.bf16.mxu1 %v8782_v31 }
 0x1a2   :  { %7981 = vmatprep.subr.bf16.mxu1 %v1685_v34  ;;  %v2015_v25 = vadd.f32 %v7084_v35, %v9250_v36  ;;  %v2095_v31 = vpack.c.bf16 %v2010_v27, %v2007_v29  ;;  %v2094_v36 = vpack.c.bf16 %v2002_v32, %v1999_v7 }
 0x1a3   :  { %v8030_v39 = vpop.f32.mrf.mxu0 }
 0x1a4   :  { %v2026_v18 = vadd.f32 %v8030_v39, %v7084_v35  ;;  %v8806_v39 = vld [vmem:[#allocation9 + $0x158] sm:$0xff]  }
 0x1a5   :  { %7982 = vmatpush3.bf16.msra.mxu1 %v1685_v34  ;;  %v9256_v45 = vpop.f32.mrf.mxu0  ;;  %v8804_v34 = vld [vmem:[#allocation9 + $0x168] sm:$0xff]  }
 0x1a6   :  { %7983 = vmatprep.subr.bf16.mxu1 %v1684_v41  ;;  %v2097_v22 = vpack.c.bf16 %v2026_v18, %v2023_v21  ;;  %v2018_v53 = vadd.f32 %v7084_v35, %v9256_v45  ;;  %8075 = vmatprep.subr.bf16.mxu0 %v8804_v34  ;;  %v8809_v45 = vld [vmem:[#allocation9 + $0x140] sm:$0xff]  }
 0x1a7   :  { %v8033_v49 = vpop.f32.mrf.mxu0  ;;  %8076 = vmatpush3.bf16.msra.mxu0 %v8804_v34 }
 0x1a8   :  { %7936 = vmatmul.mubr.bf16.gmra.mxu1 %v8783_v43  ;;  %v2039_v13 = vadd.f32 %v8033_v49, %v7084_v35  ;;  %v2096_v28 = vpack.c.bf16 %v2018_v53, %v2015_v25  ;;  %8077 = vmatprep.subr.bf16.mxu0 %v8805_v24  ;;  %v8808_v43 = vld [vmem:[#allocation9 + $0x148] sm:$0xff]   ;;  %v9275_v49 = vld [vmem:[#allocation9 + $0x1b8] sm:$0xff]  }
 0x1a9   :  { %7984 = vmatpush3.bf16.msra.mxu1 %v1684_v41  ;;  %v2030_v54 = vpop.f32.mrf.mxu0  ;;  %7939 = vmatprep.mubr.bf16.mxu1 %v8784_v46  ;;  %v8797_v41 = vld [vmem:[#allocation7 + $0x118] sm:$0xff]   ;;  %v8799_v46 = vld [vmem:[#allocation7 + $0x128] sm:$0xff]  }
 0x1aa   :  { %7985 = vmatprep.subr.bf16.mxu1 %v1683_v47  ;;  %v2031_v59 = vadd.f32 %v7084_v35, %v2030_v54 }
 0x1ab   :  { %v8034_v57 = vpop.f32.mrf.mxu0  ;;  %8078 = vmatpush3.bf16.msra.mxu0 %v8805_v24 }
 0x1ac   :  { %v2042_v38 = vadd.f32 %v8034_v57, %v7084_v35  ;;  %8079 = vmatprep.subr.bf16.mxu0 %v8806_v39 }
 0x1ad   :  { %7986 = vmatpush3.bf16.msra.mxu1 %v1683_v47  ;;  %v2033_v61 = vpop.f32.mrf.mxu0 }
 0x1ae   :  { %7987 = vmatprep.subr.bf16.mxu1 %v1682_v58  ;;  %v2099_v14 = vpack.c.bf16 %v2042_v38, %v2039_v13  ;;  %v2034_v16 = vadd.f32 %v7084_v35, %v2033_v61 }
 0x1af   :  { %v8037_v0 = vpop.f32.mrf.mxu0  ;;  %8080 = vmatpush3.bf16.msra.mxu0 %v8806_v39 }
 0x1b0   :  { %7940 = vmatmul.mubr.bf16.gmra.mxu1 %v8785_v51  ;;  %v2055_v4 = vadd.f32 %v8037_v0, %v7084_v35  ;;  %v2098_v19 = vpack.c.bf16 %v2034_v16, %v2031_v59  ;;  %8081 = vmatprep.subr.bf16.mxu0 %v8807_v26 }
 0x1b1   :  { %7988 = vmatpush3.bf16.msra.mxu1 %v1682_v58  ;;  %v2046_v2 = vpop.f32.mrf.mxu0  ;;  %7991 = vmatprep.mubr.bf16.mxu1 %v8786_v63 }
 0x1b2   :  { %7989 = vmatprep.subr.bf16.mxu1 %v1681_v62  ;;  %v2047_v1 = vadd.f32 %v7084_v35, %v2046_v2 }
 0x1b3   :  { %v8038_v3 = vpop.f32.mrf.mxu0  ;;  %8082 = vmatpush3.bf16.msra.mxu0 %v8807_v26 }
 0x1b4   :  { %v2058_v5 = vadd.f32 %v8038_v3, %v7084_v35  ;;  %8083 = vmatprep.subr.bf16.mxu0 %v8808_v43 }
 0x1b5   :  { %7990 = vmatpush3.bf16.msra.mxu1 %v1681_v62  ;;  %v2049_v6 = vpop.f32.mrf.mxu0 }
 0x1b6   :  { %v2101_v9 = vpack.c.bf16 %v2058_v5, %v2055_v4  ;;  %v2050_v11 = vadd.f32 %v7084_v35, %v2049_v6 }
 0x1b7   :  { %8084 = vmatpush3.bf16.msra.mxu0 %v8808_v43 }
 0x1b8   :  { %v2100_v55 = vpack.c.bf16 %v2050_v11, %v2047_v1  ;;  %7992 = vmatmul.mubr.bf16.vlgmr.msra.gmra.mxu1 %v8787_v44  ;;  %8039 = vmatprep.subr.bf16.mxu1 %v2101_v9 }
 0x1b9   :  { %8040 = vmatpush3.bf16.msra.mxu1 %v2101_v9  ;;  %7995 = vmatprep.mubr.bf16.mxu1 %v8788_v8 }
 0x1ba   :  { %8041 = vmatprep.subr.bf16.mxu1 %v2100_v55  ;;  %8085 = vmatprep.subr.bf16.mxu0 %v8809_v45 }
 0x1bb   :  { %8086 = vmatpush3.bf16.msra.mxu0 %v8809_v45 }
 0x1bc   :  { %8135 = vmatprep.subr.bf16.mxu0 %v9275_v49 }
 0x1bd   :  { %8042 = vmatpush3.bf16.msra.mxu1 %v2100_v55 }
 0x1be   :  { %8043 = vmatprep.subr.bf16.mxu1 %v2099_v14 }
 0x1c0   :  { %7996 = vmatmul.mubr.bf16.gmra.mxu1 %v8789_v50 }
 0x1c1   :  { %8044 = vmatpush3.bf16.msra.mxu1 %v2099_v14  ;;  %7999 = vmatprep.mubr.bf16.mxu1 %v8790_v17 }
 0x1c2   :  { %8045 = vmatprep.subr.bf16.mxu1 %v2098_v19 }
 0x1c5   :  { %8046 = vmatpush3.bf16.msra.mxu1 %v2098_v19 }
 0x1c6   :  { %8047 = vmatprep.subr.bf16.mxu1 %v2097_v22 }
 0x1c8   :  { %8000 = vmatmul.mubr.bf16.gmra.mxu1 %v8791_v20 }
 0x1c9   :  { %8048 = vmatpush3.bf16.msra.mxu1 %v2097_v22  ;;  %8003 = vmatprep.mubr.bf16.mxu1 %v8792_v23 }
 0x1ca   :  { %8049 = vmatprep.subr.bf16.mxu1 %v2096_v28 }
 0x1cd   :  { %8050 = vmatpush3.bf16.msra.mxu1 %v2096_v28 }
 0x1ce   :  { %8051 = vmatprep.subr.bf16.mxu1 %v2095_v31 }
 0x1d0   :  { %8004 = vmatmul.mubr.bf16.gmra.mxu1 %v8793_v10 }
 0x1d1   :  { %8052 = vmatpush3.bf16.msra.mxu1 %v2095_v31  ;;  %8055 = vmatprep.mubr.bf16.mxu1 %v8794_v33 }
 0x1d2   :  { %8053 = vmatprep.subr.bf16.mxu1 %v2094_v36 }
 0x1d5   :  { %8054 = vmatpush3.bf16.msra.mxu1 %v2094_v36 }
 0x1d8   :  { %8056 = vmatmul.mubr.bf16.vlgmr.msra.gmra.mxu1 %v8795_v37 }
 0x1d9   :  { %8059 = vmatprep.mubr.bf16.mxu1 %v8796_v30 }
 0x1e0   :  { %8060 = vmatmul.mubr.bf16.gmra.mxu1 %v8797_v41 }
 0x1e1   :  { %8063 = vmatprep.mubr.bf16.mxu1 %v8798_v42  ;;  %v8811_v42 = vld [vmem:[#allocation9 + $0x1b0] sm:$0xff]  }
 0x1e8   :  { %8064 = vmatmul.mubr.bf16.gmra.mxu1 %v8799_v46 }
 0x1e9   :  { %8067 = vmatprep.mubr.bf16.mxu1 %v8800_v48 }
 0x1f0   :  { %8068 = vmatmul.mubr.bf16.gmra.mxu1 %v8801_v52 }
 0x218   :  { %v7801_v47 = vpop.f32.mrf.mxu1 }
 0x21a   :  { %v532_v54 = vpop.f32.mrf.mxu1 }
 0x21c   :  { %v7802_v56 = vpop.f32.mrf.mxu1 }
 0x21e   :  { %v535_v57 = vpop.f32.mrf.mxu1 }
 0x220   :  { %v7805_v58 = vpop.f32.mrf.mxu1 }
 0x222   :  { %v548_v60 = vpop.f32.mrf.mxu1 }
 0x224   :  { %v7806_v51 = vpop.f32.mrf.mxu1 }
 0x226   :  { %v551_v61 = vpop.f32.mrf.mxu1 }
 0x228   :  { %v9278_v63 = vpop.f32.mrf.mxu1 }
 0x22a   :  { %v9280_v40 = vpop.f32.mrf.mxu1 }
 0x22c   :  { %v9282_v0 = vpop.f32.mrf.mxu1 }
 0x22e   :  { %v9284_v62 = vpop.f32.mrf.mxu1 }
 0x230   :  { %v9286_v2 = vpop.f32.mrf.mxu1 }
 0x232   :  { %v9288_v35 = vpop.f32.mrf.mxu1 }
 0x234   :  { %v9290_v3 = vpop.f32.mrf.mxu1 }
 0x236   :  { %v9292_v4 = vpop.f32.mrf.mxu1 }
 0x238   :  { %v9294_v5 = vpop.f32.mrf.mxu1 }
 0x23a   :  { %v9296_v44 = vpop.f32.mrf.mxu1 }
 0x23c   :  { %v9298_v6 = vpop.f32.mrf.mxu1 }
 0x23e   :  { %v9300_v8 = vpop.f32.mrf.mxu1 }
 0x240   :  { %v9302_v1 = vpop.f32.mrf.mxu1 }
 0x242   :  { %v9304_v9 = vpop.f32.mrf.mxu1 }
 0x244   :  { %v9306_v11 = vpop.f32.mrf.mxu1 }
 0x246   :  { %v9308_v38 = vpop.f32.mrf.mxu1 }
 0x248   :  { %v9310_v55 = vpop.f32.mrf.mxu1 }
 0x24a   :  { %v9312_v13 = vpop.f32.mrf.mxu1 }
 0x24c   :  { %v9314_v14 = vpop.f32.mrf.mxu1 }
 0x24e   :  { %v9316_v16 = vpop.f32.mrf.mxu1 }
 0x250   :  { %v9318_v50 = vpop.f32.mrf.mxu1 }
 0x252   :  { %v9320_v17 = vpop.f32.mrf.mxu1 }
 0x254   :  { %v9322_v59 = vpop.f32.mrf.mxu1 }
 0x256   :  { %v9324_v18 = vpop.f32.mrf.mxu1 }
 0x258   :  { %v7929_v19 = vpop.f32.mrf.mxu1 }
 0x259   :  { %v1423_v21 = vadd.f32 %v7929_v19, %v7801_v47 }
 0x25a   :  { %v1358_v22 = vpop.f32.mrf.mxu1 }
 0x25b   :  { %v1421_v53 = vadd.f32 %v1358_v22, %v532_v54  ;;  %v2377_v20 = vmul.f32 0.01, %v1423_v21  ;;  %vm2329_vm0 = vcmp.ge.f32.partialorder %v1423_v21, 0.0 }
 0x25c   :  { %v7930_v23 = vpop.f32.mrf.mxu1 }
 0x25d   :  { %v1424_v12 = vadd.f32 %v7930_v23, %v7802_v56  ;;  %v2375_v27 = vmul.f32 0.01, %v1421_v53  ;;  %v2425_v29 = vsel %vm2329_vm0, %v1423_v21, %v2377_v20  ;;  %vm2327_vm2 = vcmp.ge.f32.partialorder %v1421_v53, 0.0  ;;  %v8813_v23 = vld [vmem:[#allocation9 + $0x1a0] sm:$0xff]  }
 0x25e   :  { %v1361_v25 = vpop.f32.mrf.mxu1 }
 0x25f   :  { %vm2330_vm1 = vcmp.ge.f32.partialorder %v1424_v12, 0.0  ;;  %v2378_v28 = vmul.f32 0.01, %v1424_v12  ;;  %v1422_v15 = vadd.f32 %v1361_v25, %v535_v57  ;;  %v2423_v24 = vsel %vm2327_vm2, %v1421_v53, %v2375_v27 }
 0x260   :  { %v7933_v31 = vpop.f32.mrf.mxu1 }
 0x261   :  { %v2426_v32 = vsel %vm2330_vm1, %v1424_v12, %v2378_v28  ;;  %vm2328_vm3 = vcmp.ge.f32.partialorder %v1422_v15, 0.0  ;;  %v2376_v10 = vmul.f32 0.01, %v1422_v15  ;;  %v1427_v33 = vadd.f32 %v7933_v31, %v7805_v58  ;;  %v8812_v58 = vld [vmem:[#allocation9 + $0x1a8] sm:$0xff]  }
 0x262   :  { %v9326_v34 = vpack.c.bf16 %v2426_v32, %v2425_v29  ;;  %v1374_v7 = vpop.f32.mrf.mxu1  ;;  %v8814_v29 = vld [vmem:[#allocation9 + $0x198] sm:$0xff]  }
 0x263   :  { %v1425_v36 = vadd.f32 %v1374_v7, %v548_v60  ;;  %v2424_v37 = vsel %vm2328_vm3, %v1422_v15, %v2376_v10  ;;  %v2381_v30 = vmul.f32 0.01, %v1427_v33  ;;  %vm2333_vm4 = vcmp.ge.f32.partialorder %v1427_v33, 0.0 }
 0x264   :  { %v7934_v39 = vpop.f32.mrf.mxu1  ;;  %v9328_v26 = vpack.c.bf16 %v2424_v37, %v2423_v24 }
 0x265   :  { %v1428_v41 = vadd.f32 %v7934_v39, %v7806_v51  ;;  %v2379_v45 = vmul.f32 0.01, %v1425_v36  ;;  %vm2331_vm6 = vcmp.ge.f32.partialorder %v1425_v36, 0.0  ;;  %v2429_v47 = vsel %vm2333_vm4, %v1427_v33, %v2381_v30  ;;  %v8815_v30 = vld [vmem:[#allocation9 + $0x190] sm:$0xff]  }
 0x266   :  { %v1377_v43 = vpop.f32.mrf.mxu1  ;;  %8087 = vmatprep.mubr.bf16.mxu0 %v9328_v26 }
 0x267   :  { %vm2334_vm5 = vcmp.ge.f32.partialorder %v1428_v41, 0.0  ;;  %v2382_v46 = vmul.f32 0.01, %v1428_v41  ;;  %v1426_v48 = vadd.f32 %v1377_v43, %v551_v61  ;;  %8088 = vmatmul.mubr.bf16.vlgmr.msra.gmra.mxu0 %v9326_v34  ;;  %v2427_v61 = vsel %vm2331_vm6, %v1425_v36, %v2379_v45 }
 0x268   :  { %v7937_v52 = vpop.f32.mrf.mxu1  ;;  %8136 = vmatpush3.bf16.msra.mxu0 %v9275_v49 }
 0x269   :  { %vm2332_vm7 = vcmp.ge.f32.partialorder %v1426_v48, 0.0  ;;  %v2380_v54 = vmul.f32 0.01, %v1426_v48  ;;  %v1431_v56 = vadd.f32 %v7937_v52, %v9278_v63  ;;  %8137 = vmatprep.subr.bf16.mxu0 %v8811_v42  ;;  %v2430_v57 = vsel %vm2334_vm5, %v1428_v41, %v2382_v46 }
 0x26a   :  { %v1390_v60 = vpop.f32.mrf.mxu1  ;;  %v9334_v51 = vpack.c.bf16 %v2430_v57, %v2429_v47 }
 0x26b   :  { %v1429_v19 = vadd.f32 %v1390_v60, %v9280_v40  ;;  %v2428_v21 = vsel %vm2332_vm7, %v1426_v48, %v2380_v54  ;;  %v2385_v49 = vmul.f32 0.01, %v1431_v56  ;;  %vm2337_vm8 = vcmp.ge.f32.partialorder %v1431_v56, 0.0 }
 0x26c   :  { %v7938_v22 = vpop.f32.mrf.mxu1  ;;  %8138 = vmatpush3.bf16.msra.mxu0 %v8811_v42  ;;  %v9337_v53 = vpack.c.bf16 %v2428_v21, %v2427_v61 }
 0x26d   :  { %v1432_v20 = vadd.f32 %v7938_v22, %v9282_v0  ;;  %8139 = vmatprep.subr.bf16.mxu0 %v8812_v58  ;;  %v2383_v12 = vmul.f32 0.01, %v1429_v19  ;;  %vm2335_vm10 = vcmp.ge.f32.partialorder %v1429_v19, 0.0  ;;  %v2433_v0 = vsel %vm2337_vm8, %v1431_v56, %v2385_v49 }
 0x26e   :  { %v1393_v63 = vpop.f32.mrf.mxu1  ;;  %8091 = vmatprep.mubr.bf16.mxu0 %v9337_v53 }
 0x26f   :  { %vm2338_vm9 = vcmp.ge.f32.partialorder %v1432_v20, 0.0  ;;  %v2386_v25 = vmul.f32 0.01, %v1432_v20  ;;  %v1430_v40 = vadd.f32 %v1393_v63, %v9284_v62  ;;  %8092 = vmatmul.mubr.bf16.gmra.mxu0 %v9334_v51  ;;  %v2431_v7 = vsel %vm2335_vm10, %v1429_v19, %v2383_v12  ;;  %v8817_v19 = vld [vmem:[#allocation9 + $0x180] sm:$0xff]  }
 0x270   :  { %v7941_v27 = vpop.f32.mrf.mxu1  ;;  %8140 = vmatpush3.bf16.msra.mxu0 %v8812_v58 }
 0x271   :  { %vm2336_vm11 = vcmp.ge.f32.partialorder %v1430_v40, 0.0  ;;  %v2384_v28 = vmul.f32 0.01, %v1430_v40  ;;  %8141 = vmatprep.subr.bf16.mxu0 %v8813_v23  ;;  %v2434_v15 = vsel %vm2338_vm9, %v1432_v20, %v2386_v25  ;;  %v1435_v31 = vadd.f32 %v7941_v27, %v9286_v2  ;;  %v8819_v27 = vld [vmem:[#allocation9 + $0x1f0] sm:$0xff]  }
 0x272   :  { %v1406_v32 = vpop.f32.mrf.mxu1  ;;  %v9344_v10 = vpack.c.bf16 %v2434_v15, %v2433_v0 }
 0x273   :  { %v1433_v33 = vadd.f32 %v1406_v32, %v9288_v35  ;;  %v2432_v62 = vsel %vm2336_vm11, %v1430_v40, %v2384_v28  ;;  %v2389_v39 = vmul.f32 0.01, %v1435_v31  ;;  %vm2341_vm13 = vcmp.ge.f32.partialorder %v1435_v31, 0.0 }
 0x274   :  { %v7942_v36 = vpop.f32.mrf.mxu1  ;;  %8142 = vmatpush3.bf16.msra.mxu0 %v8813_v23  ;;  %v9347_v24 = vpack.c.bf16 %v2432_v62, %v2431_v7  ;;  %v8818_v23 = vld [vmem:[#allocation9 + $0x1f8] sm:$0xff]  }
 0x275   :  { %v1436_v37 = vadd.f32 %v7942_v36, %v9290_v3  ;;  %8143 = vmatprep.subr.bf16.mxu0 %v8814_v29  ;;  %v2387_v2 = vmul.f32 0.01, %v1433_v33  ;;  %vm2339_vm14 = vcmp.ge.f32.partialorder %v1433_v33, 0.0  ;;  %v8816_v3 = vld [vmem:[#allocation9 + $0x188] sm:$0xff]   ;;  %v2437_v56 = vsel %vm2341_vm13, %v1435_v31, %v2389_v39  ;;  %v8821_v36 = vld [vmem:[#allocation9 + $0x1e0] sm:$0xff]  }
 0x276   :  { %v1409_v41 = vpop.f32.mrf.mxu1  ;;  %8095 = vmatprep.mubr.bf16.mxu0 %v9347_v24  ;;  %v8820_v31 = vld [vmem:[#allocation9 + $0x1e8] sm:$0xff]  }
 0x277   :  { %vm2342_vm12 = vcmp.ge.f32.partialorder %v1436_v37, 0.0  ;;  %v2390_v42 = vmul.f32 0.01, %v1436_v37  ;;  %v1434_v43 = vadd.f32 %v1409_v41, %v9292_v4  ;;  %8096 = vmatmul.mubr.bf16.gmra.mxu0 %v9344_v10  ;;  %v2435_v47 = vsel %vm2339_vm14, %v1433_v33, %v2387_v2  ;;  %v8822_v41 = vld [vmem:[#allocation9 + $0x1d8] sm:$0xff]  }
 0x278   :  { %v7993_v35 = vpop.f32.mrf.mxu1  ;;  %8144 = vmatpush3.bf16.msra.mxu0 %v8814_v29 }
 0x279   :  { %vm2340_vm15 = vcmp.ge.f32.partialorder %v1434_v43, 0.0  ;;  %v2388_v45 = vmul.f32 0.01, %v1434_v43  ;;  %8145 = vmatprep.subr.bf16.mxu0 %v8815_v30  ;;  %v2438_v48 = vsel %vm2342_vm12, %v1436_v37, %v2390_v42  ;;  %v2409_v52 = vmul.f32 0.01, %v7993_v35 }
 0x27a   :  { %v9353_v46 = vpop.f32.mrf.mxu1  ;;  %vm2361_vm0 = vcmp.ge.f32.partialorder %v7993_v35, 0.0  ;;  %v9357_v58 = vpack.c.bf16 %v2438_v48, %v2437_v56 }
 0x27b   :  { %v2436_v54 = vsel %vm2340_vm15, %v1434_v43, %v2388_v45  ;;  %v9362_v21 = vsel %vm2361_vm0, %v7993_v35, %v2409_v52  ;;  %v8823_v45 = vld [vmem:[#allocation9 + $0x1d0] sm:$0xff]  }
 0x27c   :  { %v7994_v57 = vpop.f32.mrf.mxu1  ;;  %8146 = vmatpush3.bf16.msra.mxu0 %v8815_v30  ;;  %v9355_v4 = vpack.c.bf16 %v2436_v54, %v2435_v47  ;;  %v8824_v47 = vld [vmem:[#allocation9 + $0x1c8] sm:$0xff]  }
 0x27d   :  { %vm2362_vm1 = vcmp.ge.f32.partialorder %v7994_v57, 0.0  ;;  %v2410_v60 = vmul.f32 0.01, %v7994_v57  ;;  %8147 = vmatprep.subr.bf16.mxu0 %v8816_v3 }
 0x27e   :  { %v9359_v61 = vpop.f32.mrf.mxu1  ;;  %8099 = vmatprep.mubr.bf16.mxu0 %v9355_v4 }
 0x27f   :  { %v9364_v22 = vsel %vm2362_vm1, %v7994_v57, %v2410_v60  ;;  %8100 = vmatmul.mubr.bf16.gmra.mxu0 %v9357_v58 }
 0x280   :  { %v4228_v49 = vpack.c.bf16 %v9364_v22, %v9362_v21  ;;  %v7997_v20 = vpop.f32.mrf.mxu1  ;;  %8148 = vmatpush3.bf16.msra.mxu0 %v8816_v3  ;;  %8151 = vmatprep.mubr.bf16.mxu0 %v9328_v26 }
 0x281   :  { %8149 = vmatprep.subr.bf16.mxu0 %v8817_v19  ;;  %v2413_v12 = vmul.f32 0.01, %v7997_v20  ;;  %vm2365_vm2 = vcmp.ge.f32.partialorder %v7997_v20, 0.0 }
 0x282   :  { %v9370_v63 = vpop.f32.mrf.mxu1 }
 0x283   :  { %v9374_v0 = vsel %vm2365_vm2, %v7997_v20, %v2413_v12 }
 0x284   :  { %v7998_v25 = vpop.f32.mrf.mxu1  ;;  %8150 = vmatpush3.bf16.msra.mxu0 %v8817_v19 }
 0x285   :  { %vm2366_vm3 = vcmp.ge.f32.partialorder %v7998_v25, 0.0  ;;  %v2414_v40 = vmul.f32 0.01, %v7998_v25  ;;  %8199 = vmatprep.subr.bf16.mxu0 %v8818_v23 }
 0x286   :  { %v9372_v28 = vpop.f32.mrf.mxu1 }
 0x287   :  { %v9376_v15 = vsel %vm2366_vm3, %v7998_v25, %v2414_v40  ;;  %8152 = vmatmul.mubr.bf16.vlgmr.msra.gmra.mxu0 %v9326_v34 }
 0x288   :  { %v4230_v26 = vpack.c.bf16 %v9376_v15, %v9374_v0  ;;  %v8001_v29 = vpop.f32.mrf.mxu1  ;;  %8155 = vmatprep.mubr.bf16.mxu0 %v9337_v53  ;;  %8200 = vmatpush3.bf16.msra.mxu0 %v8818_v23 }
 0x289   :  { %8201 = vmatprep.subr.bf16.mxu0 %v8819_v27  ;;  %v2417_v33 = vmul.f32 0.01, %v8001_v29  ;;  %vm2369_vm4 = vcmp.ge.f32.partialorder %v8001_v29, 0.0 }
 0x28a   :  { %v9382_v32 = vpop.f32.mrf.mxu1 }
 0x28b   :  { %v9386_v37 = vsel %vm2369_vm4, %v8001_v29, %v2417_v33 }
 0x28c   :  { %v8002_v7 = vpop.f32.mrf.mxu1  ;;  %8202 = vmatpush3.bf16.msra.mxu0 %v8819_v27 }
 0x28d   :  { %vm2370_vm5 = vcmp.ge.f32.partialorder %v8002_v7, 0.0  ;;  %v2418_v62 = vmul.f32 0.01, %v8002_v7  ;;  %8203 = vmatprep.subr.bf16.mxu0 %v8820_v31 }
 0x28e   :  { %v9384_v34 = vpop.f32.mrf.mxu1 }
 0x28f   :  { %v9388_v30 = vsel %vm2370_vm5, %v8002_v7, %v2418_v62  ;;  %8156 = vmatmul.mubr.bf16.gmra.mxu0 %v9334_v51 }
 0x290   :  { %v4232_v53 = vpack.c.bf16 %v9388_v30, %v9386_v37  ;;  %v8005_v39 = vpop.f32.mrf.mxu1  ;;  %8159 = vmatprep.mubr.bf16.mxu0 %v9347_v24  ;;  %8204 = vmatpush3.bf16.msra.mxu0 %v8820_v31  ;;  %v7101_v30 = vld [vmem:[#allocation10 + $0x5] ss:$0 sm:$0xff] }
 0x291   :  { %8205 = vmatprep.subr.bf16.mxu0 %v8821_v36  ;;  %v2421_v42 = vmul.f32 0.01, %v8005_v39  ;;  %vm2373_vm6 = vcmp.ge.f32.partialorder %v8005_v39, 0.0 }
 0x292   :  { %v9394_v2 = vpop.f32.mrf.mxu1 }
 0x293   :  { %v9398_v3 = vsel %vm2373_vm6, %v8005_v39, %v2421_v42  ;;  %v2419_v21 = vmul.f32 0.01, %v9394_v2 }
 0x294   :  { %v8006_v43 = vpop.f32.mrf.mxu1  ;;  %8206 = vmatpush3.bf16.msra.mxu0 %v8821_v36 }
 0x295   :  { %vm2374_vm7 = vcmp.ge.f32.partialorder %v8006_v43, 0.0  ;;  %v2422_v35 = vmul.f32 0.01, %v8006_v43  ;;  %8207 = vmatprep.subr.bf16.mxu0 %v8822_v41 }
 0x296   :  { %v9396_v51 = vpop.f32.mrf.mxu1 }
 0x297   :  { %v9400_v48 = vsel %vm2374_vm7, %v8006_v43, %v2422_v35  ;;  %8160 = vmatmul.mubr.bf16.gmra.mxu0 %v9344_v10  ;;  %v8825_v10 = vld [vmem:[#allocation9 + $0x1c0] sm:$0xff]  }
 0x298   :  { %v4234_v24 = vpack.c.bf16 %v9400_v48, %v9398_v3  ;;  %v8057_v52 = vpop.f32.mrf.mxu1  ;;  %8163 = vmatprep.mubr.bf16.mxu0 %v9355_v4  ;;  %8208 = vmatpush3.bf16.msra.mxu0 %v8822_v41  ;;  %v8827_v41 = vld [vmem:[#allocation9 + $0x230] sm:$0xff]  }
 0x299   :  { %8209 = vmatprep.subr.bf16.mxu0 %v8823_v45  ;;  %v2249_v57 = vadd.f32 %v8057_v52, %v9294_v5 }
 0x29a   :  { %v2184_v54 = vpop.f32.mrf.mxu1 }
 0x29b   :  { %v2247_v56 = vadd.f32 %v2184_v54, %v9296_v44  ;;  %v2393_v25 = vmul.f32 0.01, %v2249_v57  ;;  %vm2345_vm10 = vcmp.ge.f32.partialorder %v2249_v57, 0.0  ;;  %v8826_v44 = vld [vmem:[#allocation9 + $0x238] sm:$0xff]  }
 0x29c   :  { %v8058_v60 = vpop.f32.mrf.mxu1  ;;  %8210 = vmatpush3.bf16.msra.mxu0 %v8823_v45 }
 0x29d   :  { %v2250_v19 = vadd.f32 %v8058_v60, %v9298_v6  ;;  %8211 = vmatprep.subr.bf16.mxu0 %v8824_v47  ;;  %v2391_v23 = vmul.f32 0.01, %v2247_v56  ;;  %vm2343_vm9 = vcmp.ge.f32.partialorder %v2247_v56, 0.0  ;;  %v2441_v7 = vsel %vm2345_vm10, %v2249_v57, %v2393_v25 }
 0x29e   :  { %v2187_v20 = vpop.f32.mrf.mxu1  ;;  %vm2364_vm10 = vcmp.ge.f32.partialorder %v9372_v28, 0.0 }
 0x29f   :  { %vm2346_vm8 = vcmp.ge.f32.partialorder %v2250_v19, 0.0  ;;  %v2394_v12 = vmul.f32 0.01, %v2250_v19  ;;  %v2248_v4 = vadd.f32 %v2187_v20, %v9300_v8  ;;  %8164 = vmatmul.mubr.bf16.gmra.mxu0 %v9357_v58  ;;  %v2439_v31 = vsel %vm2343_vm9, %v2247_v56, %v2391_v23 }
 0x2a0   :  { %v8061_v40 = vpop.f32.mrf.mxu1  ;;  %8212 = vmatpush3.bf16.msra.mxu0 %v8824_v47  ;;  %vm2359_vm9 = vcmp.ge.f32.partialorder %v9353_v46, 0.0 }
 0x2a1   :  { %vm2344_vm11 = vcmp.ge.f32.partialorder %v2248_v4, 0.0  ;;  %v2392_v5 = vmul.f32 0.01, %v2248_v4  ;;  %8213 = vmatprep.subr.bf16.mxu0 %v8825_v10  ;;  %v2442_v6 = vsel %vm2346_vm8, %v2250_v19, %v2394_v12  ;;  %v2253_v8 = vadd.f32 %v8061_v40, %v9302_v1 }
 0x2a2   :  { %v2200_v27 = vpop.f32.mrf.mxu1  ;;  %v9415_v36 = vpack.c.bf16 %v2442_v6, %v2441_v7  ;;  %vm2360_vm8 = vcmp.ge.f32.partialorder %v9359_v61, 0.0 }
 0x2a3   :  { %v2251_v29 = vadd.f32 %v2200_v27, %v9304_v9  ;;  %v2440_v33 = vsel %vm2344_vm11, %v2248_v4, %v2392_v5  ;;  %v2397_v1 = vmul.f32 0.01, %v2253_v8  ;;  %vm2349_vm14 = vcmp.ge.f32.partialorder %v2253_v8, 0.0  ;;  %v8829_v4 = vld [vmem:[#allocation9 + $0x220] sm:$0xff]  }
 0x2a4   :  { %v8062_v62 = vpop.f32.mrf.mxu1  ;;  %8214 = vmatpush3.bf16.msra.mxu0 %v8825_v10  ;;  %v9413_v58 = vpack.c.bf16 %v2440_v33, %v2439_v31  ;;  %vm2363_vm11 = vcmp.ge.f32.partialorder %v9370_v63, 0.0 }
 0x2a5   :  { %v2254_v39 = vadd.f32 %v8062_v62, %v9306_v11  ;;  %8263 = vmatprep.subr.bf16.mxu0 %v8826_v44  ;;  %v2395_v43 = vmul.f32 0.01, %v2251_v29  ;;  %vm2347_vm13 = vcmp.ge.f32.partialorder %v2251_v29, 0.0  ;;  %v8828_v11 = vld [vmem:[#allocation9 + $0x228] sm:$0xff]   ;;  %v2445_v19 = vsel %vm2349_vm14, %v2253_v8, %v2397_v1 }
 0x2a6   :  { %v2203_v42 = vpop.f32.mrf.mxu1  ;;  %8215 = vmatprep.mubr.bf16.mxu0 %v9413_v58  ;;  %vm2372_vm14 = vcmp.ge.f32.partialorder %v9396_v51, 0.0 }
 0x2a7   :  { %vm2350_vm12 = vcmp.ge.f32.partialorder %v2254_v39, 0.0  ;;  %v2398_v9 = vmul.f32 0.01, %v2254_v39  ;;  %v2252_v35 = vadd.f32 %v2203_v42, %v9308_v38  ;;  %8216 = vmatmul.mubr.bf16.vlgmr.msra.gmra.mxu0 %v9415_v36  ;;  %v2443_v57 = vsel %vm2347_vm13, %v2251_v29, %v2395_v43  ;;  %v8831_v43 = vld [vmem:[#allocation9 + $0x210] sm:$0xff]  }
 0x2a8   :  { %v8065_v45 = vpop.f32.mrf.mxu1  ;;  %8264 = vmatpush3.bf16.msra.mxu0 %v8826_v44  ;;  %vm2367_vm13 = vcmp.ge.f32.partialorder %v9382_v32, 0.0 }
 0x2a9   :  { %vm2348_vm15 = vcmp.ge.f32.partialorder %v2252_v35, 0.0  ;;  %v2396_v52 = vmul.f32 0.01, %v2252_v35  ;;  %8265 = vmatprep.subr.bf16.mxu0 %v8827_v41  ;;  %v2446_v47 = vsel %vm2350_vm12, %v2254_v39, %v2398_v9  ;;  %v2257_v38 = vadd.f32 %v8065_v45, %v9310_v55 }
 0x2aa   :  { %v2216_v54 = vpop.f32.mrf.mxu1  ;;  %v9425_v23 = vpack.c.bf16 %v2446_v47, %v2445_v19  ;;  %v8835_v19 = vld [vmem:[#allocation9 + $0x270] sm:$0xff]   ;;  %vm2368_vm12 = vcmp.ge.f32.partialorder %v9384_v34, 0.0 }
 0x2ab   :  { %v2255_v56 = vadd.f32 %v2216_v54, %v9312_v13  ;;  %v2444_v60 = vsel %vm2348_vm15, %v2252_v35, %v2396_v52  ;;  %v2401_v55 = vmul.f32 0.01, %v2257_v38  ;;  %vm2353_vm2 = vcmp.ge.f32.partialorder %v2257_v38, 0.0  ;;  %v8832_v52 = vld [vmem:[#allocation9 + $0x208] sm:$0xff]  }
 0x2ac   :  { %v8066_v10 = vpop.f32.mrf.mxu1  ;;  %8266 = vmatpush3.bf16.msra.mxu0 %v8827_v41  ;;  %v9423_v20 = vpack.c.bf16 %v2444_v60, %v2443_v57  ;;  %v8833_v60 = vld [vmem:[#allocation9 + $0x200] sm:$0xff]   ;;  %vm2371_vm15 = vcmp.ge.f32.partialorder %v9394_v2, 0.0 }
 0x2ad   :  { %v2258_v12 = vadd.f32 %v8066_v10, %v9314_v14  ;;  %8267 = vmatprep.subr.bf16.mxu0 %v8828_v11  ;;  %v2399_v40 = vmul.f32 0.01, %v2255_v56  ;;  %vm2351_vm1 = vcmp.ge.f32.partialorder %v2255_v56, 0.0  ;;  %v8830_v14 = vld [vmem:[#allocation9 + $0x218] sm:$0xff]   ;;  %v2449_v8 = vsel %vm2353_vm2, %v2257_v38, %v2401_v55  ;;  %v8836_v38 = vld [vmem:[#allocation9 + $0x268] sm:$0xff]   ;;  %v8837_v10 = vld [vmem:[#allocation9 + $0x260] sm:$0xff]  }
 0x2ae   :  { %v2219_v25 = vpop.f32.mrf.mxu1  ;;  %8219 = vmatprep.mubr.bf16.mxu0 %v9423_v20  ;;  %v2411_v55 = vmul.f32 0.01, %v9370_v63 }
 0x2af   :  { %vm2354_vm0 = vcmp.ge.f32.partialorder %v2258_v12, 0.0  ;;  %v2402_v13 = vmul.f32 0.01, %v2258_v12  ;;  %v2256_v5 = vadd.f32 %v2219_v25, %v9316_v16  ;;  %8220 = vmatmul.mubr.bf16.gmra.mxu0 %v9425_v23  ;;  %v2447_v33 = vsel %vm2351_vm1, %v2255_v56, %v2399_v40  ;;  %v8841_v40 = vld [vmem:[#allocation9 + $0x240] sm:$0xff]  }
 0x2b0   :  { %v8069_v44 = vpop.f32.mrf.mxu1  ;;  %8268 = vmatpush3.bf16.msra.mxu0 %v8828_v11 }
 0x2b1   :  { %vm2352_vm3 = vcmp.ge.f32.partialorder %v2256_v5, 0.0  ;;  %v2400_v6 = vmul.f32 0.01, %v2256_v5  ;;  %8269 = vmatprep.subr.bf16.mxu0 %v8829_v4  ;;  %v2450_v27 = vsel %vm2354_vm0, %v2258_v12, %v2402_v13  ;;  %v2261_v16 = vadd.f32 %v8069_v44, %v9318_v50  ;;  %v8839_v12 = vld [vmem:[#allocation9 + $0x250] sm:$0xff]  }
 0x2b2   :  { %v2232_v29 = vpop.f32.mrf.mxu1  ;;  %v3410_v41 = vpack.c.bf16 %v2450_v27, %v2449_v8  ;;  %v2415_v27 = vmul.f32 0.01, %v9382_v32 }
 0x2b3   :  { %v2259_v31 = vadd.f32 %v2232_v29, %v9320_v17  ;;  %v2448_v7 = vsel %vm2352_vm3, %v2256_v5, %v2400_v6  ;;  %v2405_v45 = vmul.f32 0.01, %v2261_v16  ;;  %vm2357_vm6 = vcmp.ge.f32.partialorder %v2261_v16, 0.0 }
 0x2b4   :  { %v8070_v62 = vpop.f32.mrf.mxu1  ;;  %8270 = vmatpush3.bf16.msra.mxu0 %v8829_v4  ;;  %v3409_v39 = vpack.c.bf16 %v2448_v7, %v2447_v33  ;;  %v2408_v4 = vmul.f32 0.01, %v9359_v61  ;;  %v2412_v5 = vmul.f32 0.01, %v9372_v28  ;;  %v2416_v6 = vmul.f32 0.01, %v9384_v34 }
 0x2b5   :  { %v2262_v42 = vadd.f32 %v8070_v62, %v9322_v59  ;;  %8271 = vmatprep.subr.bf16.mxu0 %v8830_v14  ;;  %v2403_v35 = vmul.f32 0.01, %v2259_v31  ;;  %vm2355_vm5 = vcmp.ge.f32.partialorder %v2259_v31, 0.0  ;;  %v2453_v54 = vsel %vm2357_vm6, %v2261_v16, %v2405_v45 }
 0x2b6   :  { %v2235_v9 = vpop.f32.mrf.mxu1  ;;  %8223 = vmatprep.mubr.bf16.mxu0 %v3409_v39 }
 0x2b7   :  { %vm2358_vm4 = vcmp.ge.f32.partialorder %v2262_v42, 0.0  ;;  %v2406_v1 = vmul.f32 0.01, %v2262_v42  ;;  %v2260_v17 = vadd.f32 %v2235_v9, %v9324_v18  ;;  %8224 = vmatmul.mubr.bf16.gmra.mxu0 %v3410_v41  ;;  %v2451_v59 = vsel %vm2355_vm5, %v2259_v31, %v2403_v35  ;;  %v8834_v18 = vld [vmem:[#allocation9 + $0x278] sm:$0xff]  }
 0x2b8   :  { %8272 = vmatpush3.bf16.msra.mxu0 %v8830_v14  ;;  %v8842_v14 = vld [vmem:[#allocation7] sm:$0xff]   ;;  %v2420_v31 = vmul.f32 0.01, %v9396_v51 }
 0x2b9   :  { %vm2356_vm7 = vcmp.ge.f32.partialorder %v2260_v17, 0.0  ;;  %v2404_v50 = vmul.f32 0.01, %v2260_v17  ;;  %8273 = vmatprep.subr.bf16.mxu0 %v8831_v43  ;;  %v2454_v11 = vsel %vm2358_vm4, %v2262_v42, %v2406_v1  ;;  %8119 = vmatprep.mubr.bf16.mxu1 %v8842_v14 }
 0x2ba   :  { %v3412_v57 = vpack.c.bf16 %v2454_v11, %v2453_v54  ;;  %v2468_v22 = vsel %vm2372_vm14, %v9396_v51, %v2420_v31  ;;  %v8843_v31 = vld [vmem:[#allocation7 + $0x8] sm:$0xff]  }
 0x2bb   :  { %v2452_v47 = vsel %vm2356_vm7, %v2260_v17, %v2404_v50 }
 0x2bc   :  { %8274 = vmatpush3.bf16.msra.mxu0 %v8831_v43  ;;  %v3411_v56 = vpack.c.bf16 %v2452_v47, %v2451_v59 }
 0x2bd   :  { %8275 = vmatprep.subr.bf16.mxu0 %v8832_v52 }
 0x2be   :  { %8227 = vmatprep.mubr.bf16.mxu0 %v3411_v56 }
 0x2bf   :  { %8228 = vmatmul.mubr.bf16.gmra.mxu0 %v3412_v57 }
 0x2c0   :  { %8276 = vmatpush3.bf16.msra.mxu0 %v8832_v52  ;;  %8279 = vmatprep.mubr.bf16.mxu0 %v9413_v58  ;;  %v8838_v58 = vld [vmem:[#allocation9 + $0x258] sm:$0xff]  }
 0x2c1   :  { %8277 = vmatprep.subr.bf16.mxu0 %v8833_v60 }
 0x2c4   :  { %8278 = vmatpush3.bf16.msra.mxu0 %v8833_v60 }
 0x2c5   :  { %8327 = vmatprep.subr.bf16.mxu0 %v8834_v18 }
 0x2c7   :  { %8280 = vmatmul.mubr.bf16.vlgmr.msra.gmra.mxu0 %v9415_v36  ;;  %v2407_v36 = vmul.f32 0.01, %v9353_v46 }
 0x2c8   :  { %8283 = vmatprep.mubr.bf16.mxu0 %v9423_v20  ;;  %8328 = vmatpush3.bf16.msra.mxu0 %v8834_v18  ;;  %v8840_v20 = vld [vmem:[#allocation9 + $0x248] sm:$0xff]  }
 0x2c9   :  { %8329 = vmatprep.subr.bf16.mxu0 %v8835_v19  ;;  %v2455_v25 = vsel %vm2359_vm9, %v9353_v46, %v2407_v36  ;;  %v2459_v46 = vsel %vm2363_vm11, %v9370_v63, %v2411_v55  ;;  %v2463_v63 = vsel %vm2367_vm13, %v9382_v32, %v2415_v27  ;;  %v9489_v27 = vld [vmem:[#allocation10 + $0x6] ss:$0 sm:$0xff] }
 0x2cc   :  { %8330 = vmatpush3.bf16.msra.mxu0 %v8835_v19 }
 0x2cd   :  { %8331 = vmatprep.subr.bf16.mxu0 %v8836_v38 }
 0x2cf   :  { %8284 = vmatmul.mubr.bf16.gmra.mxu0 %v9425_v23  ;;  %v2456_v23 = vsel %vm2360_vm8, %v9359_v61, %v2408_v4  ;;  %v2460_v61 = vsel %vm2364_vm10, %v9372_v28, %v2412_v5  ;;  %v2464_v28 = vsel %vm2368_vm12, %v9384_v34, %v2416_v6 }
 0x2d0   :  { %8287 = vmatprep.mubr.bf16.mxu0 %v3409_v39  ;;  %8332 = vmatpush3.bf16.msra.mxu0 %v8836_v38  ;;  %v4227_v13 = vpack.c.bf16 %v2456_v23, %v2455_v25  ;;  %v4229_v44 = vpack.c.bf16 %v2460_v61, %v2459_v46  ;;  %v4231_v29 = vpack.c.bf16 %v2464_v28, %v2463_v63 }
 0x2d1   :  { %8333 = vmatprep.subr.bf16.mxu0 %v8837_v10 }
 0x2d4   :  { %8334 = vmatpush3.bf16.msra.mxu0 %v8837_v10 }
 0x2d5   :  { %8335 = vmatprep.subr.bf16.mxu0 %v8838_v58 }
 0x2d7   :  { %8288 = vmatmul.mubr.bf16.gmra.mxu0 %v3410_v41 }
 0x2d8   :  { %8291 = vmatprep.mubr.bf16.mxu0 %v3411_v56  ;;  %8336 = vmatpush3.bf16.msra.mxu0 %v8838_v58 }
 0x2d9   :  { %8337 = vmatprep.subr.bf16.mxu0 %v8839_v12 }
 0x2dc   :  { %8338 = vmatpush3.bf16.msra.mxu0 %v8839_v12 }
 0x2dd   :  { %8339 = vmatprep.subr.bf16.mxu0 %v8840_v20 }
 0x2df   :  { %8292 = vmatmul.mubr.bf16.gmra.mxu0 %v3412_v57 }
 0x2e0   :  { %8340 = vmatpush3.bf16.msra.mxu0 %v8840_v20  ;;  %8343 = vmatprep.mubr.bf16.mxu0 %v4227_v13 }
 0x2e1   :  { %8341 = vmatprep.subr.bf16.mxu0 %v8841_v40 }
 0x2e4   :  { %8342 = vmatpush3.bf16.msra.mxu0 %v8841_v40 }
 0x2e7   :  { %8344 = vmatmul.mubr.bf16.vlgmr.msra.gmra.mxu0 %v4228_v49  ;;  %v2467_v49 = vsel %vm2371_vm15, %v9394_v2, %v2419_v21 }
 0x2e8   :  { %8347 = vmatprep.mubr.bf16.mxu0 %v4229_v44  ;;  %v4233_v34 = vpack.c.bf16 %v2468_v22, %v2467_v49  ;;  %v8844_v22 = vld [vmem:[#allocation7 + $0x10] sm:$0xff]  }
 0x2ef   :  { %8348 = vmatmul.mubr.bf16.gmra.mxu0 %v4230_v26 }
 0x2f0   :  { %8351 = vmatprep.mubr.bf16.mxu0 %v4231_v29 }
 0x2f7   :  { %8352 = vmatmul.mubr.bf16.gmra.mxu0 %v4232_v53 }
 0x2f8   :  { %8355 = vmatprep.mubr.bf16.mxu0 %v4233_v34 }
 0x2ff   :  { %8356 = vmatmul.mubr.bf16.gmra.mxu0 %v4234_v24 }
 0x327   :  { %v8089_v0 = vpop.f32.mrf.mxu0 }
 0x328   :  { %v2707_v40 = vadd.f32 %v8089_v0, %v7101_v30 }
 0x329   :  { %v2698_v15 = vpop.f32.mrf.mxu0 }
 0x32a   :  { %v2699_v46 = vadd.f32 %v7101_v30, %v2698_v15 }
 0x32b   :  { %v8090_v26 = vpop.f32.mrf.mxu0 }
 0x32c   :  { %v2710_v20 = vadd.f32 %v8090_v26, %v7101_v30 }
 0x32d   :  { %v2701_v32 = vpop.f32.mrf.mxu0 }
 0x32e   :  { %v2794_v5 = vpack.c.bf16 %v2710_v20, %v2707_v40  ;;  %v2702_v55 = vadd.f32 %v7101_v30, %v2701_v32 }
 0x32f   :  { %v8093_v33 = vpop.f32.mrf.mxu0 }
 0x330   :  { %v2723_v19 = vadd.f32 %v8093_v33, %v7101_v30  ;;  %v2793_v6 = vpack.c.bf16 %v2702_v55, %v2699_v46 }
 0x331   :  { %v2714_v7 = vpop.f32.mrf.mxu0 }
 0x332   :  { %v2715_v4 = vadd.f32 %v7101_v30, %v2714_v7 }
 0x333   :  { %v8094_v8 = vpop.f32.mrf.mxu0 }
 0x334   :  { %v2726_v57 = vadd.f32 %v8094_v8, %v7101_v30 }
 0x335   :  { %v2717_v51 = vpop.f32.mrf.mxu0 }
 0x336   :  { %v2796_v10 = vpack.c.bf16 %v2726_v57, %v2723_v19  ;;  %v2718_v58 = vadd.f32 %v7101_v30, %v2717_v51 }
 0x337   :  { %v8097_v16 = vpop.f32.mrf.mxu0 }
 0x338   :  { %v2739_v50 = vadd.f32 %v8097_v16, %v7101_v30  ;;  %v2795_v23 = vpack.c.bf16 %v2718_v58, %v2715_v4  ;;  %v8850_v58 = vld [vmem:[#allocation7 + $0x40] sm:$0xff]  }
 0x339   :  { %v2730_v2 = vpop.f32.mrf.mxu0 }
 0x33a   :  { %v2731_v54 = vadd.f32 %v7101_v30, %v2730_v2  ;;  %v8845_v2 = vld [vmem:[#allocation7 + $0x18] sm:$0xff]  }
 0x33b   :  { %v8098_v62 = vpop.f32.mrf.mxu0 }
 0x33c   :  { %v2742_v1 = vadd.f32 %v8098_v62, %v7101_v30 }
 0x33d   :  { %v2733_v39 = vpop.f32.mrf.mxu0 }
 0x33e   :  { %v2798_v11 = vpack.c.bf16 %v2742_v1, %v2739_v50  ;;  %v2734_v59 = vadd.f32 %v7101_v30, %v2733_v39  ;;  %v8846_v39 = vld [vmem:[#allocation7 + $0x20] sm:$0xff]  }
 0x33f   :  { %v8101_v41 = vpop.f32.mrf.mxu0 }
 0x340   :  { %v2755_v42 = vadd.f32 %v8101_v41, %v7101_v30  ;;  %v2797_v60 = vpack.c.bf16 %v2734_v59, %v2731_v54 }
 0x341   :  { %v2746_v37 = vpop.f32.mrf.mxu0 }
 0x342   :  { %v2747_v48 = vadd.f32 %v7101_v30, %v2746_v37 }
 0x343   :  { %v8102_v53 = vpop.f32.mrf.mxu0 }
 0x344   :  { %v2758_v43 = vadd.f32 %v8102_v53, %v7101_v30 }
 0x345   :  { %v2749_v3 = vpop.f32.mrf.mxu0 }
 0x346   :  { %v2800_v24 = vpack.c.bf16 %v2758_v43, %v2755_v42  ;;  %v2750_v9 = vadd.f32 %v7101_v30, %v2749_v3 }
 0x347   :  { %v9475_v35 = vpop.f32.mrf.mxu0 }
 0x348   :  { %v2799_v17 = vpack.c.bf16 %v2750_v9, %v2747_v48  ;;  %8103 = vmatprep.subr.bf16.mxu1 %v2800_v24  ;;  %v8847_v9 = vld [vmem:[#allocation7 + $0x28] sm:$0xff]   ;;  %v3118_v57 = vadd.f32 %v9475_v35, %v9489_v27  ;;  %v9530_v35 = vld [vmem:[#allocation10 + $0x7] ss:$0 sm:$0xff] }
 0x349   :  { %8104 = vmatpush3.bf16.msra.mxu1 %v2800_v24  ;;  %v9477_v45 = vpop.f32.mrf.mxu0 }
 0x34a   :  { %8105 = vmatprep.subr.bf16.mxu1 %v2799_v17 }
 0x34b   :  { %v9479_v52 = vpop.f32.mrf.mxu0 }
 0x34c   :  { %v3121_v59 = vadd.f32 %v9479_v52, %v9489_v27  ;;  %v3110_v52 = vadd.f32 %v9489_v27, %v9477_v45 }
 0x34d   :  { %8106 = vmatpush3.bf16.msra.mxu1 %v2799_v17  ;;  %v9481_v47 = vpop.f32.mrf.mxu0  ;;  %v8848_v17 = vld [vmem:[#allocation7 + $0x30] sm:$0xff]  }
 0x34e   :  { %8107 = vmatprep.subr.bf16.mxu1 %v2798_v11  ;;  %v3205_v19 = vpack.c.bf16 %v3121_v59, %v3118_v57 }
 0x34f   :  { %v9483_v56 = vpop.f32.mrf.mxu0 }
 0x350   :  { %v3134_v43 = vadd.f32 %v9483_v56, %v9489_v27 }
 0x351   :  { %8108 = vmatpush3.bf16.msra.mxu1 %v2798_v11  ;;  %v9485_v18 = vpop.f32.mrf.mxu0 }
 0x352   :  { %8109 = vmatprep.subr.bf16.mxu1 %v2797_v60  ;;  %v3126_v50 = vadd.f32 %v9489_v27, %v9485_v18  ;;  %v8849_v18 = vld [vmem:[#allocation7 + $0x38] sm:$0xff]  }
 0x353   :  { %v8158_v38 = vpop.f32.mrf.mxu0 }
 0x354   :  { %v3137_v30 = vadd.f32 %v8158_v38, %v9489_v27  ;;  %v3113_v38 = vadd.f32 %v9489_v27, %v9481_v47 }
 0x355   :  { %8110 = vmatpush3.bf16.msra.mxu1 %v2797_v60  ;;  %v9487_v12 = vpop.f32.mrf.mxu0 }
 0x356   :  { %8111 = vmatprep.subr.bf16.mxu1 %v2796_v10  ;;  %v3207_v48 = vpack.c.bf16 %v3137_v30, %v3134_v43  ;;  %v3129_v24 = vadd.f32 %v9489_v27, %v9487_v12  ;;  %v3204_v4 = vpack.c.bf16 %v3113_v38, %v3110_v52  ;;  %v8860_v38 = vld [vmem:[#allocation7 + $0x90] sm:$0xff]  }
 0x357   :  { %v8161_v36 = vpop.f32.mrf.mxu0 }
 0x358   :  { %v3150_v7 = vadd.f32 %v8161_v36, %v9489_v27  ;;  %v3206_v54 = vpack.c.bf16 %v3129_v24, %v3126_v50  ;;  %v8858_v50 = vld [vmem:[#allocation7 + $0x80] sm:$0xff]  }
 0x359   :  { %8112 = vmatpush3.bf16.msra.mxu1 %v2796_v10  ;;  %v3141_v25 = vpop.f32.mrf.mxu0 }
 0x35a   :  { %8113 = vmatprep.subr.bf16.mxu1 %v2795_v23  ;;  %v3142_v41 = vadd.f32 %v9489_v27, %v3141_v25  ;;  %v8851_v25 = vld [vmem:[#allocation7 + $0x48] sm:$0xff]  }
 0x35b   :  { %v8162_v13 = vpop.f32.mrf.mxu0 }
 0x35c   :  { %v3153_v26 = vadd.f32 %v8162_v13, %v9489_v27  ;;  %v8852_v13 = vld [vmem:[#allocation7 + $0x50] sm:$0xff]  }
 0x35d   :  { %8114 = vmatpush3.bf16.msra.mxu1 %v2795_v23  ;;  %v3144_v61 = vpop.f32.mrf.mxu0 }
 0x35e   :  { %8115 = vmatprep.subr.bf16.mxu1 %v2794_v5  ;;  %v3209_v51 = vpack.c.bf16 %v3153_v26, %v3150_v7  ;;  %v3145_v16 = vadd.f32 %v9489_v27, %v3144_v61 }
 0x35f   :  { %v8165_v44 = vpop.f32.mrf.mxu0 }
 0x360   :  { %v3166_v63 = vadd.f32 %v8165_v44, %v9489_v27  ;;  %v3208_v53 = vpack.c.bf16 %v3145_v16, %v3142_v41  ;;  %v8856_v41 = vld [vmem:[#allocation7 + $0x70] sm:$0xff]  }
 0x361   :  { %8116 = vmatpush3.bf16.msra.mxu1 %v2794_v5  ;;  %v3157_v14 = vpop.f32.mrf.mxu0 }
 0x362   :  { %8117 = vmatprep.subr.bf16.mxu1 %v2793_v6  ;;  %v3158_v49 = vadd.f32 %v9489_v27, %v3157_v14 }
 0x363   :  { %v8166_v28 = vpop.f32.mrf.mxu0 }
 0x364   :  { %v3169_v29 = vadd.f32 %v8166_v28, %v9489_v27 }
 0x365   :  { %8118 = vmatpush3.bf16.msra.mxu1 %v2793_v6  ;;  %v3160_v21 = vpop.f32.mrf.mxu0 }
 0x366   :  { %v3211_v34 = vpack.c.bf16 %v3169_v29, %v3166_v63  ;;  %v3161_v0 = vadd.f32 %v9489_v27, %v3160_v21  ;;  %v8853_v29 = vld [vmem:[#allocation7 + $0x58] sm:$0xff]   ;;  %v8854_v21 = vld [vmem:[#allocation7 + $0x60] sm:$0xff]  }
 0x367   :  { %v9495_v15 = vpop.f32.mrf.mxu0 }
 0x368   :  { %v3210_v32 = vpack.c.bf16 %v3161_v0, %v3158_v49  ;;  %8120 = vmatmul.mubr.bf16.vlgmr.msra.gmra.mxu1 %v8843_v31  ;;  %8167 = vmatprep.subr.bf16.mxu1 %v3211_v34 }
 0x369   :  { %8168 = vmatpush3.bf16.msra.mxu1 %v3211_v34  ;;  %v9498_v33 = vpop.f32.mrf.mxu0  ;;  %8123 = vmatprep.mubr.bf16.mxu1 %v8844_v22 }
 0x36a   :  { %8169 = vmatprep.subr.bf16.mxu1 %v3210_v32 }
 0x36b   :  { %v9501_v8 = vpop.f32.mrf.mxu0 }
 0x36d   :  { %8170 = vmatpush3.bf16.msra.mxu1 %v3210_v32  ;;  %v9504_v62 = vpop.f32.mrf.mxu0 }
 0x36e   :  { %8171 = vmatprep.subr.bf16.mxu1 %v3209_v51 }
 0x36f   :  { %v9507_v37 = vpop.f32.mrf.mxu0 }
 0x370   :  { %8124 = vmatmul.mubr.bf16.gmra.mxu1 %v8845_v2  ;;  %v3545_v32 = vadd.f32 %v9507_v37, %v9530_v35  ;;  %v8855_v2 = vld [vmem:[#allocation7 + $0x68] sm:$0xff]   ;;  %v3532_v37 = vadd.f32 %v9501_v8, %v9530_v35  ;;  %v3521_v8 = vadd.f32 %v9530_v35, %v9498_v33 }
 0x371   :  { %8172 = vmatpush3.bf16.msra.mxu1 %v3209_v51  ;;  %v9510_v42 = vpop.f32.mrf.mxu0  ;;  %8127 = vmatprep.mubr.bf16.mxu1 %v8846_v39 }
 0x372   :  { %8173 = vmatprep.subr.bf16.mxu1 %v3208_v53  ;;  %v3537_v30 = vadd.f32 %v9530_v35, %v9510_v42  ;;  %v8857_v42 = vld [vmem:[#allocation7 + $0x78] sm:$0xff]  }
 0x373   :  { %v9514_v3 = vpop.f32.mrf.mxu0 }
 0x374   :  { %v3548_v34 = vadd.f32 %v9514_v3, %v9530_v35 }
 0x375   :  { %8174 = vmatpush3.bf16.msra.mxu1 %v3208_v53  ;;  %v9518_v1 = vpop.f32.mrf.mxu0 }
 0x376   :  { %8175 = vmatprep.subr.bf16.mxu1 %v3207_v48  ;;  %v3618_v51 = vpack.c.bf16 %v3548_v34, %v3545_v32  ;;  %v3540_v16 = vadd.f32 %v9530_v35, %v9518_v1  ;;  %v3524_v1 = vadd.f32 %v9530_v35, %v9504_v62 }
 0x377   :  { %v8225_v11 = vpop.f32.mrf.mxu0 }
 0x378   :  { %8128 = vmatmul.mubr.bf16.gmra.mxu1 %v8847_v9  ;;  %v3561_v14 = vadd.f32 %v8225_v11, %v9530_v35  ;;  %v3617_v43 = vpack.c.bf16 %v3540_v16, %v3537_v30  ;;  %v3615_v59 = vpack.c.bf16 %v3524_v1, %v3521_v8  ;;  %v8866_v30 = vld [vmem:[#allocation7 + $0xc0] sm:$0xff]   ;;  %v8868_v1 = vld [vmem:[#allocation7 + $0xd0] sm:$0xff]  }
 0x379   :  { %8176 = vmatpush3.bf16.msra.mxu1 %v3207_v48  ;;  %v3552_v56 = vpop.f32.mrf.mxu0  ;;  %8131 = vmatprep.mubr.bf16.mxu1 %v8848_v17  ;;  %v3529_v48 = vadd.f32 %v9495_v15, %v9530_v35  ;;  %v9572_v15 = vld [vmem:[#allocation10 + $0x8] ss:$0 sm:$0xff] }
 0x37a   :  { %8177 = vmatprep.subr.bf16.mxu1 %v3206_v54  ;;  %v3553_v22 = vadd.f32 %v9530_v35, %v3552_v56 }
 0x37b   :  { %v8226_v60 = vpop.f32.mrf.mxu0  ;;  %v3616_v9 = vpack.c.bf16 %v3532_v37, %v3529_v48 }
 0x37c   :  { %v3564_v46 = vadd.f32 %v8226_v60, %v9530_v35  ;;  %v8859_v60 = vld [vmem:[#allocation7 + $0x88] sm:$0xff]  }
 0x37d   :  { %8178 = vmatpush3.bf16.msra.mxu1 %v3206_v54  ;;  %v3555_v10 = vpop.f32.mrf.mxu0 }
 0x37e   :  { %8179 = vmatprep.subr.bf16.mxu1 %v3205_v19  ;;  %v3620_v28 = vpack.c.bf16 %v3564_v46, %v3561_v14  ;;  %v3556_v63 = vadd.f32 %v9530_v35, %v3555_v10 }
 0x37f   :  { %v8229_v12 = vpop.f32.mrf.mxu0 }
 0x380   :  { %8132 = vmatmul.mubr.bf16.gmra.mxu1 %v8849_v18  ;;  %v3577_v47 = vadd.f32 %v8229_v12, %v9530_v35  ;;  %v3619_v0 = vpack.c.bf16 %v3556_v63, %v3553_v22  ;;  %v8864_v22 = vld [vmem:[#allocation7 + $0xb0] sm:$0xff]  }
 0x381   :  { %8180 = vmatpush3.bf16.msra.mxu1 %v3205_v19  ;;  %v3568_v36 = vpop.f32.mrf.mxu0  ;;  %8183 = vmatprep.mubr.bf16.mxu1 %v8850_v58 }
 0x382   :  { %8181 = vmatprep.subr.bf16.mxu1 %v3204_v4  ;;  %v3569_v45 = vadd.f32 %v9530_v35, %v3568_v36 }
 0x383   :  { %v8230_v20 = vpop.f32.mrf.mxu0 }
 0x384   :  { %v3580_v23 = vadd.f32 %v8230_v20, %v9530_v35 }
 0x385   :  { %8182 = vmatpush3.bf16.msra.mxu1 %v3204_v4  ;;  %v3571_v40 = vpop.f32.mrf.mxu0 }
 0x386   :  { %v3622_v5 = vpack.c.bf16 %v3580_v23, %v3577_v47  ;;  %v3572_v55 = vadd.f32 %v9530_v35, %v3571_v40  ;;  %v8861_v23 = vld [vmem:[#allocation7 + $0x98] sm:$0xff]   ;;  %v8862_v40 = vld [vmem:[#allocation7 + $0xa0] sm:$0xff]  }
 0x387   :  { %v9536_v61 = vpop.f32.mrf.mxu0 }
 0x388   :  { %v3621_v44 = vpack.c.bf16 %v3572_v55, %v3569_v45  ;;  %8184 = vmatmul.mubr.bf16.vlgmr.msra.gmra.mxu1 %v8851_v25  ;;  %8231 = vmatprep.subr.bf16.mxu1 %v3622_v5 }
 0x389   :  { %8232 = vmatpush3.bf16.msra.mxu1 %v3622_v5  ;;  %v9539_v6 = vpop.f32.mrf.mxu0  ;;  %8187 = vmatprep.mubr.bf16.mxu1 %v8852_v13 }
 0x38a   :  { %8233 = vmatprep.subr.bf16.mxu1 %v3621_v44 }
 0x38b   :  { %v9542_v27 = vpop.f32.mrf.mxu0 }
 0x38c   :  { %v3943_v32 = vadd.f32 %v9542_v27, %v9572_v15  ;;  %v3932_v27 = vadd.f32 %v9572_v15, %v9539_v6 }
 0x38d   :  { %8234 = vmatpush3.bf16.msra.mxu1 %v3621_v44  ;;  %v9545_v31 = vpop.f32.mrf.mxu0 }
 0x38e   :  { %8235 = vmatprep.subr.bf16.mxu1 %v3620_v28 }
 0x38f   :  { %v9548_v49 = vpop.f32.mrf.mxu0 }
 0x390   :  { %8188 = vmatmul.mubr.bf16.gmra.mxu1 %v8853_v29  ;;  %v3956_v44 = vadd.f32 %v9548_v49, %v9572_v15  ;;  %v8863_v29 = vld [vmem:[#allocation7 + $0xa8] sm:$0xff]  }
 0x391   :  { %8236 = vmatpush3.bf16.msra.mxu1 %v3620_v28  ;;  %v9552_v26 = vpop.f32.mrf.mxu0  ;;  %8191 = vmatprep.mubr.bf16.mxu1 %v8854_v21 }
 0x392   :  { %8237 = vmatprep.subr.bf16.mxu1 %v3619_v0  ;;  %v3948_v34 = vadd.f32 %v9572_v15, %v9552_v26  ;;  %v8865_v26 = vld [vmem:[#allocation7 + $0xb8] sm:$0xff]  }
 0x393   :  { %v9556_v7 = vpop.f32.mrf.mxu0 }
 0x394   :  { %v3959_v5 = vadd.f32 %v9556_v7, %v9572_v15 }
 0x395   :  { %8238 = vmatpush3.bf16.msra.mxu1 %v3619_v0  ;;  %v9560_v39 = vpop.f32.mrf.mxu0 }
 0x396   :  { %8239 = vmatprep.subr.bf16.mxu1 %v3618_v51  ;;  %v4029_v28 = vpack.c.bf16 %v3959_v5, %v3956_v44  ;;  %v3951_v63 = vadd.f32 %v9572_v15, %v9560_v39  ;;  %v3935_v39 = vadd.f32 %v9572_v15, %v9545_v31  ;;  %v8867_v31 = vld [vmem:[#allocation7 + $0xc8] sm:$0xff]   ;;  %v8874_v5 = vld [vmem:[#allocation7 + $0x100] sm:$0xff]  }
 0x397   :  { %v8289_v53 = vpop.f32.mrf.mxu0  ;;  %v8875_v44 = vld [vmem:[#allocation7 + $0x108] sm:$0xff]  }
 0x398   :  { %8192 = vmatmul.mubr.bf16.gmra.mxu1 %v8855_v2  ;;  %v3972_v36 = vadd.f32 %v8289_v53, %v9572_v15  ;;  %v4028_v49 = vpack.c.bf16 %v3951_v63, %v3948_v34  ;;  %v4026_v37 = vpack.c.bf16 %v3935_v39, %v3932_v27  ;;  %v8878_v63 = vld [vmem:[#allocation7 + $0x120] sm:$0xff]   ;;  %v8880_v34 = vld [vmem:[#allocation7 + $0x130] sm:$0xff]  }
 0x399   :  { %8240 = vmatpush3.bf16.msra.mxu1 %v3618_v51  ;;  %v3963_v3 = vpop.f32.mrf.mxu0  ;;  %8195 = vmatprep.mubr.bf16.mxu1 %v8856_v41  ;;  %v3940_v51 = vadd.f32 %v9536_v61, %v9572_v15  ;;  %v7169_v61 = vld [vmem:[#allocation10 + $0x9] ss:$0 sm:$0xff] }
 0x39a   :  { %8241 = vmatprep.subr.bf16.mxu1 %v3617_v43  ;;  %v3964_v13 = vadd.f32 %v9572_v15, %v3963_v3 }
 0x39b   :  { %v8290_v24 = vpop.f32.mrf.mxu0  ;;  %v4027_v2 = vpack.c.bf16 %v3943_v32, %v3940_v51  ;;  %v8881_v32 = vld [vmem:[#allocation7 + $0x138] sm:$0xff]  }
 0x39c   :  { %v3975_v52 = vadd.f32 %v8290_v24, %v9572_v15 }
 0x39d   :  { %8242 = vmatpush3.bf16.msra.mxu1 %v3617_v43  ;;  %v3966_v17 = vpop.f32.mrf.mxu0 }
 0x39e   :  { %8243 = vmatprep.subr.bf16.mxu1 %v3616_v9  ;;  %v4031_v20 = vpack.c.bf16 %v3975_v52, %v3972_v36  ;;  %v3967_v47 = vadd.f32 %v9572_v15, %v3966_v17 }
 0x39f   :  { %v8293_v11 = vpop.f32.mrf.mxu0 }
 0x3a0   :  { %8196 = vmatmul.mubr.bf16.gmra.mxu1 %v8857_v42  ;;  %v3988_v62 = vadd.f32 %v8293_v11, %v9572_v15  ;;  %v4030_v55 = vpack.c.bf16 %v3967_v47, %v3964_v13 }
 0x3a1   :  { %8244 = vmatpush3.bf16.msra.mxu1 %v3616_v9  ;;  %v3979_v54 = vpop.f32.mrf.mxu0  ;;  %8247 = vmatprep.mubr.bf16.mxu1 %v8858_v50 }
 0x3a2   :  { %8245 = vmatprep.subr.bf16.mxu1 %v3615_v59  ;;  %v3980_v33 = vadd.f32 %v9572_v15, %v3979_v54 }
 0x3a3   :  { %v8294_v56 = vpop.f32.mrf.mxu0 }
 0x3a4   :  { %v3991_v57 = vadd.f32 %v8294_v56, %v9572_v15  ;;  %v8870_v56 = vld [vmem:[#allocation7 + $0xe0] sm:$0xff]  }
 0x3a5   :  { %8246 = vmatpush3.bf16.msra.mxu1 %v3615_v59  ;;  %v3982_v19 = vpop.f32.mrf.mxu0 }
 0x3a6   :  { %v4033_v18 = vpack.c.bf16 %v3991_v57, %v3988_v62  ;;  %v3983_v10 = vadd.f32 %v9572_v15, %v3982_v19  ;;  %v8869_v15 = vld [vmem:[#allocation7 + $0xd8] sm:$0xff]  }
 0x3a7   :  { %v9578_v58 = vpop.f32.mrf.mxu0 }
 0x3a8   :  { %v4032_v12 = vpack.c.bf16 %v3983_v10, %v3980_v33  ;;  %8248 = vmatmul.mubr.bf16.vlgmr.msra.gmra.mxu1 %v8859_v60  ;;  %8295 = vmatprep.subr.bf16.mxu1 %v4033_v18  ;;  %v8872_v10 = vld [vmem:[#allocation7 + $0xf0] sm:$0xff]   ;;  %v4351_v47 = vadd.f32 %v9578_v58, %v7169_v61  ;;  %v8885_v58 = vld [vmem:[#allocation9 + $0x2a0] sm:$0xff]  }
 0x3a9   :  { %8296 = vmatpush3.bf16.msra.mxu1 %v4033_v18  ;;  %v9581_v4 = vpop.f32.mrf.mxu0  ;;  %8251 = vmatprep.mubr.bf16.mxu1 %v8860_v38  ;;  %v8871_v18 = vld [vmem:[#allocation7 + $0xe8] sm:$0xff]  }
 0x3aa   :  { %8297 = vmatprep.subr.bf16.mxu1 %v4032_v12 }
 0x3ab   :  { %v9584_v35 = vpop.f32.mrf.mxu0 }
 0x3ac   :  { %v4354_v36 = vadd.f32 %v9584_v35, %v7169_v61  ;;  %v8884_v35 = vld [vmem:[#allocation9 + $0x2a8] sm:$0xff]  }
 0x3ad   :  { %8298 = vmatpush3.bf16.msra.mxu1 %v4032_v12  ;;  %v9587_v25 = vpop.f32.mrf.mxu0  ;;  %v8882_v12 = vld [vmem:[#allocation9 + $0x2b8] sm:$0xff]  }
 0x3ae   :  { %8299 = vmatprep.subr.bf16.mxu1 %v4031_v20  ;;  %8391 = vmatprep.subr.bf16.mxu0 %v8882_v12  ;;  %v4346_v13 = vadd.f32 %v7169_v61, %v9587_v25  ;;  %v8876_v25 = vld [vmem:[#allocation7 + $0x110] sm:$0xff]  }
 0x3af   :  { %v9590_v45 = vpop.f32.mrf.mxu0  ;;  %8392 = vmatpush3.bf16.msra.mxu0 %v8882_v12 }
 0x3b0   :  { %8252 = vmatmul.mubr.bf16.gmra.mxu1 %v8861_v23  ;;  %v4367_v19 = vadd.f32 %v9590_v45, %v7169_v61  ;;  %v8883_v23 = vld [vmem:[#allocation9 + $0x2b0] sm:$0xff]   ;;  %v8873_v45 = vld [vmem:[#allocation7 + $0xf8] sm:$0xff]  }
 0x3b1   :  { %8300 = vmatpush3.bf16.msra.mxu1 %v4031_v20  ;;  %v9594_v46 = vpop.f32.mrf.mxu0  ;;  %8255 = vmatprep.mubr.bf16.mxu1 %v8862_v40  ;;  %v4438_v40 = vpack.c.bf16 %v4354_v36, %v4351_v47 }
 0x3b2   :  { %8301 = vmatprep.subr.bf16.mxu1 %v4030_v55  ;;  %v4359_v52 = vadd.f32 %v7169_v61, %v9594_v46  ;;  %8393 = vmatprep.subr.bf16.mxu0 %v8883_v23 }
 0x3b3   :  { %v8350_v14 = vpop.f32.mrf.mxu0  ;;  %8394 = vmatpush3.bf16.msra.mxu0 %v8883_v23 }
 0x3b4   :  { %v4370_v57 = vadd.f32 %v8350_v14, %v7169_v61  ;;  %8395 = vmatprep.subr.bf16.mxu0 %v8884_v35  ;;  %v8886_v14 = vld [vmem:[#allocation9 + $0x298] sm:$0xff]  }
 0x3b5   :  { %8302 = vmatpush3.bf16.msra.mxu1 %v4030_v55  ;;  %v9600_v21 = vpop.f32.mrf.mxu0  ;;  %v4343_v55 = vadd.f32 %v7169_v61, %v9581_v4  ;;  %v8887_v4 = vld [vmem:[#allocation9 + $0x290] sm:$0xff]  }
 0x3b6   :  { %8303 = vmatprep.subr.bf16.mxu1 %v4029_v28  ;;  %v4440_v38 = vpack.c.bf16 %v4370_v57, %v4367_v19  ;;  %v4362_v33 = vadd.f32 %v7169_v61, %v9600_v21  ;;  %v8889_v21 = vld [vmem:[#allocation9 + $0x280] sm:$0xff]  }
 0x3b7   :  { %v8353_v0 = vpop.f32.mrf.mxu0  ;;  %v4437_v46 = vpack.c.bf16 %v4346_v13, %v4343_v55  ;;  %8396 = vmatpush3.bf16.msra.mxu0 %v8884_v35 }
 0x3b8   :  { %8256 = vmatmul.mubr.bf16.gmra.mxu1 %v8863_v29  ;;  %v4383_v11 = vadd.f32 %v8353_v0, %v7169_v61  ;;  %v4439_v20 = vpack.c.bf16 %v4362_v33, %v4359_v52  ;;  %8397 = vmatprep.subr.bf16.mxu0 %v8885_v58  ;;  %v8888_v29 = vld [vmem:[#allocation9 + $0x288] sm:$0xff]   ;;  %v9619_v0 = vld [vmem:[#allocation9 + $0x2f8] sm:$0xff]  }
 0x3b9   :  { %8304 = vmatpush3.bf16.msra.mxu1 %v4029_v28  ;;  %v4374_v7 = vpop.f32.mrf.mxu0  ;;  %8259 = vmatprep.mubr.bf16.mxu1 %v8864_v22  ;;  %v8877_v28 = vld [vmem:[#allocation7 + $0x118] sm:$0xff]   ;;  %v8879_v22 = vld [vmem:[#allocation7 + $0x128] sm:$0xff]  }
 0x3ba   :  { %8305 = vmatprep.subr.bf16.mxu1 %v4028_v49  ;;  %v4375_v62 = vadd.f32 %v7169_v61, %v4374_v7 }
 0x3bb   :  { %v8354_v16 = vpop.f32.mrf.mxu0  ;;  %8398 = vmatpush3.bf16.msra.mxu0 %v8885_v58 }
 0x3bc   :  { %v4386_v6 = vadd.f32 %v8354_v16, %v7169_v61  ;;  %8399 = vmatprep.subr.bf16.mxu0 %v8886_v14 }
 0x3bd   :  { %8306 = vmatpush3.bf16.msra.mxu1 %v4028_v49  ;;  %v4377_v41 = vpop.f32.mrf.mxu0 }
 0x3be   :  { %8307 = vmatprep.subr.bf16.mxu1 %v4027_v2  ;;  %v4442_v59 = vpack.c.bf16 %v4386_v6, %v4383_v11  ;;  %v4378_v54 = vadd.f32 %v7169_v61, %v4377_v41 }
 0x3bf   :  { %v8357_v53 = vpop.f32.mrf.mxu0  ;;  %8400 = vmatpush3.bf16.msra.mxu0 %v8886_v14 }
 0x3c0   :  { %8260 = vmatmul.mubr.bf16.gmra.mxu1 %v8865_v26  ;;  %v4399_v48 = vadd.f32 %v8357_v53, %v7169_v61  ;;  %v4441_v60 = vpack.c.bf16 %v4378_v54, %v4375_v62  ;;  %8401 = vmatprep.subr.bf16.mxu0 %v8887_v4 }
 0x3c1   :  { %8308 = vmatpush3.bf16.msra.mxu1 %v4027_v2  ;;  %v4390_v43 = vpop.f32.mrf.mxu0  ;;  %8311 = vmatprep.mubr.bf16.mxu1 %v8866_v30 }
 0x3c2   :  { %8309 = vmatprep.subr.bf16.mxu1 %v4026_v37  ;;  %v4391_v42 = vadd.f32 %v7169_v61, %v4390_v43 }
 0x3c3   :  { %v8358_v3 = vpop.f32.mrf.mxu0  ;;  %8402 = vmatpush3.bf16.msra.mxu0 %v8887_v4 }
 0x3c4   :  { %v4402_v24 = vadd.f32 %v8358_v3, %v7169_v61  ;;  %8403 = vmatprep.subr.bf16.mxu0 %v8888_v29 }
 0x3c5   :  { %8310 = vmatpush3.bf16.msra.mxu1 %v4026_v37  ;;  %v4393_v9 = vpop.f32.mrf.mxu0 }
 0x3c6   :  { %v4444_v17 = vpack.c.bf16 %v4402_v24, %v4399_v48  ;;  %v4394_v50 = vadd.f32 %v7169_v61, %v4393_v9 }
 0x3c7   :  { %8404 = vmatpush3.bf16.msra.mxu0 %v8888_v29 }
 0x3c8   :  { %v4443_v8 = vpack.c.bf16 %v4394_v50, %v4391_v42  ;;  %8312 = vmatmul.mubr.bf16.vlgmr.msra.gmra.mxu1 %v8867_v31  ;;  %8359 = vmatprep.subr.bf16.mxu1 %v4444_v17 }
 0x3c9   :  { %8360 = vmatpush3.bf16.msra.mxu1 %v4444_v17  ;;  %8315 = vmatprep.mubr.bf16.mxu1 %v8868_v1 }
 0x3ca   :  { %8361 = vmatprep.subr.bf16.mxu1 %v4443_v8  ;;  %8405 = vmatprep.subr.bf16.mxu0 %v8889_v21 }
 0x3cb   :  { %8406 = vmatpush3.bf16.msra.mxu0 %v8889_v21 }
 0x3cc   :  { %8455 = vmatprep.subr.bf16.mxu0 %v9619_v0 }
 0x3cd   :  { %8362 = vmatpush3.bf16.msra.mxu1 %v4443_v8 }
 0x3ce   :  { %8363 = vmatprep.subr.bf16.mxu1 %v4442_v59 }
 0x3d0   :  { %8316 = vmatmul.mubr.bf16.gmra.mxu1 %v8869_v15 }
 0x3d1   :  { %8364 = vmatpush3.bf16.msra.mxu1 %v4442_v59  ;;  %8319 = vmatprep.mubr.bf16.mxu1 %v8870_v56 }
 0x3d2   :  { %8365 = vmatprep.subr.bf16.mxu1 %v4441_v60 }
 0x3d5   :  { %8366 = vmatpush3.bf16.msra.mxu1 %v4441_v60 }
 0x3d6   :  { %8367 = vmatprep.subr.bf16.mxu1 %v4440_v38 }
 0x3d8   :  { %8320 = vmatmul.mubr.bf16.gmra.mxu1 %v8871_v18 }
 0x3d9   :  { %8368 = vmatpush3.bf16.msra.mxu1 %v4440_v38  ;;  %8323 = vmatprep.mubr.bf16.mxu1 %v8872_v10 }
 0x3da   :  { %8369 = vmatprep.subr.bf16.mxu1 %v4439_v20 }
 0x3dd   :  { %8370 = vmatpush3.bf16.msra.mxu1 %v4439_v20 }
 0x3de   :  { %8371 = vmatprep.subr.bf16.mxu1 %v4438_v40 }
 0x3e0   :  { %8324 = vmatmul.mubr.bf16.gmra.mxu1 %v8873_v45 }
 0x3e1   :  { %8372 = vmatpush3.bf16.msra.mxu1 %v4438_v40  ;;  %8375 = vmatprep.mubr.bf16.mxu1 %v8874_v5 }
 0x3e2   :  { %8373 = vmatprep.subr.bf16.mxu1 %v4437_v46 }
 0x3e5   :  { %8374 = vmatpush3.bf16.msra.mxu1 %v4437_v46 }
 0x3e8   :  { %8376 = vmatmul.mubr.bf16.vlgmr.msra.gmra.mxu1 %v8875_v44 }
 0x3e9   :  { %8379 = vmatprep.mubr.bf16.mxu1 %v8876_v25 }
 0x3f0   :  { %8380 = vmatmul.mubr.bf16.gmra.mxu1 %v8877_v28 }
 0x3f1   :  { %8383 = vmatprep.mubr.bf16.mxu1 %v8878_v63  ;;  %v8891_v63 = vld [vmem:[#allocation9 + $0x2f0] sm:$0xff]  }
 0x3f8   :  { %8384 = vmatmul.mubr.bf16.gmra.mxu1 %v8879_v22 }
 0x3f9   :  { %8387 = vmatprep.mubr.bf16.mxu1 %v8880_v34 }
 0x400   :  { %8388 = vmatmul.mubr.bf16.gmra.mxu1 %v8881_v32 }
 0x428   :  { %v8121_v49 = vpop.f32.mrf.mxu1 }
 0x42a   :  { %v2883_v7 = vpop.f32.mrf.mxu1 }
 0x42c   :  { %v8122_v51 = vpop.f32.mrf.mxu1 }
 0x42e   :  { %v2886_v16 = vpop.f32.mrf.mxu1 }
 0x430   :  { %v8125_v2 = vpop.f32.mrf.mxu1 }
 0x432   :  { %v2899_v39 = vpop.f32.mrf.mxu1 }
 0x434   :  { %v8126_v26 = vpop.f32.mrf.mxu1 }
 0x436   :  { %v2902_v41 = vpop.f32.mrf.mxu1 }
 0x438   :  { %v9622_v30 = vpop.f32.mrf.mxu1 }
 0x43a   :  { %v9624_v27 = vpop.f32.mrf.mxu1 }
 0x43c   :  { %v9626_v53 = vpop.f32.mrf.mxu1 }
 0x43e   :  { %v9628_v37 = vpop.f32.mrf.mxu1 }
 0x440   :  { %v9630_v43 = vpop.f32.mrf.mxu1 }
 0x442   :  { %v9632_v61 = vpop.f32.mrf.mxu1 }
 0x444   :  { %v9634_v3 = vpop.f32.mrf.mxu1 }
 0x446   :  { %v9636_v48 = vpop.f32.mrf.mxu1 }
 0x448   :  { %v9638_v24 = vpop.f32.mrf.mxu1 }
 0x44a   :  { %v9640_v31 = vpop.f32.mrf.mxu1 }
 0x44c   :  { %v9642_v9 = vpop.f32.mrf.mxu1 }
 0x44e   :  { %v9644_v1 = vpop.f32.mrf.mxu1 }
 0x450   :  { %v9646_v42 = vpop.f32.mrf.mxu1 }
 0x452   :  { %v9648_v17 = vpop.f32.mrf.mxu1 }
 0x454   :  { %v9650_v50 = vpop.f32.mrf.mxu1 }
 0x456   :  { %v9652_v6 = vpop.f32.mrf.mxu1 }
 0x458   :  { %v9654_v8 = vpop.f32.mrf.mxu1 }
 0x45a   :  { %v9656_v11 = vpop.f32.mrf.mxu1 }
 0x45c   :  { %v9658_v59 = vpop.f32.mrf.mxu1 }
 0x45e   :  { %v9660_v54 = vpop.f32.mrf.mxu1 }
 0x460   :  { %v9662_v15 = vpop.f32.mrf.mxu1 }
 0x462   :  { %v9664_v56 = vpop.f32.mrf.mxu1 }
 0x464   :  { %v9666_v62 = vpop.f32.mrf.mxu1 }
 0x466   :  { %v9668_v57 = vpop.f32.mrf.mxu1 }
 0x468   :  { %v8249_v60 = vpop.f32.mrf.mxu1 }
 0x469   :  { %v3770_v19 = vadd.f32 %v8249_v60, %v8121_v49 }
 0x46a   :  { %v3705_v38 = vpop.f32.mrf.mxu1 }
 0x46b   :  { %v3768_v33 = vadd.f32 %v3705_v38, %v2883_v7  ;;  %v4720_v18 = vmul.f32 0.01, %v3770_v19  ;;  %vm4672_vm0 = vcmp.ge.f32.partialorder %v3770_v19, 0.0 }
 0x46c   :  { %v8250_v10 = vpop.f32.mrf.mxu1 }
 0x46d   :  { %v3771_v52 = vadd.f32 %v8250_v10, %v8122_v51  ;;  %v4718_v36 = vmul.f32 0.01, %v3768_v33  ;;  %v4768_v23 = vsel %vm4672_vm0, %v3770_v19, %v4720_v18  ;;  %vm4670_vm2 = vcmp.ge.f32.partialorder %v3768_v33, 0.0  ;;  %v8893_v10 = vld [vmem:[#allocation9 + $0x2e0] sm:$0xff]  }
 0x46e   :  { %v3708_v12 = vpop.f32.mrf.mxu1 }
 0x46f   :  { %vm4673_vm1 = vcmp.ge.f32.partialorder %v3771_v52, 0.0  ;;  %v4721_v20 = vmul.f32 0.01, %v3771_v52  ;;  %v3769_v47 = vadd.f32 %v3708_v12, %v2886_v16  ;;  %v4766_v58 = vsel %vm4670_vm2, %v3768_v33, %v4718_v36 }
 0x470   :  { %v8253_v40 = vpop.f32.mrf.mxu1 }
 0x471   :  { %v4769_v13 = vsel %vm4673_vm1, %v3771_v52, %v4721_v20  ;;  %vm4671_vm3 = vcmp.ge.f32.partialorder %v3769_v47, 0.0  ;;  %v4719_v45 = vmul.f32 0.01, %v3769_v47  ;;  %v3774_v5 = vadd.f32 %v8253_v40, %v8125_v2  ;;  %v8892_v2 = vld [vmem:[#allocation9 + $0x2e8] sm:$0xff]   ;;  %v8894_v40 = vld [vmem:[#allocation9 + $0x2d8] sm:$0xff]  }
 0x472   :  { %v9670_v55 = vpack.c.bf16 %v4769_v13, %v4768_v23  ;;  %v3721_v35 = vpop.f32.mrf.mxu1 }
 0x473   :  { %v3772_v46 = vadd.f32 %v3721_v35, %v2899_v39  ;;  %v4767_v44 = vsel %vm4671_vm3, %v3769_v47, %v4719_v45  ;;  %v4724_v25 = vmul.f32 0.01, %v3774_v5  ;;  %vm4676_vm4 = vcmp.ge.f32.partialorder %v3774_v5, 0.0 }
 0x474   :  { %v8254_v14 = vpop.f32.mrf.mxu1  ;;  %v9672_v4 = vpack.c.bf16 %v4767_v44, %v4766_v58 }
 0x475   :  { %v3775_v28 = vadd.f32 %v8254_v14, %v8126_v26  ;;  %v4722_v21 = vmul.f32 0.01, %v3772_v46  ;;  %v4772_v32 = vsel %vm4676_vm4, %v3774_v5, %v4724_v25  ;;  %vm4674_vm6 = vcmp.ge.f32.partialorder %v3772_v46, 0.0  ;;  %v8895_v14 = vld [vmem:[#allocation9 + $0x2d0] sm:$0xff]  }
 0x476   :  { %v3724_v29 = vpop.f32.mrf.mxu1  ;;  %8407 = vmatprep.mubr.bf16.mxu0 %v9672_v4 }
 0x477   :  { %vm4677_vm5 = vcmp.ge.f32.partialorder %v3775_v28, 0.0  ;;  %v4725_v22 = vmul.f32 0.01, %v3775_v28  ;;  %v3773_v34 = vadd.f32 %v3724_v29, %v2902_v41  ;;  %8408 = vmatmul.mubr.bf16.vlgmr.msra.gmra.mxu0 %v9670_v55  ;;  %v4770_v41 = vsel %vm4674_vm6, %v3772_v46, %v4722_v21 }
 0x478   :  { %v8257_v49 = vpop.f32.mrf.mxu1  ;;  %8456 = vmatpush3.bf16.msra.mxu0 %v9619_v0 }
 0x479   :  { %v4773_v7 = vsel %vm4677_vm5, %v3775_v28, %v4725_v22  ;;  %vm4675_vm7 = vcmp.ge.f32.partialorder %v3773_v34, 0.0  ;;  %v4723_v51 = vmul.f32 0.01, %v3773_v34  ;;  %v3778_v16 = vadd.f32 %v8257_v49, %v9622_v30  ;;  %8457 = vmatprep.subr.bf16.mxu0 %v8891_v63 }
 0x47a   :  { %v9678_v39 = vpack.c.bf16 %v4773_v7, %v4772_v32  ;;  %v3737_v26 = vpop.f32.mrf.mxu1 }
 0x47b   :  { %v3776_v60 = vadd.f32 %v3737_v26, %v9624_v27  ;;  %v4771_v19 = vsel %vm4675_vm7, %v3773_v34, %v4723_v51  ;;  %v4728_v38 = vmul.f32 0.01, %v3778_v16  ;;  %vm4680_vm8 = vcmp.ge.f32.partialorder %v3778_v16, 0.0  ;;  %v8896_v34 = vld [vmem:[#allocation9 + $0x2c8] sm:$0xff]  }
 0x47c   :  { %v8258_v33 = vpop.f32.mrf.mxu1  ;;  %8458 = vmatpush3.bf16.msra.mxu0 %v8891_v63  ;;  %v9681_v18 = vpack.c.bf16 %v4771_v19, %v4770_v41  ;;  %v8897_v41 = vld [vmem:[#allocation9 + $0x2c0] sm:$0xff]  }
 0x47d   :  { %v3779_v0 = vadd.f32 %v8258_v33, %v9626_v53  ;;  %8459 = vmatprep.subr.bf16.mxu0 %v8892_v2  ;;  %v4726_v52 = vmul.f32 0.01, %v3776_v60  ;;  %v4776_v36 = vsel %vm4680_vm8, %v3778_v16, %v4728_v38  ;;  %vm4678_vm10 = vcmp.ge.f32.partialorder %v3776_v60, 0.0 }
 0x47e   :  { %v3740_v30 = vpop.f32.mrf.mxu1  ;;  %8411 = vmatprep.mubr.bf16.mxu0 %v9681_v18 }
 0x47f   :  { %vm4681_vm9 = vcmp.ge.f32.partialorder %v3779_v0, 0.0  ;;  %v4729_v12 = vmul.f32 0.01, %v3779_v0  ;;  %v3777_v27 = vadd.f32 %v3740_v30, %v9628_v37  ;;  %8412 = vmatmul.mubr.bf16.gmra.mxu0 %v9678_v39  ;;  %v4774_v35 = vsel %vm4678_vm10, %v3776_v60, %v4726_v52 }
 0x480   :  { %v8261_v20 = vpop.f32.mrf.mxu1  ;;  %8460 = vmatpush3.bf16.msra.mxu0 %v8892_v2 }
 0x481   :  { %v4777_v47 = vsel %vm4681_vm9, %v3779_v0, %v4729_v12  ;;  %vm4679_vm11 = vcmp.ge.f32.partialorder %v3777_v27, 0.0  ;;  %v4727_v23 = vmul.f32 0.01, %v3777_v27  ;;  %v3782_v53 = vadd.f32 %v8261_v20, %v9630_v43  ;;  %8461 = vmatprep.subr.bf16.mxu0 %v8893_v10 }
 0x482   :  { %v9688_v13 = vpack.c.bf16 %v4777_v47, %v4776_v36  ;;  %v3753_v45 = vpop.f32.mrf.mxu1 }
 0x483   :  { %v3780_v5 = vadd.f32 %v3753_v45, %v9632_v61  ;;  %v4775_v37 = vsel %vm4679_vm11, %v3777_v27, %v4727_v23  ;;  %v4732_v44 = vmul.f32 0.01, %v3782_v53  ;;  %vm4684_vm12 = vcmp.ge.f32.partialorder %v3782_v53, 0.0  ;;  %v8898_v27 = vld [vmem:[#allocation9 + $0x338] sm:$0xff]   ;;  %v8899_v45 = vld [vmem:[#allocation9 + $0x330] sm:$0xff]  }
 0x484   :  { %v8262_v46 = vpop.f32.mrf.mxu1  ;;  %8462 = vmatpush3.bf16.msra.mxu0 %v8893_v10  ;;  %v9691_v58 = vpack.c.bf16 %v4775_v37, %v4774_v35 }
 0x485   :  { %v3783_v25 = vadd.f32 %v8262_v46, %v9634_v3  ;;  %8463 = vmatprep.subr.bf16.mxu0 %v8894_v40  ;;  %v4730_v28 = vmul.f32 0.01, %v3780_v5  ;;  %vm4682_vm14 = vcmp.ge.f32.partialorder %v3780_v5, 0.0  ;;  %v4780_v21 = vsel %vm4684_vm12, %v3782_v53, %v4732_v44 }
 0x486   :  { %v3756_v43 = vpop.f32.mrf.mxu1  ;;  %8415 = vmatprep.mubr.bf16.mxu0 %v9691_v58 }
 0x487   :  { %vm4685_vm13 = vcmp.ge.f32.partialorder %v3783_v25, 0.0  ;;  %v4733_v63 = vmul.f32 0.01, %v3783_v25  ;;  %v3781_v61 = vadd.f32 %v3756_v43, %v9636_v48  ;;  %8416 = vmatmul.mubr.bf16.gmra.mxu0 %v9688_v13  ;;  %v4778_v51 = vsel %vm4682_vm14, %v3780_v5, %v4730_v28  ;;  %v8900_v43 = vld [vmem:[#allocation9 + $0x328] sm:$0xff]  }
 0x488   :  { %v8313_v29 = vpop.f32.mrf.mxu1  ;;  %8464 = vmatpush3.bf16.msra.mxu0 %v8894_v40 }
 0x489   :  { %v4781_v22 = vsel %vm4685_vm13, %v3783_v25, %v4733_v63  ;;  %vm4683_vm15 = vcmp.ge.f32.partialorder %v3781_v61, 0.0  ;;  %v4731_v3 = vmul.f32 0.01, %v3781_v61  ;;  %8465 = vmatprep.subr.bf16.mxu0 %v8895_v14  ;;  %v4752_v7 = vmul.f32 0.01, %v8313_v29 }
 0x48a   :  { %v9697_v32 = vpack.c.bf16 %v4781_v22, %v4780_v21  ;;  %v4116_v49 = vpop.f32.mrf.mxu1  ;;  %vm4704_vm0 = vcmp.ge.f32.partialorder %v8313_v29, 0.0 }
 0x48b   :  { %v4779_v16 = vsel %vm4683_vm15, %v3781_v61, %v4731_v3  ;;  %v4750_v26 = vmul.f32 0.01, %v4116_v49  ;;  %vm4702_vm2 = vcmp.ge.f32.partialorder %v4116_v49, 0.0  ;;  %v9702_v38 = vsel %vm4704_vm0, %v8313_v29, %v4752_v7 }
 0x48c   :  { %v8314_v2 = vpop.f32.mrf.mxu1  ;;  %8466 = vmatpush3.bf16.msra.mxu0 %v8895_v14  ;;  %v9699_v48 = vpack.c.bf16 %v4779_v16, %v4778_v51 }
 0x48d   :  { %vm4705_vm1 = vcmp.ge.f32.partialorder %v8314_v2, 0.0  ;;  %v4753_v60 = vmul.f32 0.01, %v8314_v2  ;;  %8467 = vmatprep.subr.bf16.mxu0 %v8896_v34  ;;  %v9710_v52 = vsel %vm4702_vm2, %v4116_v49, %v4750_v26  ;;  %v8902_v26 = vld [vmem:[#allocation9 + $0x318] sm:$0xff]  }
 0x48e   :  { %v4119_v19 = vpop.f32.mrf.mxu1  ;;  %8419 = vmatprep.mubr.bf16.mxu0 %v9699_v48 }
 0x48f   :  { %v9704_v33 = vsel %vm4705_vm1, %v8314_v2, %v4753_v60  ;;  %vm4703_vm3 = vcmp.ge.f32.partialorder %v4119_v19, 0.0  ;;  %v4751_v0 = vmul.f32 0.01, %v4119_v19  ;;  %8420 = vmatmul.mubr.bf16.gmra.mxu0 %v9697_v32 }
 0x490   :  { %v6571_v10 = vpack.c.bf16 %v9704_v33, %v9702_v38  ;;  %v8317_v30 = vpop.f32.mrf.mxu1  ;;  %8468 = vmatpush3.bf16.msra.mxu0 %v8896_v34  ;;  %8471 = vmatprep.mubr.bf16.mxu0 %v9672_v4 }
 0x491   :  { %v9712_v12 = vsel %vm4703_vm3, %v4119_v19, %v4751_v0  ;;  %8469 = vmatprep.subr.bf16.mxu0 %v8897_v41  ;;  %v4756_v47 = vmul.f32 0.01, %v8317_v30  ;;  %vm4708_vm4 = vcmp.ge.f32.partialorder %v8317_v30, 0.0 }
 0x492   :  { %v4132_v36 = vpop.f32.mrf.mxu1  ;;  %v6570_v20 = vpack.c.bf16 %v9712_v12, %v9710_v52 }
 0x493   :  { %v4754_v53 = vmul.f32 0.01, %v4132_v36  ;;  %vm4706_vm6 = vcmp.ge.f32.partialorder %v4132_v36, 0.0  ;;  %v9716_v5 = vsel %vm4708_vm4, %v8317_v30, %v4756_v47 }
 0x494   :  { %v8318_v23 = vpop.f32.mrf.mxu1  ;;  %8470 = vmatpush3.bf16.msra.mxu0 %v8897_v41 }
 0x495   :  { %vm4709_vm5 = vcmp.ge.f32.partialorder %v8318_v23, 0.0  ;;  %v4757_v40 = vmul.f32 0.01, %v8318_v23  ;;  %8519 = vmatprep.subr.bf16.mxu0 %v8898_v27  ;;  %v9724_v25 = vsel %vm4706_vm6, %v4132_v36, %v4754_v53 }
 0x496   :  { %v4135_v4 = vpop.f32.mrf.mxu1 }
 0x497   :  { %v9718_v35 = vsel %vm4709_vm5, %v8318_v23, %v4757_v40  ;;  %vm4707_vm7 = vcmp.ge.f32.partialorder %v4135_v4, 0.0  ;;  %v4755_v37 = vmul.f32 0.01, %v4135_v4  ;;  %8472 = vmatmul.mubr.bf16.vlgmr.msra.gmra.mxu0 %v9670_v55 }
 0x498   :  { %v6573_v46 = vpack.c.bf16 %v9718_v35, %v9716_v5  ;;  %v8321_v44 = vpop.f32.mrf.mxu1  ;;  %8475 = vmatprep.mubr.bf16.mxu0 %v9681_v18  ;;  %8520 = vmatpush3.bf16.msra.mxu0 %v8898_v27  ;;  %v8901_v18 = vld [vmem:[#allocation9 + $0x320] sm:$0xff]  }
 0x499   :  { %v9726_v14 = vsel %vm4707_vm7, %v4135_v4, %v4755_v37  ;;  %8521 = vmatprep.subr.bf16.mxu0 %v8899_v45  ;;  %v4760_v61 = vmul.f32 0.01, %v8321_v44  ;;  %vm4712_vm8 = vcmp.ge.f32.partialorder %v8321_v44, 0.0  ;;  %v8904_v37 = vld [vmem:[#allocation9 + $0x308] sm:$0xff]  }
 0x49a   :  { %v4148_v28 = vpop.f32.mrf.mxu1  ;;  %v6572_v63 = vpack.c.bf16 %v9726_v14, %v9724_v25 }
 0x49b   :  { %v4758_v29 = vmul.f32 0.01, %v4148_v28  ;;  %vm4710_vm10 = vcmp.ge.f32.partialorder %v4148_v28, 0.0  ;;  %v9730_v3 = vsel %vm4712_vm8, %v8321_v44, %v4760_v61 }
 0x49c   :  { %v8322_v55 = vpop.f32.mrf.mxu1  ;;  %8522 = vmatpush3.bf16.msra.mxu0 %v8899_v45 }
 0x49d   :  { %vm4713_vm9 = vcmp.ge.f32.partialorder %v8322_v55, 0.0  ;;  %v4761_v21 = vmul.f32 0.01, %v8322_v55  ;;  %8523 = vmatprep.subr.bf16.mxu0 %v8900_v43  ;;  %v9738_v16 = vsel %vm4710_vm10, %v4148_v28, %v4758_v29 }
 0x49e   :  { %v4151_v22 = vpop.f32.mrf.mxu1 }
 0x49f   :  { %v9732_v34 = vsel %vm4713_vm9, %v8322_v55, %v4761_v21  ;;  %vm4711_vm11 = vcmp.ge.f32.partialorder %v4151_v22, 0.0  ;;  %v4759_v49 = vmul.f32 0.01, %v4151_v22  ;;  %8476 = vmatmul.mubr.bf16.gmra.mxu0 %v9678_v39 }
 0x4a0   :  { %v6575_v7 = vpack.c.bf16 %v9732_v34, %v9730_v3  ;;  %v8325_v51 = vpop.f32.mrf.mxu1  ;;  %8479 = vmatprep.mubr.bf16.mxu0 %v9691_v58  ;;  %8524 = vmatpush3.bf16.msra.mxu0 %v8900_v43  ;;  %v8903_v58 = vld [vmem:[#allocation9 + $0x310] sm:$0xff]  }
 0x4a1   :  { %v9740_v2 = vsel %vm4711_vm11, %v4151_v22, %v4759_v49  ;;  %8525 = vmatprep.subr.bf16.mxu0 %v8901_v18  ;;  %v4764_v19 = vmul.f32 0.01, %v8325_v51  ;;  %vm4716_vm12 = vcmp.ge.f32.partialorder %v8325_v51, 0.0 }
 0x4a2   :  { %v4164_v60 = vpop.f32.mrf.mxu1  ;;  %v6574_v41 = vpack.c.bf16 %v9740_v2, %v9738_v16 }
 0x4a3   :  { %v4762_v0 = vmul.f32 0.01, %v4164_v60  ;;  %vm4714_vm14 = vcmp.ge.f32.partialorder %v4164_v60, 0.0  ;;  %v9744_v36 = vsel %vm4716_vm12, %v8325_v51, %v4764_v19 }
 0x4a4   :  { %v8326_v39 = vpop.f32.mrf.mxu1  ;;  %8526 = vmatpush3.bf16.msra.mxu0 %v8901_v18 }
 0x4a5   :  { %vm4717_vm13 = vcmp.ge.f32.partialorder %v8326_v39, 0.0  ;;  %v4765_v30 = vmul.f32 0.01, %v8326_v39  ;;  %8527 = vmatprep.subr.bf16.mxu0 %v8902_v26  ;;  %v9752_v45 = vsel %vm4714_vm14, %v4164_v60, %v4762_v0 }
 0x4a6   :  { %v4167_v27 = vpop.f32.mrf.mxu1 }
 0x4a7   :  { %v9746_v47 = vsel %vm4717_vm13, %v8326_v39, %v4765_v30  ;;  %vm4715_vm15 = vcmp.ge.f32.partialorder %v4167_v27, 0.0  ;;  %v4763_v23 = vmul.f32 0.01, %v4167_v27  ;;  %8480 = vmatmul.mubr.bf16.gmra.mxu0 %v9688_v13 }
 0x4a8   :  { %v6577_v53 = vpack.c.bf16 %v9746_v47, %v9744_v36  ;;  %v8377_v40 = vpop.f32.mrf.mxu1  ;;  %8483 = vmatprep.mubr.bf16.mxu0 %v9699_v48  ;;  %8528 = vmatpush3.bf16.msra.mxu0 %v8902_v26  ;;  %v8905_v48 = vld [vmem:[#allocation9 + $0x300] sm:$0xff]  }
 0x4a9   :  { %v9754_v4 = vsel %vm4715_vm15, %v4167_v27, %v4763_v23  ;;  %8529 = vmatprep.subr.bf16.mxu0 %v8903_v58  ;;  %v4592_v13 = vadd.f32 %v8377_v40, %v9638_v24  ;;  %v8907_v23 = vld [vmem:[#allocation9 + $0x370] sm:$0xff]  }
 0x4aa   :  { %v4527_v44 = vpop.f32.mrf.mxu1  ;;  %v6576_v43 = vpack.c.bf16 %v9754_v4, %v9752_v45 }
 0x4ab   :  { %v4590_v28 = vadd.f32 %v4527_v44, %v9640_v31  ;;  %v4736_v49 = vmul.f32 0.01, %v4592_v13  ;;  %vm4688_vm2 = vcmp.ge.f32.partialorder %v4592_v13, 0.0  ;;  %v8906_v31 = vld [vmem:[#allocation9 + $0x378] sm:$0xff]  }
 0x4ac   :  { %v8378_v61 = vpop.f32.mrf.mxu1  ;;  %8530 = vmatpush3.bf16.msra.mxu0 %v8903_v58 }
 0x4ad   :  { %v4593_v55 = vadd.f32 %v8378_v61, %v9642_v9  ;;  %8531 = vmatprep.subr.bf16.mxu0 %v8904_v37  ;;  %v4734_v21 = vmul.f32 0.01, %v4590_v28  ;;  %vm4686_vm1 = vcmp.ge.f32.partialorder %v4590_v28, 0.0  ;;  %v4784_v0 = vsel %vm4688_vm2, %v4592_v13, %v4736_v49 }
 0x4ae   :  { %v4530_v29 = vpop.f32.mrf.mxu1 }
 0x4af   :  { %vm4689_vm0 = vcmp.ge.f32.partialorder %v4593_v55, 0.0  ;;  %v4737_v18 = vmul.f32 0.01, %v4593_v55  ;;  %v4591_v22 = vadd.f32 %v4530_v29, %v9644_v1  ;;  %8484 = vmatmul.mubr.bf16.gmra.mxu0 %v9697_v32  ;;  %v4782_v19 = vsel %vm4686_vm1, %v4590_v28, %v4734_v21 }
 0x4b0   :  { %v8381_v51 = vpop.f32.mrf.mxu1  ;;  %8532 = vmatpush3.bf16.msra.mxu0 %v8904_v37 }
 0x4b1   :  { %vm4687_vm3 = vcmp.ge.f32.partialorder %v4591_v22, 0.0  ;;  %v4735_v24 = vmul.f32 0.01, %v4591_v22  ;;  %8533 = vmatprep.subr.bf16.mxu0 %v8905_v48  ;;  %v4785_v9 = vsel %vm4689_vm0, %v4593_v55, %v4737_v18  ;;  %v4596_v1 = vadd.f32 %v8381_v51, %v9646_v42 }
 0x4b2   :  { %v4543_v26 = vpop.f32.mrf.mxu1  ;;  %v9767_v58 = vpack.c.bf16 %v4785_v9, %v4784_v0 }
 0x4b3   :  { %v4594_v60 = vadd.f32 %v4543_v26, %v9648_v17  ;;  %v4783_v39 = vsel %vm4687_vm3, %v4591_v22, %v4735_v24  ;;  %v4740_v42 = vmul.f32 0.01, %v4596_v1  ;;  %vm4692_vm6 = vcmp.ge.f32.partialorder %v4596_v1, 0.0 }
 0x4b4   :  { %v8382_v30 = vpop.f32.mrf.mxu1  ;;  %8534 = vmatpush3.bf16.msra.mxu0 %v8905_v48  ;;  %v9765_v32 = vpack.c.bf16 %v4783_v39, %v4782_v19 }
 0x4b5   :  { %v4597_v27 = vadd.f32 %v8382_v30, %v9650_v50  ;;  %8583 = vmatprep.subr.bf16.mxu0 %v8906_v31  ;;  %v4738_v37 = vmul.f32 0.01, %v4594_v60  ;;  %vm4690_vm5 = vcmp.ge.f32.partialorder %v4594_v60, 0.0  ;;  %v8908_v50 = vld [vmem:[#allocation9 + $0x368] sm:$0xff]   ;;  %v4788_v18 = vsel %vm4692_vm6, %v4596_v1, %v4740_v42 }
 0x4b6   :  { %v4546_v40 = vpop.f32.mrf.mxu1  ;;  %8535 = vmatprep.mubr.bf16.mxu0 %v9765_v32 }
 0x4b7   :  { %vm4693_vm4 = vcmp.ge.f32.partialorder %v4597_v27, 0.0  ;;  %v4741_v17 = vmul.f32 0.01, %v4597_v27  ;;  %v4595_v44 = vadd.f32 %v4546_v40, %v9652_v6  ;;  %8536 = vmatmul.mubr.bf16.vlgmr.msra.gmra.mxu0 %v9767_v58  ;;  %v4786_v29 = vsel %vm4690_vm5, %v4594_v60, %v4738_v37 }
 0x4b8   :  { %v8385_v28 = vpop.f32.mrf.mxu1  ;;  %8584 = vmatpush3.bf16.msra.mxu0 %v8906_v31  ;;  %v8909_v31 = vld [vmem:[#allocation9 + $0x360] sm:$0xff]  }
 0x4b9   :  { %vm4691_vm7 = vcmp.ge.f32.partialorder %v4595_v44, 0.0  ;;  %v4739_v13 = vmul.f32 0.01, %v4595_v44  ;;  %8585 = vmatprep.subr.bf16.mxu0 %v8907_v23  ;;  %v4789_v61 = vsel %vm4693_vm4, %v4597_v27, %v4741_v17  ;;  %v4600_v6 = vadd.f32 %v8385_v28, %v9654_v8  ;;  %v8911_v28 = vld [vmem:[#allocation9 + $0x350] sm:$0xff]  }
 0x4ba   :  { %v4559_v55 = vpop.f32.mrf.mxu1  ;;  %v9777_v51 = vpack.c.bf16 %v4789_v61, %v4788_v18 }
 0x4bb   :  { %v4598_v48 = vadd.f32 %v4559_v55, %v9656_v11  ;;  %v4787_v21 = vsel %vm4691_vm7, %v4595_v44, %v4739_v13  ;;  %v4744_v8 = vmul.f32 0.01, %v4600_v6  ;;  %vm4696_vm10 = vcmp.ge.f32.partialorder %v4600_v6, 0.0 }
 0x4bc   :  { %v8386_v22 = vpop.f32.mrf.mxu1  ;;  %8586 = vmatpush3.bf16.msra.mxu0 %v8907_v23  ;;  %v9775_v49 = vpack.c.bf16 %v4787_v21, %v4786_v29 }
 0x4bd   :  { %v4601_v24 = vadd.f32 %v8386_v22, %v9658_v59  ;;  %8587 = vmatprep.subr.bf16.mxu0 %v8908_v50  ;;  %v4742_v26 = vmul.f32 0.01, %v4598_v48  ;;  %vm4694_vm9 = vcmp.ge.f32.partialorder %v4598_v48, 0.0  ;;  %v8910_v59 = vld [vmem:[#allocation9 + $0x358] sm:$0xff]   ;;  %v4792_v40 = vsel %vm4696_vm10, %v4600_v6, %v4744_v8 }
 0x4be   :  { %v4562_v9 = vpop.f32.mrf.mxu1  ;;  %8539 = vmatprep.mubr.bf16.mxu0 %v9775_v49 }
 0x4bf   :  { %vm4697_vm8 = vcmp.ge.f32.partialorder %v4601_v24, 0.0  ;;  %v4745_v11 = vmul.f32 0.01, %v4601_v24  ;;  %v4599_v60 = vadd.f32 %v4562_v9, %v9660_v54  ;;  %8540 = vmatmul.mubr.bf16.gmra.mxu0 %v9777_v51  ;;  %v4790_v27 = vsel %vm4694_vm9, %v4598_v48, %v4742_v26  ;;  %v8912_v48 = vld [vmem:[#allocation9 + $0x348] sm:$0xff]   ;;  %v8917_v26 = vld [vmem:[#allocation9 + $0x3a0] sm:$0xff]  }
 0x4c0   :  { %v8389_v19 = vpop.f32.mrf.mxu1  ;;  %8588 = vmatpush3.bf16.msra.mxu0 %v8908_v50  ;;  %v8916_v9 = vld [vmem:[#allocation9 + $0x3a8] sm:$0xff]  }
 0x4c1   :  { %vm4695_vm11 = vcmp.ge.f32.partialorder %v4599_v60, 0.0  ;;  %v4743_v39 = vmul.f32 0.01, %v4599_v60  ;;  %8589 = vmatprep.subr.bf16.mxu0 %v8909_v31  ;;  %v4793_v0 = vsel %vm4697_vm8, %v4601_v24, %v4745_v11  ;;  %v4604_v54 = vadd.f32 %v8389_v19, %v9662_v15  ;;  %v8913_v24 = vld [vmem:[#allocation9 + $0x340] sm:$0xff]   ;;  %v8919_v11 = vld [vmem:[#allocation9 + $0x390] sm:$0xff]  }
 0x4c2   :  { %v4575_v1 = vpop.f32.mrf.mxu1  ;;  %v5753_v44 = vpack.c.bf16 %v4793_v0, %v4792_v40 }
 0x4c3   :  { %v4602_v30 = vadd.f32 %v4575_v1, %v9664_v56  ;;  %v4791_v23 = vsel %vm4695_vm11, %v4599_v60, %v4743_v39  ;;  %v4748_v55 = vmul.f32 0.01, %v4604_v54  ;;  %vm4700_vm14 = vcmp.ge.f32.partialorder %v4604_v54, 0.0 }
 0x4c4   :  { %v8390_v37 = vpop.f32.mrf.mxu1  ;;  %8590 = vmatpush3.bf16.msra.mxu0 %v8909_v31  ;;  %v5752_v17 = vpack.c.bf16 %v4791_v23, %v4790_v27  ;;  %v8915_v31 = vld [vmem:[#allocation9 + $0x3b0] sm:$0xff]  }
 0x4c5   :  { %v4605_v42 = vadd.f32 %v8390_v37, %v9666_v62  ;;  %8591 = vmatprep.subr.bf16.mxu0 %v8910_v59  ;;  %v4746_v50 = vmul.f32 0.01, %v4602_v30  ;;  %vm4698_vm13 = vcmp.ge.f32.partialorder %v4602_v30, 0.0  ;;  %v4796_v18 = vsel %vm4700_vm14, %v4604_v54, %v4748_v55 }
 0x4c6   :  { %v4578_v13 = vpop.f32.mrf.mxu1  ;;  %8543 = vmatprep.mubr.bf16.mxu0 %v5752_v17 }
 0x4c7   :  { %vm4701_vm12 = vcmp.ge.f32.partialorder %v4605_v42, 0.0  ;;  %v4749_v61 = vmul.f32 0.01, %v4605_v42  ;;  %v4603_v56 = vadd.f32 %v4578_v13, %v9668_v57  ;;  %8544 = vmatmul.mubr.bf16.gmra.mxu0 %v5753_v44  ;;  %v4794_v62 = vsel %vm4698_vm13, %v4602_v30, %v4746_v50  ;;  %v8914_v57 = vld [vmem:[#allocation9 + $0x3b8] sm:$0xff]  }
 0x4c8   :  { %8592 = vmatpush3.bf16.msra.mxu0 %v8910_v59 }
 0x4c9   :  { %vm4699_vm15 = vcmp.ge.f32.partialorder %v4603_v56, 0.0  ;;  %v4747_v15 = vmul.f32 0.01, %v4603_v56  ;;  %8593 = vmatprep.subr.bf16.mxu0 %v8911_v28  ;;  %v4797_v29 = vsel %vm4701_vm12, %v4605_v42, %v4749_v61 }
 0x4ca   :  { %v5755_v22 = vpack.c.bf16 %v4797_v29, %v4796_v18 }
 0x4cb   :  { %v4795_v21 = vsel %vm4699_vm15, %v4603_v56, %v4747_v15 }
 0x4cc   :  { %8594 = vmatpush3.bf16.msra.mxu0 %v8911_v28  ;;  %v5754_v6 = vpack.c.bf16 %v4795_v21, %v4794_v62 }
 0x4cd   :  { %8595 = vmatprep.subr.bf16.mxu0 %v8912_v48 }
 0x4ce   :  { %8547 = vmatprep.mubr.bf16.mxu0 %v5754_v6 }
 0x4cf   :  { %8548 = vmatmul.mubr.bf16.gmra.mxu0 %v5755_v22 }
 0x4d0   :  { %8596 = vmatpush3.bf16.msra.mxu0 %v8912_v48  ;;  %8599 = vmatprep.mubr.bf16.mxu0 %v9765_v32  ;;  %v8918_v32 = vld [vmem:[#allocation9 + $0x398] sm:$0xff]  }
 0x4d1   :  { %8597 = vmatprep.subr.bf16.mxu0 %v8913_v24 }
 0x4d4   :  { %8598 = vmatpush3.bf16.msra.mxu0 %v8913_v24 }
 0x4d5   :  { %8647 = vmatprep.subr.bf16.mxu0 %v8914_v57 }
 0x4d7   :  { %8600 = vmatmul.mubr.bf16.vlgmr.msra.gmra.mxu0 %v9767_v58  ;;  %v8920_v58 = vld [vmem:[#allocation9 + $0x388] sm:$0xff]  }
 0x4d8   :  { %8603 = vmatprep.mubr.bf16.mxu0 %v9775_v49  ;;  %8648 = vmatpush3.bf16.msra.mxu0 %v8914_v57  ;;  %v8921_v49 = vld [vmem:[#allocation9 + $0x380] sm:$0xff]   ;;  %v9829_v57 = vld [vmem:[#allocation10 + $0xb] ss:$0 sm:$0xff] }
 0x4d9   :  { %8649 = vmatprep.subr.bf16.mxu0 %v8915_v31 }
 0x4dc   :  { %8650 = vmatpush3.bf16.msra.mxu0 %v8915_v31 }
 0x4dd   :  { %8651 = vmatprep.subr.bf16.mxu0 %v8916_v9 }
 0x4df   :  { %8604 = vmatmul.mubr.bf16.gmra.mxu0 %v9777_v51  ;;  %v8922_v51 = vld [vmem:[#allocation7] sm:$0xff]  }
 0x4e0   :  { %8607 = vmatprep.mubr.bf16.mxu0 %v5752_v17  ;;  %8652 = vmatpush3.bf16.msra.mxu0 %v8916_v9 }
 0x4e1   :  { %8653 = vmatprep.subr.bf16.mxu0 %v8917_v26  ;;  %8439 = vmatprep.mubr.bf16.mxu1 %v8922_v51 }
 0x4e4   :  { %8654 = vmatpush3.bf16.msra.mxu0 %v8917_v26 }
 0x4e5   :  { %8655 = vmatprep.subr.bf16.mxu0 %v8918_v32 }
 0x4e7   :  { %8608 = vmatmul.mubr.bf16.gmra.mxu0 %v5753_v44 }
 0x4e8   :  { %8611 = vmatprep.mubr.bf16.mxu0 %v5754_v6  ;;  %8656 = vmatpush3.bf16.msra.mxu0 %v8918_v32  ;;  %v8923_v32 = vld [vmem:[#allocation7 + $0x8] sm:$0xff]  }
 0x4e9   :  { %8657 = vmatprep.subr.bf16.mxu0 %v8919_v11 }
 0x4ec   :  { %8658 = vmatpush3.bf16.msra.mxu0 %v8919_v11 }
 0x4ed   :  { %8659 = vmatprep.subr.bf16.mxu0 %v8920_v58 }
 0x4ef   :  { %8612 = vmatmul.mubr.bf16.gmra.mxu0 %v5755_v22 }
 0x4f0   :  { %8660 = vmatpush3.bf16.msra.mxu0 %v8920_v58  ;;  %8663 = vmatprep.mubr.bf16.mxu0 %v6570_v20  ;;  %v8924_v58 = vld [vmem:[#allocation7 + $0x10] sm:$0xff]  }
 0x4f1   :  { %8661 = vmatprep.subr.bf16.mxu0 %v8921_v49 }
 0x4f4   :  { %8662 = vmatpush3.bf16.msra.mxu0 %v8921_v49 }
 0x4f7   :  { %8664 = vmatmul.mubr.bf16.vlgmr.msra.gmra.mxu0 %v6571_v10 }
 0x4f8   :  { %8667 = vmatprep.mubr.bf16.mxu0 %v6572_v63 }
 0x4ff   :  { %8668 = vmatmul.mubr.bf16.gmra.mxu0 %v6573_v46 }
 0x500   :  { %8671 = vmatprep.mubr.bf16.mxu0 %v6574_v41 }
 0x507   :  { %8672 = vmatmul.mubr.bf16.gmra.mxu0 %v6575_v7  ;;  %v7186_v7 = vld [vmem:[#allocation10 + $0xa] ss:$0 sm:$0xff] }
 0x508   :  { %8675 = vmatprep.mubr.bf16.mxu0 %v6576_v43 }
 0x50f   :  { %8676 = vmatmul.mubr.bf16.gmra.mxu0 %v6577_v53 }
 0x537   :  { %v8409_v38 = vpop.f32.mrf.mxu0 }
 0x538   :  { %v5050_v15 = vadd.f32 %v8409_v38, %v7186_v7 }
 0x539   :  { %v5041_v33 = vpop.f32.mrf.mxu0 }
 0x53a   :  { %v5042_v18 = vadd.f32 %v7186_v7, %v5041_v33 }
 0x53b   :  { %v8410_v10 = vpop.f32.mrf.mxu0 }
 0x53c   :  { %v5053_v61 = vadd.f32 %v8410_v10, %v7186_v7 }
 0x53d   :  { %v5044_v52 = vpop.f32.mrf.mxu0 }
 0x53e   :  { %v5137_v29 = vpack.c.bf16 %v5053_v61, %v5050_v15  ;;  %v5045_v62 = vadd.f32 %v7186_v7, %v5044_v52 }
 0x53f   :  { %v8413_v12 = vpop.f32.mrf.mxu0 }
 0x540   :  { %v5066_v37 = vadd.f32 %v8413_v12, %v7186_v7  ;;  %v5136_v22 = vpack.c.bf16 %v5045_v62, %v5042_v18 }
 0x541   :  { %v5057_v20 = vpop.f32.mrf.mxu0 }
 0x542   :  { %v5058_v13 = vadd.f32 %v7186_v7, %v5057_v20 }
 0x543   :  { %v8414_v5 = vpop.f32.mrf.mxu0 }
 0x544   :  { %v5069_v23 = vadd.f32 %v8414_v5, %v7186_v7 }
 0x545   :  { %v5060_v35 = vpop.f32.mrf.mxu0 }
 0x546   :  { %v5139_v44 = vpack.c.bf16 %v5069_v23, %v5066_v37  ;;  %v5061_v42 = vadd.f32 %v7186_v7, %v5060_v35 }
 0x547   :  { %v8417_v46 = vpop.f32.mrf.mxu0 }
 0x548   :  { %v5082_v19 = vadd.f32 %v8417_v46, %v7186_v7  ;;  %v5138_v56 = vpack.c.bf16 %v5061_v42, %v5058_v13  ;;  %v8930_v42 = vld [vmem:[#allocation7 + $0x40] sm:$0xff]  }
 0x549   :  { %v5073_v25 = vpop.f32.mrf.mxu0 }
 0x54a   :  { %v5074_v30 = vadd.f32 %v7186_v7, %v5073_v25  ;;  %v8925_v25 = vld [vmem:[#allocation7 + $0x18] sm:$0xff]  }
 0x54b   :  { %v8418_v14 = vpop.f32.mrf.mxu0 }
 0x54c   :  { %v5085_v43 = vadd.f32 %v8418_v14, %v7186_v7 }
 0x54d   :  { %v5076_v63 = vpop.f32.mrf.mxu0 }
 0x54e   :  { %v5141_v59 = vpack.c.bf16 %v5085_v43, %v5082_v19  ;;  %v5077_v0 = vadd.f32 %v7186_v7, %v5076_v63  ;;  %v8926_v63 = vld [vmem:[#allocation7 + $0x20] sm:$0xff]  }
 0x54f   :  { %v8421_v3 = vpop.f32.mrf.mxu0 }
 0x550   :  { %v5098_v2 = vadd.f32 %v8421_v3, %v7186_v7  ;;  %v5140_v40 = vpack.c.bf16 %v5077_v0, %v5074_v30 }
 0x551   :  { %v5089_v34 = vpop.f32.mrf.mxu0 }
 0x552   :  { %v5090_v47 = vadd.f32 %v7186_v7, %v5089_v34 }
 0x553   :  { %v8422_v16 = vpop.f32.mrf.mxu0 }
 0x554   :  { %v5101_v41 = vadd.f32 %v8422_v16, %v7186_v7 }
 0x555   :  { %v5092_v36 = vpop.f32.mrf.mxu0 }
 0x556   :  { %v5143_v53 = vpack.c.bf16 %v5101_v41, %v5098_v2  ;;  %v5093_v45 = vadd.f32 %v7186_v7, %v5092_v36 }
 0x557   :  { %v9815_v4 = vpop.f32.mrf.mxu0 }
 0x558   :  { %v5142_v60 = vpack.c.bf16 %v5093_v45, %v5090_v47  ;;  %8423 = vmatprep.subr.bf16.mxu1 %v5143_v53  ;;  %v8927_v45 = vld [vmem:[#allocation7 + $0x28] sm:$0xff]   ;;  %v5461_v23 = vadd.f32 %v9815_v4, %v9829_v57 }
 0x559   :  { %8424 = vmatpush3.bf16.msra.mxu1 %v5143_v53  ;;  %v9817_v8 = vpop.f32.mrf.mxu0  ;;  %v9870_v4 = vld [vmem:[#allocation10 + $0xc] ss:$0 sm:$0xff] }
 0x55a   :  { %8425 = vmatprep.subr.bf16.mxu1 %v5142_v60 }
 0x55b   :  { %v9819_v39 = vpop.f32.mrf.mxu0 }
 0x55c   :  { %v5464_v0 = vadd.f32 %v9819_v39, %v9829_v57  ;;  %v5453_v39 = vadd.f32 %v9829_v57, %v9817_v8 }
 0x55d   :  { %8426 = vmatpush3.bf16.msra.mxu1 %v5142_v60  ;;  %v9821_v1 = vpop.f32.mrf.mxu0  ;;  %v8928_v60 = vld [vmem:[#allocation7 + $0x30] sm:$0xff]  }
 0x55e   :  { %8427 = vmatprep.subr.bf16.mxu1 %v5141_v59  ;;  %v5548_v37 = vpack.c.bf16 %v5464_v0, %v5461_v23 }
 0x55f   :  { %v9823_v27 = vpop.f32.mrf.mxu0 }
 0x560   :  { %v5477_v41 = vadd.f32 %v9823_v27, %v9829_v57 }
 0x561   :  { %8428 = vmatpush3.bf16.msra.mxu1 %v5141_v59  ;;  %v9825_v54 = vpop.f32.mrf.mxu0 }
 0x562   :  { %8429 = vmatprep.subr.bf16.mxu1 %v5140_v40  ;;  %v5469_v19 = vadd.f32 %v9829_v57, %v9825_v54  ;;  %v8929_v54 = vld [vmem:[#allocation7 + $0x38] sm:$0xff]  }
 0x563   :  { %v8478_v17 = vpop.f32.mrf.mxu0 }
 0x564   :  { %v5480_v7 = vadd.f32 %v8478_v17, %v9829_v57  ;;  %v5456_v17 = vadd.f32 %v9829_v57, %v9821_v1 }
 0x565   :  { %8430 = vmatpush3.bf16.msra.mxu1 %v5140_v40  ;;  %v9827_v28 = vpop.f32.mrf.mxu0 }
 0x566   :  { %8431 = vmatprep.subr.bf16.mxu1 %v5139_v44  ;;  %v5550_v47 = vpack.c.bf16 %v5480_v7, %v5477_v41  ;;  %v5472_v53 = vadd.f32 %v9829_v57, %v9827_v28  ;;  %v5547_v13 = vpack.c.bf16 %v5456_v17, %v5453_v39  ;;  %v8940_v17 = vld [vmem:[#allocation7 + $0x90] sm:$0xff]  }
 0x567   :  { %v8481_v50 = vpop.f32.mrf.mxu0 }
 0x568   :  { %v5493_v20 = vadd.f32 %v8481_v50, %v9829_v57  ;;  %v5549_v30 = vpack.c.bf16 %v5472_v53, %v5469_v19  ;;  %v8938_v19 = vld [vmem:[#allocation7 + $0x80] sm:$0xff]  }
 0x569   :  { %8432 = vmatpush3.bf16.msra.mxu1 %v5139_v44  ;;  %v5484_v55 = vpop.f32.mrf.mxu0 }
 0x56a   :  { %8433 = vmatprep.subr.bf16.mxu1 %v5138_v56  ;;  %v5485_v3 = vadd.f32 %v9829_v57, %v5484_v55  ;;  %v8931_v55 = vld [vmem:[#allocation7 + $0x48] sm:$0xff]  }
 0x56b   :  { %v8482_v48 = vpop.f32.mrf.mxu0 }
 0x56c   :  { %v5496_v10 = vadd.f32 %v8482_v48, %v9829_v57  ;;  %v8932_v48 = vld [vmem:[#allocation7 + $0x50] sm:$0xff]  }
 0x56d   :  { %8434 = vmatpush3.bf16.msra.mxu1 %v5138_v56  ;;  %v5487_v21 = vpop.f32.mrf.mxu0 }
 0x56e   :  { %8435 = vmatprep.subr.bf16.mxu1 %v5137_v29  ;;  %v5552_v35 = vpack.c.bf16 %v5496_v10, %v5493_v20  ;;  %v5488_v46 = vadd.f32 %v9829_v57, %v5487_v21 }
 0x56f   :  { %v8485_v6 = vpop.f32.mrf.mxu0 }
 0x570   :  { %v5509_v9 = vadd.f32 %v8485_v6, %v9829_v57  ;;  %v5551_v16 = vpack.c.bf16 %v5488_v46, %v5485_v3  ;;  %v8936_v3 = vld [vmem:[#allocation7 + $0x70] sm:$0xff]  }
 0x571   :  { %8436 = vmatpush3.bf16.msra.mxu1 %v5137_v29  ;;  %v5500_v24 = vpop.f32.mrf.mxu0 }
 0x572   :  { %8437 = vmatprep.subr.bf16.mxu1 %v5136_v22  ;;  %v5501_v49 = vadd.f32 %v9829_v57, %v5500_v24 }
 0x573   :  { %v8486_v31 = vpop.f32.mrf.mxu0 }
 0x574   :  { %v5512_v26 = vadd.f32 %v8486_v31, %v9829_v57 }
 0x575   :  { %8438 = vmatpush3.bf16.msra.mxu1 %v5136_v22  ;;  %v5503_v11 = vpop.f32.mrf.mxu0 }
 0x576   :  { %v5554_v51 = vpack.c.bf16 %v5512_v26, %v5509_v9  ;;  %v5504_v38 = vadd.f32 %v9829_v57, %v5503_v11  ;;  %v8933_v26 = vld [vmem:[#allocation7 + $0x58] sm:$0xff]   ;;  %v8934_v11 = vld [vmem:[#allocation7 + $0x60] sm:$0xff]  }
 0x577   :  { %v9835_v33 = vpop.f32.mrf.mxu0 }
 0x578   :  { %v5553_v52 = vpack.c.bf16 %v5504_v38, %v5501_v49  ;;  %8440 = vmatmul.mubr.bf16.vlgmr.msra.gmra.mxu1 %v8923_v32  ;;  %8487 = vmatprep.subr.bf16.mxu1 %v5554_v51 }
 0x579   :  { %8488 = vmatpush3.bf16.msra.mxu1 %v5554_v51  ;;  %v9838_v12 = vpop.f32.mrf.mxu0  ;;  %8443 = vmatprep.mubr.bf16.mxu1 %v8924_v58 }
 0x57a   :  { %8489 = vmatprep.subr.bf16.mxu1 %v5553_v52 }
 0x57b   :  { %v9841_v5 = vpop.f32.mrf.mxu0 }
 0x57d   :  { %8490 = vmatpush3.bf16.msra.mxu1 %v5553_v52  ;;  %v9844_v14 = vpop.f32.mrf.mxu0 }
 0x57e   :  { %8491 = vmatprep.subr.bf16.mxu1 %v5552_v35 }
 0x57f   :  { %v9847_v34 = vpop.f32.mrf.mxu0 }
 0x580   :  { %8444 = vmatmul.mubr.bf16.gmra.mxu1 %v8925_v25  ;;  %v5888_v52 = vadd.f32 %v9847_v34, %v9870_v4  ;;  %v8935_v25 = vld [vmem:[#allocation7 + $0x68] sm:$0xff]   ;;  %v5875_v34 = vadd.f32 %v9841_v5, %v9870_v4  ;;  %v5864_v5 = vadd.f32 %v9870_v4, %v9838_v12 }
 0x581   :  { %8492 = vmatpush3.bf16.msra.mxu1 %v5552_v35  ;;  %v9850_v2 = vpop.f32.mrf.mxu0  ;;  %8447 = vmatprep.mubr.bf16.mxu1 %v8926_v63 }
 0x582   :  { %8493 = vmatprep.subr.bf16.mxu1 %v5551_v16  ;;  %v5880_v7 = vadd.f32 %v9870_v4, %v9850_v2  ;;  %v8937_v2 = vld [vmem:[#allocation7 + $0x78] sm:$0xff]  }
 0x583   :  { %v9854_v36 = vpop.f32.mrf.mxu0 }
 0x584   :  { %v5891_v51 = vadd.f32 %v9854_v36, %v9870_v4 }
 0x585   :  { %8494 = vmatpush3.bf16.msra.mxu1 %v5551_v16  ;;  %v9858_v43 = vpop.f32.mrf.mxu0 }
 0x586   :  { %8495 = vmatprep.subr.bf16.mxu1 %v5550_v47  ;;  %v5961_v35 = vpack.c.bf16 %v5891_v51, %v5888_v52  ;;  %v5883_v46 = vadd.f32 %v9870_v4, %v9858_v43  ;;  %v5867_v43 = vadd.f32 %v9870_v4, %v9844_v14 }
 0x587   :  { %v8545_v59 = vpop.f32.mrf.mxu0 }
 0x588   :  { %8448 = vmatmul.mubr.bf16.gmra.mxu1 %v8927_v45  ;;  %v5904_v24 = vadd.f32 %v8545_v59, %v9870_v4  ;;  %v5960_v41 = vpack.c.bf16 %v5883_v46, %v5880_v7  ;;  %v5958_v0 = vpack.c.bf16 %v5867_v43, %v5864_v5  ;;  %v8946_v7 = vld [vmem:[#allocation7 + $0xc0] sm:$0xff]   ;;  %v8948_v43 = vld [vmem:[#allocation7 + $0xd0] sm:$0xff]  }
 0x589   :  { %8496 = vmatpush3.bf16.msra.mxu1 %v5550_v47  ;;  %v5895_v27 = vpop.f32.mrf.mxu0  ;;  %8451 = vmatprep.mubr.bf16.mxu1 %v8928_v60  ;;  %v5872_v47 = vadd.f32 %v9835_v33, %v9870_v4  ;;  %v9912_v33 = vld [vmem:[#allocation10 + $0xd] ss:$0 sm:$0xff] }
 0x58a   :  { %8497 = vmatprep.subr.bf16.mxu1 %v5549_v30  ;;  %v5896_v58 = vadd.f32 %v9870_v4, %v5895_v27 }
 0x58b   :  { %v8546_v40 = vpop.f32.mrf.mxu0  ;;  %v5959_v45 = vpack.c.bf16 %v5875_v34, %v5872_v47 }
 0x58c   :  { %v5907_v18 = vadd.f32 %v8546_v40, %v9870_v4  ;;  %v8939_v40 = vld [vmem:[#allocation7 + $0x88] sm:$0xff]  }
 0x58d   :  { %8498 = vmatpush3.bf16.msra.mxu1 %v5549_v30  ;;  %v5898_v44 = vpop.f32.mrf.mxu0 }
 0x58e   :  { %8499 = vmatprep.subr.bf16.mxu1 %v5548_v37  ;;  %v5963_v31 = vpack.c.bf16 %v5907_v18, %v5904_v24  ;;  %v5899_v9 = vadd.f32 %v9870_v4, %v5898_v44 }
 0x58f   :  { %v8549_v28 = vpop.f32.mrf.mxu0 }
 0x590   :  { %8452 = vmatmul.mubr.bf16.gmra.mxu1 %v8929_v54  ;;  %v5920_v1 = vadd.f32 %v8549_v28, %v9870_v4  ;;  %v5962_v38 = vpack.c.bf16 %v5899_v9, %v5896_v58  ;;  %v8944_v58 = vld [vmem:[#allocation7 + $0xb0] sm:$0xff]  }
 0x591   :  { %8500 = vmatpush3.bf16.msra.mxu1 %v5548_v37  ;;  %v5911_v50 = vpop.f32.mrf.mxu0  ;;  %8503 = vmatprep.mubr.bf16.mxu1 %v8930_v42 }
 0x592   :  { %8501 = vmatprep.subr.bf16.mxu1 %v5547_v13  ;;  %v5912_v8 = vadd.f32 %v9870_v4, %v5911_v50 }
 0x593   :  { %v8550_v61 = vpop.f32.mrf.mxu0 }
 0x594   :  { %v5923_v56 = vadd.f32 %v8550_v61, %v9870_v4 }
 0x595   :  { %8502 = vmatpush3.bf16.msra.mxu1 %v5547_v13  ;;  %v5914_v15 = vpop.f32.mrf.mxu0 }
 0x596   :  { %v5965_v29 = vpack.c.bf16 %v5923_v56, %v5920_v1  ;;  %v5915_v62 = vadd.f32 %v9870_v4, %v5914_v15  ;;  %v8941_v56 = vld [vmem:[#allocation7 + $0x98] sm:$0xff]   ;;  %v8942_v15 = vld [vmem:[#allocation7 + $0xa0] sm:$0xff]  }
 0x597   :  { %v9876_v21 = vpop.f32.mrf.mxu0 }
 0x598   :  { %v5964_v6 = vpack.c.bf16 %v5915_v62, %v5912_v8  ;;  %8504 = vmatmul.mubr.bf16.vlgmr.msra.gmra.mxu1 %v8931_v55  ;;  %8551 = vmatprep.subr.bf16.mxu1 %v5965_v29 }
 0x599   :  { %8552 = vmatpush3.bf16.msra.mxu1 %v5965_v29  ;;  %v9879_v22 = vpop.f32.mrf.mxu0  ;;  %8507 = vmatprep.mubr.bf16.mxu1 %v8932_v48 }
 0x59a   :  { %8553 = vmatprep.subr.bf16.mxu1 %v5964_v6 }
 0x59b   :  { %v9882_v57 = vpop.f32.mrf.mxu0 }
 0x59c   :  { %v6286_v52 = vadd.f32 %v9882_v57, %v9912_v33  ;;  %v6275_v57 = vadd.f32 %v9912_v33, %v9879_v22 }
 0x59d   :  { %8554 = vmatpush3.bf16.msra.mxu1 %v5964_v6  ;;  %v9885_v32 = vpop.f32.mrf.mxu0 }
 0x59e   :  { %8555 = vmatprep.subr.bf16.mxu1 %v5963_v31 }
 0x59f   :  { %v9888_v49 = vpop.f32.mrf.mxu0 }
 0x5a0   :  { %8508 = vmatmul.mubr.bf16.gmra.mxu1 %v8933_v26  ;;  %v6299_v6 = vadd.f32 %v9888_v49, %v9912_v33  ;;  %v8943_v26 = vld [vmem:[#allocation7 + $0xa8] sm:$0xff]  }
 0x5a1   :  { %8556 = vmatpush3.bf16.msra.mxu1 %v5963_v31  ;;  %v9892_v10 = vpop.f32.mrf.mxu0  ;;  %8511 = vmatprep.mubr.bf16.mxu1 %v8934_v11 }
 0x5a2   :  { %8557 = vmatprep.subr.bf16.mxu1 %v5962_v38  ;;  %v6291_v51 = vadd.f32 %v9912_v33, %v9892_v10  ;;  %v8945_v10 = vld [vmem:[#allocation7 + $0xb8] sm:$0xff]  }
 0x5a3   :  { %v9896_v20 = vpop.f32.mrf.mxu0 }
 0x5a4   :  { %v6302_v29 = vadd.f32 %v9896_v20, %v9912_v33 }
 0x5a5   :  { %8558 = vmatpush3.bf16.msra.mxu1 %v5962_v38  ;;  %v9900_v63 = vpop.f32.mrf.mxu0 }
 0x5a6   :  { %8559 = vmatprep.subr.bf16.mxu1 %v5961_v35  ;;  %v6372_v31 = vpack.c.bf16 %v6302_v29, %v6299_v6  ;;  %v6294_v9 = vadd.f32 %v9912_v33, %v9900_v63  ;;  %v6278_v63 = vadd.f32 %v9912_v33, %v9885_v32  ;;  %v8947_v32 = vld [vmem:[#allocation7 + $0xc8] sm:$0xff]   ;;  %v8960_v6 = vld [vmem:[#allocation7 + $0x130] sm:$0xff]  }
 0x5a7   :  { %v8609_v16 = vpop.f32.mrf.mxu0 }
 0x5a8   :  { %8512 = vmatmul.mubr.bf16.gmra.mxu1 %v8935_v25  ;;  %v6315_v50 = vadd.f32 %v8609_v16, %v9912_v33  ;;  %v6371_v49 = vpack.c.bf16 %v6294_v9, %v6291_v51  ;;  %v6369_v34 = vpack.c.bf16 %v6278_v63, %v6275_v57 }
 0x5a9   :  { %8560 = vmatpush3.bf16.msra.mxu1 %v5961_v35  ;;  %v6306_v36 = vpop.f32.mrf.mxu0  ;;  %8515 = vmatprep.mubr.bf16.mxu1 %v8936_v3  ;;  %v6283_v35 = vadd.f32 %v9876_v21, %v9912_v33  ;;  %v7254_v21 = vld [vmem:[#allocation10 + $0xe] ss:$0 sm:$0xff] }
 0x5aa   :  { %8561 = vmatprep.subr.bf16.mxu1 %v5960_v41  ;;  %v6307_v48 = vadd.f32 %v9912_v33, %v6306_v36 }
 0x5ab   :  { %v8610_v53 = vpop.f32.mrf.mxu0  ;;  %v6370_v25 = vpack.c.bf16 %v6286_v52, %v6283_v35 }
 0x5ac   :  { %v6318_v39 = vadd.f32 %v8610_v53, %v9912_v33 }
 0x5ad   :  { %8562 = vmatpush3.bf16.msra.mxu1 %v5960_v41  ;;  %v6309_v60 = vpop.f32.mrf.mxu0 }
 0x5ae   :  { %8563 = vmatprep.subr.bf16.mxu1 %v5959_v45  ;;  %v6374_v61 = vpack.c.bf16 %v6318_v39, %v6315_v50  ;;  %v6310_v1 = vadd.f32 %v9912_v33, %v6309_v60 }
 0x5af   :  { %v8613_v59 = vpop.f32.mrf.mxu0 }
 0x5b0   :  { %8516 = vmatmul.mubr.bf16.gmra.mxu1 %v8937_v2  ;;  %v6331_v14 = vadd.f32 %v8613_v59, %v9912_v33  ;;  %v6373_v62 = vpack.c.bf16 %v6310_v1, %v6307_v48  ;;  %v8954_v48 = vld [vmem:[#allocation7 + $0x100] sm:$0xff]  }
 0x5b1   :  { %8564 = vmatpush3.bf16.msra.mxu1 %v5959_v45  ;;  %v6322_v30 = vpop.f32.mrf.mxu0  ;;  %8567 = vmatprep.mubr.bf16.mxu1 %v8938_v19 }
 0x5b2   :  { %8565 = vmatprep.subr.bf16.mxu1 %v5958_v0  ;;  %v6323_v12 = vadd.f32 %v9912_v33, %v6322_v30 }
 0x5b3   :  { %v8614_v27 = vpop.f32.mrf.mxu0 }
 0x5b4   :  { %v6334_v23 = vadd.f32 %v8614_v27, %v9912_v33  ;;  %v8950_v27 = vld [vmem:[#allocation7 + $0xe0] sm:$0xff]  }
 0x5b5   :  { %8566 = vmatpush3.bf16.msra.mxu1 %v5958_v0  ;;  %v6325_v37 = vpop.f32.mrf.mxu0 }
 0x5b6   :  { %v6376_v54 = vpack.c.bf16 %v6334_v23, %v6331_v14  ;;  %v6326_v44 = vadd.f32 %v9912_v33, %v6325_v37  ;;  %v8949_v33 = vld [vmem:[#allocation7 + $0xd8] sm:$0xff]  }
 0x5b7   :  { %v9918_v42 = vpop.f32.mrf.mxu0 }
 0x5b8   :  { %v6375_v28 = vpack.c.bf16 %v6326_v44, %v6323_v12  ;;  %8568 = vmatmul.mubr.bf16.vlgmr.msra.gmra.mxu1 %v8939_v40  ;;  %8615 = vmatprep.subr.bf16.mxu1 %v6376_v54  ;;  %v8952_v44 = vld [vmem:[#allocation7 + $0xf0] sm:$0xff]  }
 0x5b9   :  { %8616 = vmatpush3.bf16.msra.mxu1 %v6376_v54  ;;  %v9921_v13 = vpop.f32.mrf.mxu0  ;;  %8571 = vmatprep.mubr.bf16.mxu1 %v8940_v17  ;;  %v8951_v54 = vld [vmem:[#allocation7 + $0xe8] sm:$0xff]  }
 0x5ba   :  { %8617 = vmatprep.subr.bf16.mxu1 %v6375_v28 }
 0x5bb   :  { %v9924_v4 = vpop.f32.mrf.mxu0 }
 0x5bd   :  { %8618 = vmatpush3.bf16.msra.mxu1 %v6375_v28  ;;  %v9927_v55 = vpop.f32.mrf.mxu0  ;;  %v6697_v28 = vadd.f32 %v9924_v4, %v7254_v21  ;;  %v8955_v4 = vld [vmem:[#allocation7 + $0x108] sm:$0xff]  }
 0x5be   :  { %8619 = vmatprep.subr.bf16.mxu1 %v6374_v61 }
 0x5bf   :  { %v9930_v8 = vpop.f32.mrf.mxu0 }
 0x5c0   :  { %8572 = vmatmul.mubr.bf16.gmra.mxu1 %v8941_v56  ;;  %v6710_v37 = vadd.f32 %v9930_v8, %v7254_v21  ;;  %v6689_v56 = vadd.f32 %v7254_v21, %v9927_v55  ;;  %v6686_v8 = vadd.f32 %v7254_v21, %v9921_v13  ;;  %v8959_v55 = vld [vmem:[#allocation7 + $0x128] sm:$0xff]   ;;  %v8961_v13 = vld [vmem:[#allocation7 + $0x138] sm:$0xff]  }
 0x5c1   :  { %8620 = vmatpush3.bf16.msra.mxu1 %v6374_v61  ;;  %v9934_v18 = vpop.f32.mrf.mxu0  ;;  %8575 = vmatprep.mubr.bf16.mxu1 %v8942_v15  ;;  %v6694_v61 = vadd.f32 %v9918_v42, %v7254_v21  ;;  %v8953_v15 = vld [vmem:[#allocation7 + $0xf8] sm:$0xff]  }
 0x5c2   :  { %8621 = vmatprep.subr.bf16.mxu1 %v6373_v62  ;;  %v6702_v39 = vadd.f32 %v7254_v21, %v9934_v18  ;;  %v6780_v29 = vpack.c.bf16 %v6689_v56, %v6686_v8  ;;  %v8957_v42 = vld [vmem:[#allocation7 + $0x118] sm:$0xff]   ;;  %v8958_v18 = vld [vmem:[#allocation7 + $0x120] sm:$0xff]  }
 0x5c3   :  { %v8670_v24 = vpop.f32.mrf.mxu0  ;;  %v6781_v1 = vpack.c.bf16 %v6697_v28, %v6694_v61 }
 0x5c4   :  { %v6713_v23 = vadd.f32 %v8670_v24, %v7254_v21 }
 0x5c5   :  { %8622 = vmatpush3.bf16.msra.mxu1 %v6373_v62  ;;  %v9940_v11 = vpop.f32.mrf.mxu0  ;;  %v8956_v62 = vld [vmem:[#allocation7 + $0x110] sm:$0xff]  }
 0x5c6   :  { %8623 = vmatprep.subr.bf16.mxu1 %v6372_v31  ;;  %v6783_v17 = vpack.c.bf16 %v6713_v23, %v6710_v37  ;;  %v6705_v12 = vadd.f32 %v7254_v21, %v9940_v11 }
 0x5c7   :  { %v8673_v38 = vpop.f32.mrf.mxu0 }
 0x5c8   :  { %8576 = vmatmul.mubr.bf16.gmra.mxu1 %v8943_v26  ;;  %v6726_v59 = vadd.f32 %v8673_v38, %v7254_v21  ;;  %v6782_v50 = vpack.c.bf16 %v6705_v12, %v6702_v39 }
 0x5c9   :  { %8624 = vmatpush3.bf16.msra.mxu1 %v6372_v31  ;;  %v6717_v20 = vpop.f32.mrf.mxu0  ;;  %8579 = vmatprep.mubr.bf16.mxu1 %v8944_v58 }
 0x5ca   :  { %8625 = vmatprep.subr.bf16.mxu1 %v6371_v49  ;;  %v6718_v14 = vadd.f32 %v7254_v21, %v6717_v20 }
 0x5cb   :  { %v8674_v46 = vpop.f32.mrf.mxu0 }
 0x5cc   :  { %v6729_v22 = vadd.f32 %v8674_v46, %v7254_v21 }
 0x5cd   :  { %8626 = vmatpush3.bf16.msra.mxu1 %v6371_v49  ;;  %v6720_v3 = vpop.f32.mrf.mxu0 }
 0x5ce   :  { %8627 = vmatprep.subr.bf16.mxu1 %v6370_v25  ;;  %v6785_v0 = vpack.c.bf16 %v6729_v22, %v6726_v59  ;;  %v6721_v30 = vadd.f32 %v7254_v21, %v6720_v3 }
 0x5cf   :  { %v8677_v16 = vpop.f32.mrf.mxu0 }
 0x5d0   :  { %8580 = vmatmul.mubr.bf16.gmra.mxu1 %v8945_v10  ;;  %v6742_v47 = vadd.f32 %v8677_v16, %v7254_v21  ;;  %v6784_v40 = vpack.c.bf16 %v6721_v30, %v6718_v14 }
 0x5d1   :  { %8628 = vmatpush3.bf16.msra.mxu1 %v6370_v25  ;;  %v6733_v41 = vpop.f32.mrf.mxu0  ;;  %8631 = vmatprep.mubr.bf16.mxu1 %v8946_v7 }
 0x5d2   :  { %8629 = vmatprep.subr.bf16.mxu1 %v6369_v34  ;;  %v6734_v2 = vadd.f32 %v7254_v21, %v6733_v41 }
 0x5d3   :  { %v8678_v36 = vpop.f32.mrf.mxu0 }
 0x5d4   :  { %v6745_v53 = vadd.f32 %v8678_v36, %v7254_v21 }
 0x5d5   :  { %8630 = vmatpush3.bf16.msra.mxu1 %v6369_v34  ;;  %v6736_v45 = vpop.f32.mrf.mxu0 }
 0x5d6   :  { %v6787_v60 = vpack.c.bf16 %v6745_v53, %v6742_v47  ;;  %v6737_v19 = vadd.f32 %v7254_v21, %v6736_v45 }
 0x5d8   :  { %v6786_v5 = vpack.c.bf16 %v6737_v19, %v6734_v2  ;;  %8632 = vmatmul.mubr.bf16.vlgmr.msra.gmra.mxu1 %v8947_v32  ;;  %8679 = vmatprep.subr.bf16.mxu1 %v6787_v60 }
 0x5d9   :  { %8680 = vmatpush3.bf16.msra.mxu1 %v6787_v60  ;;  %8635 = vmatprep.mubr.bf16.mxu1 %v8948_v43 }
 0x5da   :  { %8681 = vmatprep.subr.bf16.mxu1 %v6786_v5 }
 0x5dd   :  { %8682 = vmatpush3.bf16.msra.mxu1 %v6786_v5 }
 0x5de   :  { %8683 = vmatprep.subr.bf16.mxu1 %v6785_v0 }
 0x5e0   :  { %8636 = vmatmul.mubr.bf16.gmra.mxu1 %v8949_v33 }
 0x5e1   :  { %8684 = vmatpush3.bf16.msra.mxu1 %v6785_v0  ;;  %8639 = vmatprep.mubr.bf16.mxu1 %v8950_v27 }
 0x5e2   :  { %8685 = vmatprep.subr.bf16.mxu1 %v6784_v40 }
 0x5e5   :  { %8686 = vmatpush3.bf16.msra.mxu1 %v6784_v40 }
 0x5e6   :  { %8687 = vmatprep.subr.bf16.mxu1 %v6783_v17 }
 0x5e8   :  { %8640 = vmatmul.mubr.bf16.gmra.mxu1 %v8951_v54 }
 0x5e9   :  { %8688 = vmatpush3.bf16.msra.mxu1 %v6783_v17  ;;  %8643 = vmatprep.mubr.bf16.mxu1 %v8952_v44 }
 0x5ea   :  { %8689 = vmatprep.subr.bf16.mxu1 %v6782_v50 }
 0x5ed   :  { %8690 = vmatpush3.bf16.msra.mxu1 %v6782_v50 }
 0x5ee   :  { %8691 = vmatprep.subr.bf16.mxu1 %v6781_v1 }
 0x5f0   :  { %8644 = vmatmul.mubr.bf16.gmra.mxu1 %v8953_v15 }
 0x5f1   :  { %8692 = vmatpush3.bf16.msra.mxu1 %v6781_v1  ;;  %8695 = vmatprep.mubr.bf16.mxu1 %v8954_v48 }
 0x5f2   :  { %8693 = vmatprep.subr.bf16.mxu1 %v6780_v29 }
 0x5f5   :  { %8694 = vmatpush3.bf16.msra.mxu1 %v6780_v29 }
 0x5f8   :  { %8696 = vmatmul.mubr.bf16.vlgmr.msra.gmra.mxu1 %v8955_v4 }
 0x5f9   :  { %8699 = vmatprep.mubr.bf16.mxu1 %v8956_v62 }
 0x600   :  { %8700 = vmatmul.mubr.bf16.gmra.mxu1 %v8957_v42 }
 0x601   :  { %8703 = vmatprep.mubr.bf16.mxu1 %v8958_v18 }
 0x608   :  { %8704 = vmatmul.mubr.bf16.gmra.mxu1 %v8959_v55 }
 0x609   :  { %8707 = vmatprep.mubr.bf16.mxu1 %v8960_v6 }
 0x610   :  { %8708 = vmatmul.mubr.bf16.gmra.mxu1 %v8961_v13 }
 0x638   :  { %v8441_v24 = vpop.f32.mrf.mxu1 }
 0x63a   :  { %v5226_v31 = vpop.f32.mrf.mxu1 }
 0x63c   :  { %v8442_v9 = vpop.f32.mrf.mxu1 }
 0x63e   :  { %v5229_v26 = vpop.f32.mrf.mxu1 }
 0x640   :  { %v8445_v11 = vpop.f32.mrf.mxu1 }
 0x642   :  { %v5242_v58 = vpop.f32.mrf.mxu1 }
 0x644   :  { %v8446_v51 = vpop.f32.mrf.mxu1 }
 0x646   :  { %v5245_v38 = vpop.f32.mrf.mxu1 }
 0x648   :  { %v8449_v52 = vpop.f32.mrf.mxu1 }
 0x64a   :  { %v5258_v49 = vpop.f32.mrf.mxu1 }
 0x64c   :  { %v8450_v20 = vpop.f32.mrf.mxu1 }
 0x64e   :  { %v5261_v35 = vpop.f32.mrf.mxu1 }
 0x650   :  { %v8453_v46 = vpop.f32.mrf.mxu1 }
 0x652   :  { %v5274_v25 = vpop.f32.mrf.mxu1 }
 0x654   :  { %v8454_v63 = vpop.f32.mrf.mxu1 }
 0x656   :  { %v5277_v10 = vpop.f32.mrf.mxu1 }
 0x658   :  { %v8505_v3 = vpop.f32.mrf.mxu1 }
 0x65a   :  { %v5637_v7 = vpop.f32.mrf.mxu1 }
 0x65c   :  { %v8506_v57 = vpop.f32.mrf.mxu1 }
 0x65e   :  { %v5640_v16 = vpop.f32.mrf.mxu1 }
 0x660   :  { %v8509_v34 = vpop.f32.mrf.mxu1 }
 0x662   :  { %v5653_v41 = vpop.f32.mrf.mxu1 }
 0x664   :  { %v8510_v21 = vpop.f32.mrf.mxu1 }
 0x666   :  { %v9959_v36 = vpop.f32.mrf.mxu1 }
 0x668   :  { %v9961_v47 = vpop.f32.mrf.mxu1 }
 0x66a   :  { %v9963_v53 = vpop.f32.mrf.mxu1 }
 0x66c   :  { %v9965_v32 = vpop.f32.mrf.mxu1 }
 0x66e   :  { %v9967_v45 = vpop.f32.mrf.mxu1 }
 0x670   :  { %v9969_v43 = vpop.f32.mrf.mxu1 }
 0x672   :  { %v9971_v2 = vpop.f32.mrf.mxu1 }
 0x674   :  { %v9973_v60 = vpop.f32.mrf.mxu1 }
 0x676   :  { %v9975_v19 = vpop.f32.mrf.mxu1 }
 0x678   :  { %v8569_v22 = vpop.f32.mrf.mxu1 }
 0x67a   :  { %v6048_v5 = vpop.f32.mrf.mxu1 }
 0x67c   :  { %v8570_v59 = vpop.f32.mrf.mxu1 }
 0x67e   :  { %v6051_v0 = vpop.f32.mrf.mxu1 }
 0x680   :  { %v8573_v30 = vpop.f32.mrf.mxu1 }
 0x682   :  { %v6064_v33 = vpop.f32.mrf.mxu1 }
 0x684   :  { %v8574_v27 = vpop.f32.mrf.mxu1 }
 0x686   :  { %v6067_v14 = vpop.f32.mrf.mxu1 }
 0x688   :  { %v8577_v23 = vpop.f32.mrf.mxu1 }
 0x68a   :  { %v6080_v40 = vpop.f32.mrf.mxu1 }
 0x68c   :  { %v8578_v37 = vpop.f32.mrf.mxu1 }
 0x68e   :  { %v6083_v17 = vpop.f32.mrf.mxu1 }
 0x690   :  { %v8581_v12 = vpop.f32.mrf.mxu1 }
 0x692   :  { %v6096_v54 = vpop.f32.mrf.mxu1 }
 0x694   :  { %v8582_v44 = vpop.f32.mrf.mxu1 }
 0x696   :  { %v6099_v39 = vpop.f32.mrf.mxu1 }
 0x698   :  { %v8633_v28 = vpop.f32.mrf.mxu1 }
 0x69a   :  { %v6459_v50 = vpop.f32.mrf.mxu1 }
 0x69c   :  { %v8634_v61 = vpop.f32.mrf.mxu1 }
 0x69e   :  { %v6462_v1 = vpop.f32.mrf.mxu1 }
 0x6a0   :  { %v8637_v56 = vpop.f32.mrf.mxu1 }
 0x6a2   :  { %v6475_v15 = vpop.f32.mrf.mxu1 }
 0x6a4   :  { %v8638_v48 = vpop.f32.mrf.mxu1 }
 0x6a6   :  { %v6478_v8 = vpop.f32.mrf.mxu1 }
 0x6a8   :  { %v8641_v29 = vpop.f32.mrf.mxu1 }
 0x6aa   :  { %v6491_v4 = vpop.f32.mrf.mxu1 }
 0x6ac   :  { %v8642_v62 = vpop.f32.mrf.mxu1 }
 0x6ae   :  { %v6494_v42 = vpop.f32.mrf.mxu1 }
 0x6b0   :  { %v8645_v18 = vpop.f32.mrf.mxu1 }
 0x6b2   :  { %v6507_v55 = vpop.f32.mrf.mxu1 }
 0x6b4   :  { %v8646_v6 = vpop.f32.mrf.mxu1 }
 0x6b6   :  { %v6510_v13 = vpop.f32.mrf.mxu1 }
 0x6b8   :  { %v8697_v24 = vpop.f32.mrf.mxu1 }
 0x6b9   :  { %v6935_v31 = vadd.f32 %v8697_v24, %v8505_v3 }
 0x6ba   :  { %v6870_v9 = vpop.f32.mrf.mxu1 }
 0x6bb   :  { %6983 = vst [vmem:[#allocation12 + $0x10] sm:$0xff] %v6935_v31  ;;  %v6933_v26 = vadd.f32 %v6870_v9, %v5637_v7 }
 0x6bc   :  { %v8698_v11 = vpop.f32.mrf.mxu1 }
 0x6bd   :  { %6981 = vst [vmem:[#allocation12] sm:$0xff] %v6933_v26  ;;  %v6936_v58 = vadd.f32 %v8698_v11, %v8506_v57 }
 0x6be   :  { %v6873_v51 = vpop.f32.mrf.mxu1 }
 0x6bf   :  { %6984 = vst [vmem:[#allocation12 + $0x18] sm:$0xff] %v6936_v58  ;;  %v6934_v38 = vadd.f32 %v6873_v51, %v5640_v16 }
 0x6c0   :  { %v8701_v52 = vpop.f32.mrf.mxu1 }
 0x6c1   :  { %6982 = vst [vmem:[#allocation12 + $0x8] sm:$0xff] %v6934_v38  ;;  %v6939_v49 = vadd.f32 %v8701_v52, %v8509_v34 }
 0x6c2   :  { %v6886_v20 = vpop.f32.mrf.mxu1 }
 0x6c3   :  { %6987 = vst [vmem:[#allocation12 + $0x30] sm:$0xff] %v6939_v49  ;;  %v6937_v35 = vadd.f32 %v6886_v20, %v5653_v41 }
 0x6c4   :  { %v8702_v46 = vpop.f32.mrf.mxu1 }
 0x6c5   :  { %6985 = vst [vmem:[#allocation12 + $0x20] sm:$0xff] %v6937_v35  ;;  %v6940_v25 = vadd.f32 %v8702_v46, %v8510_v21 }
 0x6c6   :  { %v6889_v63 = vpop.f32.mrf.mxu1 }
 0x6c7   :  { %6988 = vst [vmem:[#allocation12 + $0x38] sm:$0xff] %v6940_v25  ;;  %v6938_v10 = vadd.f32 %v6889_v63, %v9959_v36 }
 0x6c8   :  { %v8705_v3 = vpop.f32.mrf.mxu1 }
 0x6c9   :  { %6986 = vst [vmem:[#allocation12 + $0x28] sm:$0xff] %v6938_v10  ;;  %v6943_v7 = vadd.f32 %v8705_v3, %v9961_v47 }
 0x6ca   :  { %v6902_v57 = vpop.f32.mrf.mxu1 }
 0x6cb   :  { %6991 = vst [vmem:[#allocation12 + $0x50] sm:$0xff] %v6943_v7  ;;  %v6941_v16 = vadd.f32 %v6902_v57, %v9963_v53 }
 0x6cc   :  { %v8706_v22 = vpop.f32.mrf.mxu1 }
 0x6cd   :  { %6989 = vst [vmem:[#allocation12 + $0x40] sm:$0xff] %v6941_v16  ;;  %v6944_v34 = vadd.f32 %v8706_v22, %v9965_v32 }
 0x6ce   :  { %v6905_v41 = vpop.f32.mrf.mxu1 }
 0x6cf   :  { %6992 = vst [vmem:[#allocation12 + $0x58] sm:$0xff] %v6944_v34  ;;  %v6942_v21 = vadd.f32 %v6905_v41, %v9967_v45 }
 0x6d0   :  { %v8709_v5 = vpop.f32.mrf.mxu1 }
 0x6d1   :  { %6990 = vst [vmem:[#allocation12 + $0x48] sm:$0xff] %v6942_v21  ;;  %v6947_v36 = vadd.f32 %v8709_v5, %v9969_v43 }
 0x6d2   :  { %v6918_v59 = vpop.f32.mrf.mxu1 }
 0x6d3   :  { %6995 = vst [vmem:[#allocation12 + $0x70] sm:$0xff] %v6947_v36  ;;  %v6945_v47 = vadd.f32 %v6918_v59, %v9971_v2 }
 0x6d4   :  { %v8710_v0 = vpop.f32.mrf.mxu1 }
 0x6d5   :  { %6993 = vst [vmem:[#allocation12 + $0x60] sm:$0xff] %v6945_v47  ;;  %v6948_v53 = vadd.f32 %v8710_v0, %v9973_v60 }
 0x6d6   :  { %v6921_v30 = vpop.f32.mrf.mxu1 }
 0x6d7   :  { %6996 = vst [vmem:[#allocation12 + $0x78] sm:$0xff] %v6948_v53  ;;  %v6946_v32 = vadd.f32 %v6921_v30, %v9975_v19 }
 0x6d9   :  { %6994 = vst [vmem:[#allocation12 + $0x68] sm:$0xff] %v6946_v32 }
 0x6da   :  { %9053 = shalt.err (!%p9050_p10)
}
 0x6db   :  { %7008 = dma.vmem_to_hbm [thread:$0]  %s7003_s3, 2048, %s9996_s4, [#allocation6], %s9074_s25, %s9074_s25, %s9075_s26  }
 0x6dc   :  { %9068 = dma.done.wait [#allocation6], 2048  }
 0x6dd   :  { %9069 = vsyncadd [#allocation6], 4294965248 }
 0x6de   :  { %7012 = vsyncpa [#allocation5], 1 }
 0x6df   :  { %7013 = vsyncpa [#allocation8], 1 }
 0x6e0   :  { %7014 = vsyncpa [#allocation11], 1 }
 0x6e1   :  { %7015 = vsyncpa [#allocation6], 1 }

</bundles_post_ra>
